<compile_context>
chip_gen: v6e
topology: v6e:2x2x1
jax: 0.10.0
libtpu: 0.0.40
codegen_flags: <defaults>
</compile_context>

<pallas_src>
import functools

import jax
import jax.numpy as jnp
from jax.experimental import pallas as pl
from jax.experimental.pallas import tpu as pltpu

EPS = 1e-5
LANE = 128


# ----------------------------- kernel helpers ------------------------------

def _conv3x3_im2col(x_halo, w_flat, patch_ref):
    """3x3 'valid' conv on a halo-padded activation via one im2col matmul.

    x_halo:    (H+2, W+2, Cp) activation with a 1-pixel zero halo (f32).
    w_flat:    (9*Cp, Cout) folded HWIO weights, already in the MXU dtype.
    patch_ref: VMEM scratch (H*W, 9*Cp) in the MXU dtype (the im2col buffer).
    returns    (H, W, Cout) float32 (f32 MXU accumulation).
    """
    Hp, Wp, Cp = x_halo.shape
    H, W = Hp - 2, Wp - 2
    xq = x_halo.astype(patch_ref.dtype)
    t = 0
    for dy in range(3):
        for dx in range(3):
            patch_ref[:, t * Cp:(t + 1) * Cp] = (
                xq[dy:dy + H, dx:dx + W, :].reshape(H * W, Cp))
            t += 1
    out = jnp.dot(patch_ref[...], w_flat,
                  preferred_element_type=jnp.float32)      # (H*W, Cout)
    return out.reshape(H, W, w_flat.shape[-1])


def _partial_stats(y):
    """Per-channel (sum, sum-of-squares) partials for BN. y: (H, W, Cp)."""
    yf = y.reshape(-1, y.shape[-1])
    return (jnp.sum(yf, axis=0, keepdims=True),            # (1, Cp)
            jnp.sum(yf * yf, axis=0, keepdims=True))       # (1, Cp)


# -------------------------------- kernels -----------------------------------

def conv_stats_kernel(xp_ref, w_ref, y_ref, s_ref, q_ref, patch_ref):
    """Pass 1: conv1 on the pre-padded input + BN1 partial statistics."""
    y = _conv3x3_im2col(xp_ref[0], w_ref[...], patch_ref)   # (H, W, Cp) f32
    y_ref[0] = y
    s, q = _partial_stats(y)
    s_ref[0] = s
    q_ref[0] = q


def bn_relu_conv_stats_kernel(y1_ref, sc_ref, sh_ref, w_ref,
                              y2_ref, s_ref, q_ref, patch_ref):
    """Pass 2: BN1 (fused scale/shift) + ReLU + conv2 + BN2 partial stats."""
    h = jnp.maximum(y1_ref[0] * sc_ref[...] + sh_ref[...], 0.0)  # (H, W, Cp)
    hp = jnp.pad(h, ((1, 1), (1, 1), (0, 0)))                    # zero halo
    y2 = _conv3x3_im2col(hp, w_ref[...], patch_ref)
    y2_ref[0] = y2
    s, q = _partial_stats(y2)
    s_ref[0] = s
    q_ref[0] = q


def bn_residual_relu_kernel(y2_ref, x_ref, sc_ref, sh_ref, o_ref):
    """Pass 3: BN2 (fused scale/shift) + residual add + ReLU."""
    o_ref[0] = jnp.maximum(
        y2_ref[0] * sc_ref[...] + sh_ref[...] + x_ref[0], 0.0)


# ------------------------------- wrapper -----------------------------------

def _finalize_bn(sum_p, sq_p, gamma_p, beta_p, count):
    """Per-channel partials -> fused BN (scale, shift). Tiny (size-Cp) math."""
    s = jnp.sum(sum_p[:, 0, :], axis=0)
    q = jnp.sum(sq_p[:, 0, :], axis=0)
    mean = s / count
    var = jnp.maximum(q / count - mean * mean, 0.0)   # biased variance
    inv = jax.lax.rsqrt(var + EPS)
    scale = gamma_p * inv
    shift = beta_p - mean * scale
    cp = scale.shape[0]
    return scale.reshape(1, cp), shift.reshape(1, cp)


@functools.partial(jax.jit, static_argnames=("mxu_dtype",))
def resblock_forward(x_nchw, w1_oihw, w2_oihw, gamma1, beta1, gamma2, beta2,
                     mxu_dtype=jnp.bfloat16):
    """x_nchw: (N,C,H,W); conv weights: (C,C,3,3) OIHW; BN params: (C,)."""
    x = jnp.transpose(x_nchw, (0, 2, 3, 1)).astype(jnp.float32)   # NHWC
    N, H, W, C = x.shape
    Cp = ((C + LANE - 1) // LANE) * LANE                          # lane-dense C
    pc = Cp - C

    # Zero-padding the channels keeps BN exact: padded gamma/beta are 0, so
    # padded channels stay identically 0 through conv/BN/ReLU/residual.
    x_cp = jnp.pad(x, ((0, 0), (0, 0), (0, 0), (0, pc)))          # (N,H,W,Cp)
    x_halo = jnp.pad(x_cp, ((0, 0), (1, 1), (1, 1), (0, 0)))      # conv1 halo

    def fold_w(w_oihw):
        w = jnp.transpose(w_oihw, (2, 3, 1, 0)).astype(jnp.float32)  # HWIO
        w = jnp.pad(w, ((0, 0), (0, 0), (0, pc), (0, pc)))           # (3,3,Cp,Cp)
        return w.reshape(9 * Cp, Cp).astype(mxu_dtype)               # folded K
    w1f, w2f = fold_w(w1_oihw), fold_w(w2_oihw)

    g1 = jnp.pad(gamma1.astype(jnp.float32), (0, pc))
    b1 = jnp.pad(beta1.astype(jnp.float32), (0, pc))
    g2 = jnp.pad(gamma2.astype(jnp.float32), (0, pc))
    b2 = jnp.pad(beta2.astype(jnp.float32), (0, pc))

    grid = (N,)
    cparams = pltpu.CompilerParams(
        dimension_semantics=("parallel",),       # shards over v7x's 2 TCs
        vmem_limit_bytes=32 * 1024 * 1024)       # explicit, safe on v5e/v6e/v7x

    act_spec = pl.BlockSpec((1, H, W, Cp), lambda n: (n, 0, 0, 0))
    halo_spec = pl.BlockSpec((1, H + 2, W + 2, Cp), lambda n: (n, 0, 0, 0))
    w_spec = pl.BlockSpec((9 * Cp, Cp), lambda n: (0, 0))          # resident
    vec_spec = pl.BlockSpec((1, Cp), lambda n: (0, 0))             # scale/shift
    stat_spec = pl.BlockSpec((1, 1, Cp), lambda n: (n, 0, 0))

    act_shape = jax.ShapeDtypeStruct((N, H, W, Cp), jnp.float32)
    stat_shape = jax.ShapeDtypeStruct((N, 1, Cp), jnp.float32)
    patch_scratch = pltpu.VMEM((H * W, 9 * Cp), mxu_dtype)         # im2col buf

    # Pass 1: conv1 + BN1 partial stats.
    y1, s1, q1 = pl.pallas_call(
        conv_stats_kernel,
        grid=grid,
        in_specs=[halo_spec, w_spec],
        out_specs=[act_spec, stat_spec, stat_spec],
        out_shape=[act_shape, stat_shape, stat_shape],
        scratch_shapes=[patch_scratch],
        compiler_params=cparams,
    )(x_halo, w1f)

    count = float(N * H * W)
    sc1, sh1 = _finalize_bn(s1, q1, g1, b1, count)

    # Pass 2: BN1 apply + ReLU + conv2 + BN2 partial stats.
    y2, s2, q2 = pl.pallas_call(
        bn_relu_conv_stats_kernel,
        grid=grid,
        in_specs=[act_spec, vec_spec, vec_spec, w_spec],
        out_specs=[act_spec, stat_spec, stat_spec],
        out_shape=[act_shape, stat_shape, stat_shape],
        scratch_shapes=[patch_scratch],
        compiler_params=cparams,
    )(y1, sc1, sh1, w2f)

    sc2, sh2 = _finalize_bn(s2, q2, g2, b2, count)

    # Pass 3: BN2 apply + residual + ReLU.
    out_p = pl.pallas_call(
        bn_residual_relu_kernel,
        grid=grid,
        in_specs=[act_spec, act_spec, vec_spec, vec_spec],
        out_specs=act_spec,
        out_shape=act_shape,
        compiler_params=cparams,
    )(y2, x_cp, sc2, sh2)

    out = out_p[..., :C]                                  # drop channel padding
    return jnp.transpose(out, (0, 3, 1, 2))               # back to NCHW


# ------------------------ pure-JAX reference (check) ------------------------

def resblock_reference(x_nchw, w1_oihw, w2_oihw, gamma1, beta1, gamma2, beta2):
    x = jnp.transpose(x_nchw, (0, 2, 3, 1)).astype(jnp.float32)

    def conv(a, w_oihw):
        w = jnp.transpose(w_oihw, (2, 3, 1, 0)).astype(jnp.float32)
        return jax.lax.conv_general_dilated(
            a, w, window_strides=(1, 1), padding="SAME",
            dimension_numbers=("NHWC", "HWIO", "NHWC"))

    def bn(a, g, b):
        m = a.mean((0, 1, 2), keepdims=True)
        v = ((a - m) ** 2).mean((0, 1, 2), keepdims=True)
        return (a - m) * jax.lax.rsqrt(v + EPS) * g.reshape(1, 1, 1, -1) \
            + b.reshape(1, 1, 1, -1)

    out = jnp.maximum(bn(conv(x, w1_oihw), gamma1, beta1), 0.0)
    out = bn(conv(out, w2_oihw), gamma2, beta2) + x
    out = jnp.maximum(out, 0.0)
    return jnp.transpose(out, (0, 3, 1, 2))


# --------------------------------- main -------------------------------------

if __name__ == "__main__":
    N, C, H, W = 2, 4, 16, 16
    key = jax.random.PRNGKey(0)
    kx, kw1, kw2, kg1, kb1, kg2, kb2 = jax.random.split(key, 7)

    x = jax.random.normal(kx, (N, C, H, W), jnp.float32)
    # Conv2d(C, C, 3, padding=1, bias=False) weights, OIHW, kaiming-ish scale.
    fan_in = C * 3 * 3
    bound = (1.0 / fan_in) ** 0.5
    w1 = jax.random.uniform(kw1, (C, C, 3, 3), jnp.float32, -bound, bound)
    w2 = jax.random.uniform(kw2, (C, C, 3, 3), jnp.float32, -bound, bound)
    # BatchNorm affine params (perturbed so the affine path is exercised).
    g1 = 1.0 + 0.1 * jax.random.normal(kg1, (C,), jnp.float32)
    b1 = 0.1 * jax.random.normal(kb1, (C,), jnp.float32)
    g2 = 1.0 + 0.1 * jax.random.normal(kg2, (C,), jnp.float32)
    b2 = 0.1 * jax.random.normal(kb2, (C,), jnp.float32)

    ref = jax.block_until_ready(resblock_reference(x, w1, w2, g1, b1, g2, b2))

    # f32 MXU-operand path: tight numerical check against the XLA reference.
    out_f32 = jax.block_until_ready(
        resblock_forward(x, w1, w2, g1, b1, g2, b2, mxu_dtype=jnp.float32))
    assert out_f32.shape == (N, C, H, W)
    assert jnp.allclose(out_f32, ref, atol=1e-3, rtol=1e-3), \
        f"f32 path max abs err {jnp.max(jnp.abs(out_f32 - ref))}"

    # bf16 MXU-operand fast path (v6e/v7x feedback): reduced-precision matmul
    # inputs with f32 accumulation -> looser tolerance vs the f32 reference.
    out_bf16 = jax.block_until_ready(
        resblock_forward(x, w1, w2, g1, b1, g2, b2, mxu_dtype=jnp.bfloat16))
    assert out_bf16.shape == (N, C, H, W)
    assert jnp.allclose(out_bf16, ref, atol=1e-1, rtol=1e-1), \
        f"bf16 path max abs err {jnp.max(jnp.abs(out_bf16 - ref))}"

    print("KERNEL_OK")
</pallas_src>

<mosaic_0001>
module attributes {stable_mosaic.version = 11 : i64} {
  func.func @conv_stats_kernel(%arg0: i32, %arg1: memref<1x18x18x128xf32, #tpu.memory_space<vmem>>, %arg2: memref<1152x128xf32, #tpu.memory_space<vmem>>, %arg3: memref<1x16x16x128xf32, #tpu.memory_space<vmem>>, %arg4: memref<1x1x128xf32, #tpu.memory_space<vmem>>, %arg5: memref<1x1x128xf32, #tpu.memory_space<vmem>>, %arg6: memref<256x1152xf32, #tpu.memory_space<vmem>>) attributes {dimension_semantics = [#tpu.dimension_semantics<parallel>], iteration_bounds = array<i64: 2>, scalar_prefetch = 0 : i64, scratch_operands = 1 : i64, tpu.core_type = #tpu.core_type<tc>, window_params = [{transform_indices = @transform_0, window_bounds = array<i64: 1, 18, 18, 128>}, {pipeline_mode = #tpu.pipeline_mode<synchronous>, transform_indices = @transform_1, window_bounds = array<i64: 1152, 128>}, {transform_indices = @transform_2, window_bounds = array<i64: 1, 16, 16, 128>}, {transform_indices = @transform_3, window_bounds = array<i64: 1, 1, 128>}, {transform_indices = @transform_4, window_bounds = array<i64: 1, 1, 128>}]} {
    %c0 = arith.constant 0 : index
    %c0_0 = arith.constant 0 : index
    %c0_1 = arith.constant 0 : index
    %c0_2 = arith.constant 0 : index
    %0 = vector.load %arg1[%c0, %c0_0, %c0_1, %c0_2] : memref<1x18x18x128xf32, #tpu.memory_space<vmem>>, vector<1x18x18x128xf32>
    %1 = vector.shape_cast %0 : vector<1x18x18x128xf32> to vector<18x18x128xf32>
    %c0_3 = arith.constant 0 : index
    %c0_4 = arith.constant 0 : index
    %2 = vector.load %arg2[%c0_3, %c0_4] : memref<1152x128xf32, #tpu.memory_space<vmem>>, vector<1152x128xf32>
    %3 = vector.extract_strided_slice %1 {offsets = [0, 0, 0], sizes = [16, 16, 128], strides = [1, 1, 1]} : vector<18x18x128xf32> to vector<16x16x128xf32>
    %4 = vector.shape_cast %3 : vector<16x16x128xf32> to vector<256x128xf32>
    %c0_5 = arith.constant 0 : index
    %c0_6 = arith.constant 0 : index
    %5 = vector.load %arg6[%c0_5, %c0_6] : memref<256x1152xf32, #tpu.memory_space<vmem>>, vector<256x128xf32>
    tpu.vector_store %arg6[%c0_5, %c0_6], %4 {strides = array<i32>} : memref<256x1152xf32, #tpu.memory_space<vmem>>, vector<256x128xf32>,
    %6 = vector.extract_strided_slice %1 {offsets = [0, 1, 0], sizes = [16, 16, 128], strides = [1, 1, 1]} : vector<18x18x128xf32> to vector<16x16x128xf32>
    %7 = vector.shape_cast %6 : vector<16x16x128xf32> to vector<256x128xf32>
    %c0_7 = arith.constant 0 : index
    %c128 = arith.constant 128 : index
    %8 = vector.load %arg6[%c0_7, %c128] : memref<256x1152xf32, #tpu.memory_space<vmem>>, vector<256x128xf32>
    tpu.vector_store %arg6[%c0_7, %c128], %7 {strides = array<i32>} : memref<256x1152xf32, #tpu.memory_space<vmem>>, vector<256x128xf32>,
    %9 = vector.extract_strided_slice %1 {offsets = [0, 2, 0], sizes = [16, 16, 128], strides = [1, 1, 1]} : vector<18x18x128xf32> to vector<16x16x128xf32>
    %10 = vector.shape_cast %9 : vector<16x16x128xf32> to vector<256x128xf32>
    %c0_8 = arith.constant 0 : index
    %c256 = arith.constant 256 : index
    %11 = vector.load %arg6[%c0_8, %c256] : memref<256x1152xf32, #tpu.memory_space<vmem>>, vector<256x128xf32>
    tpu.vector_store %arg6[%c0_8, %c256], %10 {strides = array<i32>} : memref<256x1152xf32, #tpu.memory_space<vmem>>, vector<256x128xf32>,
    %12 = vector.extract_strided_slice %1 {offsets = [1, 0, 0], sizes = [16, 16, 128], strides = [1, 1, 1]} : vector<18x18x128xf32> to vector<16x16x128xf32>
    %13 = vector.shape_cast %12 : vector<16x16x128xf32> to vector<256x128xf32>
    %c0_9 = arith.constant 0 : index
    %c384 = arith.constant 384 : index
    %14 = vector.load %arg6[%c0_9, %c384] : memref<256x1152xf32, #tpu.memory_space<vmem>>, vector<256x128xf32>
    tpu.vector_store %arg6[%c0_9, %c384], %13 {strides = array<i32>} : memref<256x1152xf32, #tpu.memory_space<vmem>>, vector<256x128xf32>,
    %15 = vector.extract_strided_slice %1 {offsets = [1, 1, 0], sizes = [16, 16, 128], strides = [1, 1, 1]} : vector<18x18x128xf32> to vector<16x16x128xf32>
    %16 = vector.shape_cast %15 : vector<16x16x128xf32> to vector<256x128xf32>
    %c0_10 = arith.constant 0 : index
    %c512 = arith.constant 512 : index
    %17 = vector.load %arg6[%c0_10, %c512] : memref<256x1152xf32, #tpu.memory_space<vmem>>, vector<256x128xf32>
    tpu.vector_store %arg6[%c0_10, %c512], %16 {strides = array<i32>} : memref<256x1152xf32, #tpu.memory_space<vmem>>, vector<256x128xf32>,
    %18 = vector.extract_strided_slice %1 {offsets = [1, 2, 0], sizes = [16, 16, 128], strides = [1, 1, 1]} : vector<18x18x128xf32> to vector<16x16x128xf32>
    %19 = vector.shape_cast %18 : vector<16x16x128xf32> to vector<256x128xf32>
    %c0_11 = arith.constant 0 : index
    %c640 = arith.constant 640 : index
    %20 = vector.load %arg6[%c0_11, %c640] : memref<256x1152xf32, #tpu.memory_space<vmem>>, vector<256x128xf32>
    tpu.vector_store %arg6[%c0_11, %c640], %19 {strides = array<i32>} : memref<256x1152xf32, #tpu.memory_space<vmem>>, vector<256x128xf32>,
    %21 = vector.extract_strided_slice %1 {offsets = [2, 0, 0], sizes = [16, 16, 128], strides = [1, 1, 1]} : vector<18x18x128xf32> to vector<16x16x128xf32>
    %22 = vector.shape_cast %21 : vector<16x16x128xf32> to vector<256x128xf32>
    %c0_12 = arith.constant 0 : index
    %c768 = arith.constant 768 : index
    %23 = vector.load %arg6[%c0_12, %c768] : memref<256x1152xf32, #tpu.memory_space<vmem>>, vector<256x128xf32>
    tpu.vector_store %arg6[%c0_12, %c768], %22 {strides = array<i32>} : memref<256x1152xf32, #tpu.memory_space<vmem>>, vector<256x128xf32>,
    %24 = vector.extract_strided_slice %1 {offsets = [2, 1, 0], sizes = [16, 16, 128], strides = [1, 1, 1]} : vector<18x18x128xf32> to vector<16x16x128xf32>
    %25 = vector.shape_cast %24 : vector<16x16x128xf32> to vector<256x128xf32>
    %c0_13 = arith.constant 0 : index
    %c896 = arith.constant 896 : index
    %26 = vector.load %arg6[%c0_13, %c896] : memref<256x1152xf32, #tpu.memory_space<vmem>>, vector<256x128xf32>
    tpu.vector_store %arg6[%c0_13, %c896], %25 {strides = array<i32>} : memref<256x1152xf32, #tpu.memory_space<vmem>>, vector<256x128xf32>,
    %27 = vector.extract_strided_slice %1 {offsets = [2, 2, 0], sizes = [16, 16, 128], strides = [1, 1, 1]} : vector<18x18x128xf32> to vector<16x16x128xf32>
    %28 = vector.shape_cast %27 : vector<16x16x128xf32> to vector<256x128xf32>
    %c0_14 = arith.constant 0 : index
    %c1024 = arith.constant 1024 : index
    %29 = vector.load %arg6[%c0_14, %c1024] : memref<256x1152xf32, #tpu.memory_space<vmem>>, vector<256x128xf32>
    tpu.vector_store %arg6[%c0_14, %c1024], %28 {strides = array<i32>} : memref<256x1152xf32, #tpu.memory_space<vmem>>, vector<256x128xf32>,
    %c0_15 = arith.constant 0 : index
    %c0_16 = arith.constant 0 : index
    %30 = vector.load %arg6[%c0_15, %c0_16] : memref<256x1152xf32, #tpu.memory_space<vmem>>, vector<256x1152xf32>
    %cst = arith.constant dense<0.000000e+00> : vector<256x128xf32>
    %31 = tpu.matmul %30, %2, %cst {dimension_numbers = #tpu.dot_dimension_numbers<[1], [0], [0], [1], [0, 0, 1, 1], [], []>} : vector<256x1152xf32>, vector<1152x128xf32>, vector<256x128xf32> -> vector<256x128xf32>
    %32 = vector.shape_cast %31 : vector<256x128xf32> to vector<16x16x128xf32>
    %c0_17 = arith.constant 0 : index
    %c0_18 = arith.constant 0 : index
    %c0_19 = arith.constant 0 : index
    %c0_20 = arith.constant 0 : index
    %33 = vector.load %arg3[%c0_17, %c0_18, %c0_19, %c0_20] : memref<1x16x16x128xf32, #tpu.memory_space<vmem>>, vector<1x16x16x128xf32>
    %34 = vector.shape_cast %33 : vector<1x16x16x128xf32> to vector<16x16x128xf32>
    %35 = vector.shape_cast %32 : vector<16x16x128xf32> to vector<1x16x16x128xf32>
    tpu.vector_store %arg3[%c0_17, %c0_18, %c0_19, %c0_20], %35 {strides = array<i32>} : memref<1x16x16x128xf32, #tpu.memory_space<vmem>>, vector<1x16x16x128xf32>,
    %36 = vector.shape_cast %32 : vector<16x16x128xf32> to vector<256x128xf32>
    %cst_21 = arith.constant dense<0.000000e+00> : vector<128xf32>
    %37 = vector.multi_reduction <add>, %36, %cst_21 [0] : vector<256x128xf32> to vector<128xf32>
    %38 = vector.shape_cast %37 : vector<128xf32> to vector<1x128xf32>
    %39 = arith.mulf %36, %36 : vector<256x128xf32>
    %cst_22 = arith.constant dense<0.000000e+00> : vector<128xf32>
    %40 = vector.multi_reduction <add>, %39, %cst_22 [0] : vector<256x128xf32> to vector<128xf32>
    %41 = vector.shape_cast %40 : vector<128xf32> to vector<1x128xf32>
    %c0_23 = arith.constant 0 : index
    %c0_24 = arith.constant 0 : index
    %c0_25 = arith.constant 0 : index
    %42 = vector.load %arg4[%c0_23, %c0_24, %c0_25] : memref<1x1x128xf32, #tpu.memory_space<vmem>>, vector<1x1x128xf32>
    %43 = vector.shape_cast %42 : vector<1x1x128xf32> to vector<1x128xf32>
    %44 = vector.shape_cast %38 : vector<1x128xf32> to vector<1x1x128xf32>
    tpu.vector_store %arg4[%c0_23, %c0_24, %c0_25], %44 {strides = array<i32>} : memref<1x1x128xf32, #tpu.memory_space<vmem>>, vector<1x1x128xf32>,
    %c0_26 = arith.constant 0 : index
    %c0_27 = arith.constant 0 : index
    %c0_28 = arith.constant 0 : index
    %45 = vector.load %arg5[%c0_26, %c0_27, %c0_28] : memref<1x1x128xf32, #tpu.memory_space<vmem>>, vector<1x1x128xf32>
    %46 = vector.shape_cast %45 : vector<1x1x128xf32> to vector<1x128xf32>
    %47 = vector.shape_cast %41 : vector<1x128xf32> to vector<1x1x128xf32>
    tpu.vector_store %arg5[%c0_26, %c0_27, %c0_28], %47 {strides = array<i32>} : memref<1x1x128xf32, #tpu.memory_space<vmem>>, vector<1x1x128xf32>,
    return
  }
  func.func @transform_0(%arg0: i32) -> (i32, i32, i32, i32) {
    %c0_i32 = arith.constant 0 : i32
    %c0_i32_0 = arith.constant 0 : i32
    %c0_i32_1 = arith.constant 0 : i32
    %c0_i32_2 = arith.constant 0 : i32
    return %arg0, %c0_i32, %c0_i32_0, %c0_i32_1 : i32, i32, i32, i32
  }
  func.func @transform_1(%arg0: i32) -> (i32, i32) {
    %c0_i32 = arith.constant 0 : i32
    %c0_i32_0 = arith.constant 0 : i32
    %c0_i32_1 = arith.constant 0 : i32
    return %c0_i32, %c0_i32_0 : i32, i32
  }
  func.func @transform_2(%arg0: i32) -> (i32, i32, i32, i32) {
    %c0_i32 = arith.constant 0 : i32
    %c0_i32_0 = arith.constant 0 : i32
    %c0_i32_1 = arith.constant 0 : i32
    %c0_i32_2 = arith.constant 0 : i32
    return %arg0, %c0_i32, %c0_i32_0, %c0_i32_1 : i32, i32, i32, i32
  }
  func.func @transform_3(%arg0: i32) -> (i32, i32, i32) {
    %c0_i32 = arith.constant 0 : i32
    %c0_i32_0 = arith.constant 0 : i32
    %c0_i32_1 = arith.constant 0 : i32
    return %arg0, %c0_i32, %c0_i32_0 : i32, i32, i32
  }
  func.func @transform_4(%arg0: i32) -> (i32, i32, i32) {
    %c0_i32 = arith.constant 0 : i32
    %c0_i32_0 = arith.constant 0 : i32
    %c0_i32_1 = arith.constant 0 : i32
    return %arg0, %c0_i32, %c0_i32_0 : i32, i32, i32
  }
}

module attributes {stable_mosaic.version = 11 : i64} {
  func.func @bn_residual_relu_kernel(%arg0: i32, %arg1: memref<1x16x16x128xf32, #tpu.memory_space<vmem>>, %arg2: memref<1x16x16x128xf32, #tpu.memory_space<vmem>>, %arg3: memref<1x128xf32, #tpu.memory_space<vmem>>, %arg4: memref<1x128xf32, #tpu.memory_space<vmem>>, %arg5: memref<1x16x16x128xf32, #tpu.memory_space<vmem>>) attributes {dimension_semantics = [#tpu.dimension_semantics<parallel>], iteration_bounds = array<i64: 2>, scalar_prefetch = 0 : i64, scratch_operands = 0 : i64, tpu.core_type = #tpu.core_type<tc>, window_params = [{transform_indices = @transform_0, window_bounds = array<i64: 1, 16, 16, 128>}, {transform_indices = @transform_1, window_bounds = array<i64: 1, 16, 16, 128>}, {pipeline_mode = #tpu.pipeline_mode<synchronous>, transform_indices = @transform_2, window_bounds = array<i64: 1, 128>}, {pipeline_mode = #tpu.pipeline_mode<synchronous>, transform_indices = @transform_3, window_bounds = array<i64: 1, 128>}, {transform_indices = @transform_4, window_bounds = array<i64: 1, 16, 16, 128>}]} {
    %c0 = arith.constant 0 : index
    %c0_0 = arith.constant 0 : index
    %c0_1 = arith.constant 0 : index
    %c0_2 = arith.constant 0 : index
    %0 = vector.load %arg1[%c0, %c0_0, %c0_1, %c0_2] : memref<1x16x16x128xf32, #tpu.memory_space<vmem>>, vector<1x16x16x128xf32>
    %1 = vector.shape_cast %0 : vector<1x16x16x128xf32> to vector<16x16x128xf32>
    %c0_3 = arith.constant 0 : index
    %c0_4 = arith.constant 0 : index
    %2 = vector.load %arg3[%c0_3, %c0_4] : memref<1x128xf32, #tpu.memory_space<vmem>>, vector<1x128xf32>
    %3 = vector.shape_cast %2 : vector<1x128xf32> to vector<1x1x128xf32>
    %4 = vector.broadcast %3 : vector<1x1x128xf32> to vector<16x16x128xf32>
    %5 = arith.mulf %1, %4 : vector<16x16x128xf32>
    %c0_5 = arith.constant 0 : index
    %c0_6 = arith.constant 0 : index
    %6 = vector.load %arg4[%c0_5, %c0_6] : memref<1x128xf32, #tpu.memory_space<vmem>>, vector<1x128xf32>
    %7 = vector.shape_cast %6 : vector<1x128xf32> to vector<1x1x128xf32>
    %8 = vector.broadcast %7 : vector<1x1x128xf32> to vector<16x16x128xf32>
    %9 = arith.addf %5, %8 : vector<16x16x128xf32>
    %c0_7 = arith.constant 0 : index
    %c0_8 = arith.constant 0 : index
    %c0_9 = arith.constant 0 : index
    %c0_10 = arith.constant 0 : index
    %10 = vector.load %arg2[%c0_7, %c0_8, %c0_9, %c0_10] : memref<1x16x16x128xf32, #tpu.memory_space<vmem>>, vector<1x16x16x128xf32>
    %11 = vector.shape_cast %10 : vector<1x16x16x128xf32> to vector<16x16x128xf32>
    %12 = arith.addf %9, %11 : vector<16x16x128xf32>
    %cst = arith.constant 0.000000e+00 : f32
    %13 = vector.broadcast %cst : f32 to vector<16x16x128xf32>
    %14 = arith.maximumf %12, %13 : vector<16x16x128xf32>
    %c0_11 = arith.constant 0 : index
    %c0_12 = arith.constant 0 : index
    %c0_13 = arith.constant 0 : index
    %c0_14 = arith.constant 0 : index
    %15 = vector.load %arg5[%c0_11, %c0_12, %c0_13, %c0_14] : memref<1x16x16x128xf32, #tpu.memory_space<vmem>>, vector<1x16x16x128xf32>
    %16 = vector.shape_cast %15 : vector<1x16x16x128xf32> to vector<16x16x128xf32>
    %17 = vector.shape_cast %14 : vector<16x16x128xf32> to vector<1x16x16x128xf32>
    tpu.vector_store %arg5[%c0_11, %c0_12, %c0_13, %c0_14], %17 {strides = array<i32>} : memref<1x16x16x128xf32, #tpu.memory_space<vmem>>, vector<1x16x16x128xf32>,
    return
  }
  func.func @transform_0(%arg0: i32) -> (i32, i32, i32, i32) {
    %c0_i32 = arith.constant 0 : i32
    %c0_i32_0 = arith.constant 0 : i32
    %c0_i32_1 = arith.constant 0 : i32
    %c0_i32_2 = arith.constant 0 : i32
    return %arg0, %c0_i32, %c0_i32_0, %c0_i32_1 : i32, i32, i32, i32
  }
  func.func @transform_1(%arg0: i32) -> (i32, i32, i32, i32) {
    %c0_i32 = arith.constant 0 : i32
    %c0_i32_0 = arith.constant 0 : i32
    %c0_i32_1 = arith.constant 0 : i32
    %c0_i32_2 = arith.constant 0 : i32
    return %arg0, %c0_i32, %c0_i32_0, %c0_i32_1 : i32, i32, i32, i32
  }
  func.func @transform_2(%arg0: i32) -> (i32, i32) {
    %c0_i32 = arith.constant 0 : i32
    %c0_i32_0 = arith.constant 0 : i32
    %c0_i32_1 = arith.constant 0 : i32
    return %c0_i32, %c0_i32_0 : i32, i32
  }
  func.func @transform_3(%arg0: i32) -> (i32, i32) {
    %c0_i32 = arith.constant 0 : i32
    %c0_i32_0 = arith.constant 0 : i32
    %c0_i32_1 = arith.constant 0 : i32
    return %c0_i32, %c0_i32_0 : i32, i32
  }
  func.func @transform_4(%arg0: i32) -> (i32, i32, i32, i32) {
    %c0_i32 = arith.constant 0 : i32
    %c0_i32_0 = arith.constant 0 : i32
    %c0_i32_1 = arith.constant 0 : i32
    %c0_i32_2 = arith.constant 0 : i32
    return %arg0, %c0_i32, %c0_i32_0, %c0_i32_1 : i32, i32, i32, i32
  }
}

module attributes {stable_mosaic.version = 11 : i64} {
  func.func @bn_relu_conv_stats_kernel(%arg0: i32, %arg1: memref<1x16x16x128xf32, #tpu.memory_space<vmem>>, %arg2: memref<1x128xf32, #tpu.memory_space<vmem>>, %arg3: memref<1x128xf32, #tpu.memory_space<vmem>>, %arg4: memref<1152x128xf32, #tpu.memory_space<vmem>>, %arg5: memref<1x16x16x128xf32, #tpu.memory_space<vmem>>, %arg6: memref<1x1x128xf32, #tpu.memory_space<vmem>>, %arg7: memref<1x1x128xf32, #tpu.memory_space<vmem>>, %arg8: memref<256x1152xf32, #tpu.memory_space<vmem>>) attributes {dimension_semantics = [#tpu.dimension_semantics<parallel>], iteration_bounds = array<i64: 2>, scalar_prefetch = 0 : i64, scratch_operands = 1 : i64, tpu.core_type = #tpu.core_type<tc>, window_params = [{transform_indices = @transform_0, window_bounds = array<i64: 1, 16, 16, 128>}, {pipeline_mode = #tpu.pipeline_mode<synchronous>, transform_indices = @transform_1, window_bounds = array<i64: 1, 128>}, {pipeline_mode = #tpu.pipeline_mode<synchronous>, transform_indices = @transform_2, window_bounds = array<i64: 1, 128>}, {pipeline_mode = #tpu.pipeline_mode<synchronous>, transform_indices = @transform_3, window_bounds = array<i64: 1152, 128>}, {transform_indices = @transform_4, window_bounds = array<i64: 1, 16, 16, 128>}, {transform_indices = @transform_5, window_bounds = array<i64: 1, 1, 128>}, {transform_indices = @transform_6, window_bounds = array<i64: 1, 1, 128>}]} {
    %c0 = arith.constant 0 : index
    %c0_0 = arith.constant 0 : index
    %c0_1 = arith.constant 0 : index
    %c0_2 = arith.constant 0 : index
    %0 = vector.load %arg1[%c0, %c0_0, %c0_1, %c0_2] : memref<1x16x16x128xf32, #tpu.memory_space<vmem>>, vector<1x16x16x128xf32>
    %1 = vector.shape_cast %0 : vector<1x16x16x128xf32> to vector<16x16x128xf32>
    %c0_3 = arith.constant 0 : index
    %c0_4 = arith.constant 0 : index
    %2 = vector.load %arg2[%c0_3, %c0_4] : memref<1x128xf32, #tpu.memory_space<vmem>>, vector<1x128xf32>
    %3 = vector.shape_cast %2 : vector<1x128xf32> to vector<1x1x128xf32>
    %4 = vector.broadcast %3 : vector<1x1x128xf32> to vector<16x16x128xf32>
    %5 = arith.mulf %1, %4 : vector<16x16x128xf32>
    %c0_5 = arith.constant 0 : index
    %c0_6 = arith.constant 0 : index
    %6 = vector.load %arg3[%c0_5, %c0_6] : memref<1x128xf32, #tpu.memory_space<vmem>>, vector<1x128xf32>
    %7 = vector.shape_cast %6 : vector<1x128xf32> to vector<1x1x128xf32>
    %8 = vector.broadcast %7 : vector<1x1x128xf32> to vector<16x16x128xf32>
    %9 = arith.addf %5, %8 : vector<16x16x128xf32>
    %cst = arith.constant 0.000000e+00 : f32
    %10 = vector.broadcast %cst : f32 to vector<16x16x128xf32>
    %11 = arith.maximumf %9, %10 : vector<16x16x128xf32>
    %c0_i32 = arith.constant 0 : i32
    %12 = arith.sitofp %c0_i32 : i32 to f32
    %13 = vector.broadcast %12 : f32 to vector<1x16x128xf32>
    %14 = tpu.concatenate %13, %11 in 0 : vector<1x16x128xf32>, vector<16x16x128xf32> -> vector<17x16x128xf32>
    %15 = vector.broadcast %12 : f32 to vector<1x16x128xf32>
    %16 = tpu.concatenate %14, %15 in 0 : vector<17x16x128xf32>, vector<1x16x128xf32> -> vector<18x16x128xf32>
    %17 = vector.broadcast %12 : f32 to vector<18x1x128xf32>
    %18 = tpu.concatenate %17, %16 in 1 : vector<18x1x128xf32>, vector<18x16x128xf32> -> vector<18x17x128xf32>
    %19 = vector.broadcast %12 : f32 to vector<18x1x128xf32>
    %20 = tpu.concatenate %18, %19 in 1 : vector<18x17x128xf32>, vector<18x1x128xf32> -> vector<18x18x128xf32>
    %c0_7 = arith.constant 0 : index
    %c0_8 = arith.constant 0 : index
    %21 = vector.load %arg4[%c0_7, %c0_8] : memref<1152x128xf32, #tpu.memory_space<vmem>>, vector<1152x128xf32>
    %22 = vector.extract_strided_slice %20 {offsets = [0, 0, 0], sizes = [16, 16, 128], strides = [1, 1, 1]} : vector<18x18x128xf32> to vector<16x16x128xf32>
    %23 = vector.shape_cast %22 : vector<16x16x128xf32> to vector<256x128xf32>
    %c0_9 = arith.constant 0 : index
    %c0_10 = arith.constant 0 : index
    %24 = vector.load %arg8[%c0_9, %c0_10] : memref<256x1152xf32, #tpu.memory_space<vmem>>, vector<256x128xf32>
    tpu.vector_store %arg8[%c0_9, %c0_10], %23 {strides = array<i32>} : memref<256x1152xf32, #tpu.memory_space<vmem>>, vector<256x128xf32>,
    %25 = vector.extract_strided_slice %20 {offsets = [0, 1, 0], sizes = [16, 16, 128], strides = [1, 1, 1]} : vector<18x18x128xf32> to vector<16x16x128xf32>
    %26 = vector.shape_cast %25 : vector<16x16x128xf32> to vector<256x128xf32>
    %c0_11 = arith.constant 0 : index
    %c128 = arith.constant 128 : index
    %27 = vector.load %arg8[%c0_11, %c128] : memref<256x1152xf32, #tpu.memory_space<vmem>>, vector<256x128xf32>
    tpu.vector_store %arg8[%c0_11, %c128], %26 {strides = array<i32>} : memref<256x1152xf32, #tpu.memory_space<vmem>>, vector<256x128xf32>,
    %28 = vector.extract_strided_slice %20 {offsets = [0, 2, 0], sizes = [16, 16, 128], strides = [1, 1, 1]} : vector<18x18x128xf32> to vector<16x16x128xf32>
    %29 = vector.shape_cast %28 : vector<16x16x128xf32> to vector<256x128xf32>
    %c0_12 = arith.constant 0 : index
    %c256 = arith.constant 256 : index
    %30 = vector.load %arg8[%c0_12, %c256] : memref<256x1152xf32, #tpu.memory_space<vmem>>, vector<256x128xf32>
    tpu.vector_store %arg8[%c0_12, %c256], %29 {strides = array<i32>} : memref<256x1152xf32, #tpu.memory_space<vmem>>, vector<256x128xf32>,
    %31 = vector.extract_strided_slice %20 {offsets = [1, 0, 0], sizes = [16, 16, 128], strides = [1, 1, 1]} : vector<18x18x128xf32> to vector<16x16x128xf32>
    %32 = vector.shape_cast %31 : vector<16x16x128xf32> to vector<256x128xf32>
    %c0_13 = arith.constant 0 : index
    %c384 = arith.constant 384 : index
    %33 = vector.load %arg8[%c0_13, %c384] : memref<256x1152xf32, #tpu.memory_space<vmem>>, vector<256x128xf32>
    tpu.vector_store %arg8[%c0_13, %c384], %32 {strides = array<i32>} : memref<256x1152xf32, #tpu.memory_space<vmem>>, vector<256x128xf32>,
    %34 = vector.extract_strided_slice %20 {offsets = [1, 1, 0], sizes = [16, 16, 128], strides = [1, 1, 1]} : vector<18x18x128xf32> to vector<16x16x128xf32>
    %35 = vector.shape_cast %34 : vector<16x16x128xf32> to vector<256x128xf32>
    %c0_14 = arith.constant 0 : index
    %c512 = arith.constant 512 : index
    %36 = vector.load %arg8[%c0_14, %c512] : memref<256x1152xf32, #tpu.memory_space<vmem>>, vector<256x128xf32>
    tpu.vector_store %arg8[%c0_14, %c512], %35 {strides = array<i32>} : memref<256x1152xf32, #tpu.memory_space<vmem>>, vector<256x128xf32>,
    %37 = vector.extract_strided_slice %20 {offsets = [1, 2, 0], sizes = [16, 16, 128], strides = [1, 1, 1]} : vector<18x18x128xf32> to vector<16x16x128xf32>
    %38 = vector.shape_cast %37 : vector<16x16x128xf32> to vector<256x128xf32>
    %c0_15 = arith.constant 0 : index
    %c640 = arith.constant 640 : index
    %39 = vector.load %arg8[%c0_15, %c640] : memref<256x1152xf32, #tpu.memory_space<vmem>>, vector<256x128xf32>
    tpu.vector_store %arg8[%c0_15, %c640], %38 {strides = array<i32>} : memref<256x1152xf32, #tpu.memory_space<vmem>>, vector<256x128xf32>,
    %40 = vector.extract_strided_slice %20 {offsets = [2, 0, 0], sizes = [16, 16, 128], strides = [1, 1, 1]} : vector<18x18x128xf32> to vector<16x16x128xf32>
    %41 = vector.shape_cast %40 : vector<16x16x128xf32> to vector<256x128xf32>
    %c0_16 = arith.constant 0 : index
    %c768 = arith.constant 768 : index
    %42 = vector.load %arg8[%c0_16, %c768] : memref<256x1152xf32, #tpu.memory_space<vmem>>, vector<256x128xf32>
    tpu.vector_store %arg8[%c0_16, %c768], %41 {strides = array<i32>} : memref<256x1152xf32, #tpu.memory_space<vmem>>, vector<256x128xf32>,
    %43 = vector.extract_strided_slice %20 {offsets = [2, 1, 0], sizes = [16, 16, 128], strides = [1, 1, 1]} : vector<18x18x128xf32> to vector<16x16x128xf32>
    %44 = vector.shape_cast %43 : vector<16x16x128xf32> to vector<256x128xf32>
    %c0_17 = arith.constant 0 : index
    %c896 = arith.constant 896 : index
    %45 = vector.load %arg8[%c0_17, %c896] : memref<256x1152xf32, #tpu.memory_space<vmem>>, vector<256x128xf32>
    tpu.vector_store %arg8[%c0_17, %c896], %44 {strides = array<i32>} : memref<256x1152xf32, #tpu.memory_space<vmem>>, vector<256x128xf32>,
    %46 = vector.extract_strided_slice %20 {offsets = [2, 2, 0], sizes = [16, 16, 128], strides = [1, 1, 1]} : vector<18x18x128xf32> to vector<16x16x128xf32>
    %47 = vector.shape_cast %46 : vector<16x16x128xf32> to vector<256x128xf32>
    %c0_18 = arith.constant 0 : index
    %c1024 = arith.constant 1024 : index
    %48 = vector.load %arg8[%c0_18, %c1024] : memref<256x1152xf32, #tpu.memory_space<vmem>>, vector<256x128xf32>
    tpu.vector_store %arg8[%c0_18, %c1024], %47 {strides = array<i32>} : memref<256x1152xf32, #tpu.memory_space<vmem>>, vector<256x128xf32>,
    %c0_19 = arith.constant 0 : index
    %c0_20 = arith.constant 0 : index
    %49 = vector.load %arg8[%c0_19, %c0_20] : memref<256x1152xf32, #tpu.memory_space<vmem>>, vector<256x1152xf32>
    %cst_21 = arith.constant dense<0.000000e+00> : vector<256x128xf32>
    %50 = tpu.matmul %49, %21, %cst_21 {dimension_numbers = #tpu.dot_dimension_numbers<[1], [0], [0], [1], [0, 0, 1, 1], [], []>} : vector<256x1152xf32>, vector<1152x128xf32>, vector<256x128xf32> -> vector<256x128xf32>
    %51 = vector.shape_cast %50 : vector<256x128xf32> to vector<16x16x128xf32>
    %c0_22 = arith.constant 0 : index
    %c0_23 = arith.constant 0 : index
    %c0_24 = arith.constant 0 : index
    %c0_25 = arith.constant 0 : index
    %52 = vector.load %arg5[%c0_22, %c0_23, %c0_24, %c0_25] : memref<1x16x16x128xf32, #tpu.memory_space<vmem>>, vector<1x16x16x128xf32>
    %53 = vector.shape_cast %52 : vector<1x16x16x128xf32> to vector<16x16x128xf32>
    %54 = vector.shape_cast %51 : vector<16x16x128xf32> to vector<1x16x16x128xf32>
    tpu.vector_store %arg5[%c0_22, %c0_23, %c0_24, %c0_25], %54 {strides = array<i32>} : memref<1x16x16x128xf32, #tpu.memory_space<vmem>>, vector<1x16x16x128xf32>,
    %55 = vector.shape_cast %51 : vector<16x16x128xf32> to vector<256x128xf32>
    %cst_26 = arith.constant dense<0.000000e+00> : vector<128xf32>
    %56 = vector.multi_reduction <add>, %55, %cst_26 [0] : vector<256x128xf32> to vector<128xf32>
    %57 = vector.shape_cast %56 : vector<128xf32> to vector<1x128xf32>
    %58 = arith.mulf %55, %55 : vector<256x128xf32>
    %cst_27 = arith.constant dense<0.000000e+00> : vector<128xf32>
    %59 = vector.multi_reduction <add>, %58, %cst_27 [0] : vector<256x128xf32> to vector<128xf32>
    %60 = vector.shape_cast %59 : vector<128xf32> to vector<1x128xf32>
    %c0_28 = arith.constant 0 : index
    %c0_29 = arith.constant 0 : index
    %c0_30 = arith.constant 0 : index
    %61 = vector.load %arg6[%c0_28, %c0_29, %c0_30] : memref<1x1x128xf32, #tpu.memory_space<vmem>>, vector<1x1x128xf32>
    %62 = vector.shape_cast %61 : vector<1x1x128xf32> to vector<1x128xf32>
    %63 = vector.shape_cast %57 : vector<1x128xf32> to vector<1x1x128xf32>
    tpu.vector_store %arg6[%c0_28, %c0_29, %c0_30], %63 {strides = array<i32>} : memref<1x1x128xf32, #tpu.memory_space<vmem>>, vector<1x1x128xf32>,
    %c0_31 = arith.constant 0 : index
    %c0_32 = arith.constant 0 : index
    %c0_33 = arith.constant 0 : index
    %64 = vector.load %arg7[%c0_31, %c0_32, %c0_33] : memref<1x1x128xf32, #tpu.memory_space<vmem>>, vector<1x1x128xf32>
    %65 = vector.shape_cast %64 : vector<1x1x128xf32> to vector<1x128xf32>
    %66 = vector.shape_cast %60 : vector<1x128xf32> to vector<1x1x128xf32>
    tpu.vector_store %arg7[%c0_31, %c0_32, %c0_33], %66 {strides = array<i32>} : memref<1x1x128xf32, #tpu.memory_space<vmem>>, vector<1x1x128xf32>,
    return
  }
  func.func @transform_0(%arg0: i32) -> (i32, i32, i32, i32) {
    %c0_i32 = arith.constant 0 : i32
    %c0_i32_0 = arith.constant 0 : i32
    %c0_i32_1 = arith.constant 0 : i32
    %c0_i32_2 = arith.constant 0 : i32
    return %arg0, %c0_i32, %c0_i32_0, %c0_i32_1 : i32, i32, i32, i32
  }
  func.func @transform_1(%arg0: i32) -> (i32, i32) {
    %c0_i32 = arith.constant 0 : i32
    %c0_i32_0 = arith.constant 0 : i32
    %c0_i32_1 = arith.constant 0 : i32
    return %c0_i32, %c0_i32_0 : i32, i32
  }
  func.func @transform_2(%arg0: i32) -> (i32, i32) {
    %c0_i32 = arith.constant 0 : i32
    %c0_i32_0 = arith.constant 0 : i32
    %c0_i32_1 = arith.constant 0 : i32
    return %c0_i32, %c0_i32_0 : i32, i32
  }
  func.func @transform_3(%arg0: i32) -> (i32, i32) {
    %c0_i32 = arith.constant 0 : i32
    %c0_i32_0 = arith.constant 0 : i32
    %c0_i32_1 = arith.constant 0 : i32
    return %c0_i32, %c0_i32_0 : i32, i32
  }
  func.func @transform_4(%arg0: i32) -> (i32, i32, i32, i32) {
    %c0_i32 = arith.constant 0 : i32
    %c0_i32_0 = arith.constant 0 : i32
    %c0_i32_1 = arith.constant 0 : i32
    %c0_i32_2 = arith.constant 0 : i32
    return %arg0, %c0_i32, %c0_i32_0, %c0_i32_1 : i32, i32, i32, i32
  }
  func.func @transform_5(%arg0: i32) -> (i32, i32, i32) {
    %c0_i32 = arith.constant 0 : i32
    %c0_i32_0 = arith.constant 0 : i32
    %c0_i32_1 = arith.constant 0 : i32
    return %arg0, %c0_i32, %c0_i32_0 : i32, i32, i32
  }
  func.func @transform_6(%arg0: i32) -> (i32, i32, i32) {
    %c0_i32 = arith.constant 0 : i32
    %c0_i32_0 = arith.constant 0 : i32
    %c0_i32_1 = arith.constant 0 : i32
    return %arg0, %c0_i32, %c0_i32_0 : i32, i32, i32
  }
}

</mosaic_0001>

<bundles_post_ra>
// kernel: resblock_forward.5
= control target key start
LH: loop header
LB: loop body
LE: loop exit
PB: predicated region body
PF: predicated region fallthrough
CT: control target
= control target key end

     0   :  { %s582_s15 = smov 0   ;;  %s783_s0 = inlined_call_operand.vmem [shape: f32[2,16,16,128], index: 0, kind: input, shape index: {}]   ;;  %s784_s1 = inlined_call_operand.vmem [shape: f32[2,16,16,128], index: 1, kind: input, shape index: {}]   ;;  %s785_s2 = inlined_call_operand.vmem [shape: f32[1,128], index: 2, kind: input, shape index: {}]   ;;  %s786_s3 = inlined_call_operand.vmem [shape: f32[1,128], index: 3, kind: input, shape index: {}]   ;;  %s787_s4 = inlined_call_operand.vmem [shape: f32[2,16,16,128], index: 4, kind: output, shape index: {}]  }
   0x1 LB: > { %s523_s16 = sadd.s32 4294967295, %s555_s15   ;;  %p527_p0 = scmp.ge.s32.totalorder %s555_s15, 1  ;;  %s555_s15 = sphi %s582_s15, %s14_s15  }
   0x2   : > { %p172_p1 = scmp.lt.s32.totalorder %s555_s15, 3 }
   0x4   : > { %p173_p2 = pnand %p527_p0, %p172_p1 }
   0x5   : > { %p203_p3 = scmp.lt.s32.totalorder (!%p173_p2), %s523_s16, 1 }
   0x6   : > { %176 = sbr.rel (%p173_p2) target bundleno = 53 (0x35), region = 36 }
   0xb   : > { %s789_s16 = smov (!%p203_p3, %s523_s16), 1  ;;  %v595_v0 = vld [vmem:[%s785_s2] ss:$0 sm:$0xff] }
   0xc   : > { %s590_s17 = sshll.u32 %s789_s16, 8  ;;  %v613_v2 = vld [vmem:[%s786_s3] ss:$0 sm:$0xff] }
   0xd   : > { %s601_s22 = scalar_lea.vmem %s783_s0, %s590_s17  ;;  %s607_s25 = scalar_lea.vmem %s784_s1, %s590_s17 }
   0xe   : > { %v218_v1 = vld [vmem:[%s601_s22] sm:$0xff]  ;;  %v219_v3 = vld [vmem:[%s601_s22 + $0x8] sm:$0xff]  ;;  %v220_v7 = vld [vmem:[%s601_s22 + $0x10] sm:$0xff]  ;;  %s643_s30 = scalar_lea.vmem %s787_s4, %s590_s17 }
   0xf   : > { %v257_v4 = vmul.f32 %v595_v0, %v218_v1  ;;  %v328_v5 = vld [vmem:[%s607_s25] sm:$0xff]  ;;  %v258_v6 = vmul.f32 %v595_v0, %v219_v3  ;;  %v329_v8 = vld [vmem:[%s607_s25 + $0x8] sm:$0xff]  ;;  %v259_v9 = vmul.f32 %v595_v0, %v220_v7  ;;  %v221_v10 = vld [vmem:[%s601_s22 + $0x18] sm:$0xff] }
  0x10   : > { %v222_v11 = vld [vmem:[%s601_s22 + $0x20] sm:$0xff]  ;;  %v330_v14 = vld [vmem:[%s607_s25 + $0x10] sm:$0xff]  ;;  %v260_v15 = vmul.f32 %v595_v0, %v221_v10  ;;  %v331_v16 = vld [vmem:[%s607_s25 + $0x18] sm:$0xff] }
  0x11   : > { %v296_v12 = vadd.f32 %v613_v2, %v257_v4  ;;  %v297_v13 = vadd.f32 %v613_v2, %v258_v6  ;;  %v261_v17 = vmul.f32 %v595_v0, %v222_v11  ;;  %v223_v18 = vld [vmem:[%s601_s22 + $0x28] sm:$0xff]  ;;  %v298_v19 = vadd.f32 %v613_v2, %v259_v9  ;;  %v332_v20 = vld [vmem:[%s607_s25 + $0x20] sm:$0xff]  ;;  %v224_v22 = vld [vmem:[%s601_s22 + $0x30] sm:$0xff] }
  0x12   : > { %v262_v21 = vmul.f32 %v595_v0, %v223_v18  ;;  %v225_v23 = vld [vmem:[%s601_s22 + $0x38] sm:$0xff]  ;;  %v299_v26 = vadd.f32 %v613_v2, %v260_v15  ;;  %v333_v28 = vld [vmem:[%s607_s25 + $0x28] sm:$0xff]  ;;  %v263_v31 = vmul.f32 %v595_v0, %v224_v22  ;;  %v226_v33 = vld [vmem:[%s601_s22 + $0x40] sm:$0xff] }
  0x13   : > { %v360_v24 = vadd.f32 %v328_v5, %v296_v12  ;;  %v361_v25 = vadd.f32 %v329_v8, %v297_v13  ;;  %v300_v27 = vadd.f32 %v613_v2, %v261_v17  ;;  %v362_v29 = vadd.f32 %v330_v14, %v298_v19  ;;  %v227_v34 = vld [vmem:[%s601_s22 + $0x48] sm:$0xff]  ;;  %v334_v39 = vld [vmem:[%s607_s25 + $0x30] sm:$0xff]  ;;  %v335_v40 = vld [vmem:[%s607_s25 + $0x38] sm:$0xff] }
  0x14   : > { %v301_v30 = vadd.f32 %v613_v2, %v262_v21  ;;  %v264_v32 = vmul.f32 %v595_v0, %v225_v23  ;;  %v363_v37 = vadd.f32 %v331_v16, %v299_v26  ;;  %v228_v41 = vld [vmem:[%s601_s22 + $0x50] sm:$0xff]  ;;  %v302_v44 = vadd.f32 %v613_v2, %v263_v31  ;;  %v229_v46 = vld [vmem:[%s601_s22 + $0x58] sm:$0xff]  ;;  %v230_v47 = vld [vmem:[%s601_s22 + $0x60] sm:$0xff] }
  0x15   : > { %v392_v35 = vmax.f32 %v360_v24, 0.0  ;;  %v393_v36 = vmax.f32 %v361_v25, 0.0  ;;  %v364_v38 = vadd.f32 %v332_v20, %v300_v27  ;;  %v394_v42 = vmax.f32 %v362_v29, 0.0  ;;  %v231_v52 = vld [vmem:[%s601_s22 + $0x68] sm:$0xff]  ;;  %v336_v56 = vld [vmem:[%s607_s25 + $0x40] sm:$0xff]  ;;  %v338_v61 = vld [vmem:[%s607_s25 + $0x50] sm:$0xff] }
  0x16   : > { %v365_v43 = vadd.f32 %v333_v28, %v301_v30  ;;  %v303_v45 = vadd.f32 %v613_v2, %v264_v32  ;;  %v395_v48 = vmax.f32 %v363_v37, 0.0  ;;  %v265_v50 = vmul.f32 %v595_v0, %v226_v33  ;;  %v337_v57 = vld [vmem:[%s607_s25 + $0x48] sm:$0xff]  ;;  %v232_v1 = vld [vmem:[%s601_s22 + $0x70] sm:$0xff]  ;;  %v233_v3 = vld [vmem:[%s601_s22 + $0x78] sm:$0xff] }
  0x17   : > { %424 = vst [vmem:[%s643_s30] sm:$0xff] %v392_v35  ;;  %425 = vst [vmem:[%s643_s30 + $0x8] sm:$0xff] %v393_v36  ;;  %v396_v49 = vmax.f32 %v364_v38, 0.0  ;;  %v266_v51 = vmul.f32 %v595_v0, %v227_v34  ;;  %v366_v54 = vadd.f32 %v334_v39, %v302_v44  ;;  %v267_v58 = vmul.f32 %v595_v0, %v228_v41  ;;  %v339_v7 = vld [vmem:[%s607_s25 + $0x58] sm:$0xff]  ;;  %v340_v8 = vld [vmem:[%s607_s25 + $0x60] sm:$0xff] }
  0x18   : > { %426 = vst [vmem:[%s643_s30 + $0x10] sm:$0xff] %v394_v42  ;;  %v397_v53 = vmax.f32 %v365_v43, 0.0  ;;  %v367_v55 = vadd.f32 %v335_v40, %v303_v45  ;;  %427 = vst [vmem:[%s643_s30 + $0x18] sm:$0xff] %v395_v48  ;;  %v304_v59 = vadd.f32 %v613_v2, %v265_v50  ;;  %v268_v62 = vmul.f32 %v595_v0, %v229_v46  ;;  %v341_v14 = vld [vmem:[%s607_s25 + $0x68] sm:$0xff]  ;;  %v234_v19 = vld [vmem:[%s601_s22 + $0x80] sm:$0xff] }
  0x19   : > { %428 = vst [vmem:[%s643_s30 + $0x20] sm:$0xff] %v396_v49  ;;  %v305_v60 = vadd.f32 %v613_v2, %v266_v51  ;;  %v269_v63 = vmul.f32 %v595_v0, %v230_v47  ;;  %v398_v4 = vmax.f32 %v366_v54, 0.0  ;;  %v306_v6 = vadd.f32 %v613_v2, %v267_v58  ;;  %v235_v20 = vld [vmem:[%s601_s22 + $0x88] sm:$0xff]  ;;  %v342_v25 = vld [vmem:[%s607_s25 + $0x70] sm:$0xff]  ;;  %v343_v26 = vld [vmem:[%s607_s25 + $0x78] sm:$0xff] }
  0x1a   : > { %429 = vst [vmem:[%s643_s30 + $0x28] sm:$0xff] %v397_v53  ;;  %v399_v5 = vmax.f32 %v367_v55, 0.0  ;;  %v270_v9 = vmul.f32 %v595_v0, %v231_v52  ;;  %v368_v10 = vadd.f32 %v336_v56, %v304_v59  ;;  %v307_v12 = vadd.f32 %v613_v2, %v268_v62  ;;  %v236_v27 = vld [vmem:[%s601_s22 + $0x90] sm:$0xff]  ;;  %v237_v32 = vld [vmem:[%s601_s22 + $0x98] sm:$0xff]  ;;  %v238_v33 = vld [vmem:[%s601_s22 + $0xa0] sm:$0xff] }
  0x1b   : > { %v369_v11 = vadd.f32 %v337_v57, %v305_v60  ;;  %v308_v13 = vadd.f32 %v613_v2, %v269_v63  ;;  %430 = vst [vmem:[%s643_s30 + $0x30] sm:$0xff] %v398_v4  ;;  %v370_v15 = vadd.f32 %v338_v61, %v306_v6  ;;  %v271_v17 = vmul.f32 %v595_v0, %v232_v1  ;;  %v239_v38 = vld [vmem:[%s601_s22 + $0xa8] sm:$0xff]  ;;  %v344_v42 = vld [vmem:[%s607_s25 + $0x80] sm:$0xff]  ;;  %v346_v47 = vld [vmem:[%s607_s25 + $0x90] sm:$0xff] }
  0x1c   : > { %431 = vst [vmem:[%s643_s30 + $0x38] sm:$0xff] %v399_v5  ;;  %v309_v16 = vadd.f32 %v613_v2, %v270_v9  ;;  %v272_v18 = vmul.f32 %v595_v0, %v233_v3  ;;  %v400_v21 = vmax.f32 %v368_v10, 0.0  ;;  %v371_v23 = vadd.f32 %v339_v7, %v307_v12  ;;  %v345_v43 = vld [vmem:[%s607_s25 + $0x88] sm:$0xff]  ;;  %v240_v50 = vld [vmem:[%s601_s22 + $0xb0] sm:$0xff]  ;;  %v241_v51 = vld [vmem:[%s601_s22 + $0xb8] sm:$0xff] }
  0x1d   : > { %v401_v22 = vmax.f32 %v369_v11, 0.0  ;;  %v372_v24 = vadd.f32 %v340_v8, %v308_v13  ;;  %v402_v28 = vmax.f32 %v370_v15, 0.0  ;;  %v310_v30 = vadd.f32 %v613_v2, %v271_v17  ;;  %v347_v55 = vld [vmem:[%s607_s25 + $0x98] sm:$0xff]  ;;  %v348_v56 = vld [vmem:[%s607_s25 + $0xa0] sm:$0xff]  ;;  %v349_v62 = vld [vmem:[%s607_s25 + $0xa8] sm:$0xff] }
  0x1e   : > { %v373_v29 = vadd.f32 %v341_v14, %v309_v16  ;;  %v311_v31 = vadd.f32 %v613_v2, %v272_v18  ;;  %432 = vst [vmem:[%s643_s30 + $0x40] sm:$0xff] %v400_v21  ;;  %v403_v34 = vmax.f32 %v371_v23, 0.0  ;;  %v273_v36 = vmul.f32 %v595_v0, %v234_v19  ;;  %v242_v5 = vld [vmem:[%s601_s22 + $0xc0] sm:$0xff]  ;;  %v243_v6 = vld [vmem:[%s601_s22 + $0xc8] sm:$0xff]  ;;  %v350_v11 = vld [vmem:[%s607_s25 + $0xb0] sm:$0xff] }
  0x1f   : > { %433 = vst [vmem:[%s643_s30 + $0x48] sm:$0xff] %v401_v22  ;;  %v404_v35 = vmax.f32 %v372_v24, 0.0  ;;  %v274_v37 = vmul.f32 %v595_v0, %v235_v20  ;;  %434 = vst [vmem:[%s643_s30 + $0x50] sm:$0xff] %v402_v28  ;;  %v374_v40 = vadd.f32 %v342_v25, %v310_v30  ;;  %v275_v44 = vmul.f32 %v595_v0, %v236_v27  ;;  %v351_v12 = vld [vmem:[%s607_s25 + $0xb8] sm:$0xff]  ;;  %v244_v13 = vld [vmem:[%s601_s22 + $0xd0] sm:$0xff] }
  0x20   : > { %v405_v39 = vmax.f32 %v373_v29, 0.0  ;;  %v375_v41 = vadd.f32 %v343_v26, %v311_v31  ;;  %435 = vst [vmem:[%s643_s30 + $0x58] sm:$0xff] %v403_v34  ;;  %v312_v45 = vadd.f32 %v613_v2, %v273_v36  ;;  %v276_v48 = vmul.f32 %v595_v0, %v237_v32  ;;  %v245_v18 = vld [vmem:[%s601_s22 + $0xd8] sm:$0xff]  ;;  %v246_v19 = vld [vmem:[%s601_s22 + $0xe0] sm:$0xff]  ;;  %v247_v24 = vld [vmem:[%s601_s22 + $0xe8] sm:$0xff] }
  0x21   : > { %436 = vst [vmem:[%s643_s30 + $0x60] sm:$0xff] %v404_v35  ;;  %v313_v46 = vadd.f32 %v613_v2, %v274_v37  ;;  %v277_v49 = vmul.f32 %v595_v0, %v238_v33  ;;  %v406_v52 = vmax.f32 %v374_v40, 0.0  ;;  %v314_v54 = vadd.f32 %v613_v2, %v275_v44  ;;  %v352_v28 = vld [vmem:[%s607_s25 + $0xc0] sm:$0xff]  ;;  %v353_v29 = vld [vmem:[%s607_s25 + $0xc8] sm:$0xff]  ;;  %v354_v33 = vld [vmem:[%s607_s25 + $0xd0] sm:$0xff] }
  0x22   : > { %437 = vst [vmem:[%s643_s30 + $0x68] sm:$0xff] %v405_v39  ;;  %v407_v53 = vmax.f32 %v375_v41, 0.0  ;;  %v278_v57 = vmul.f32 %v595_v0, %v239_v38  ;;  %v376_v58 = vadd.f32 %v344_v42, %v312_v45  ;;  %v315_v60 = vadd.f32 %v613_v2, %v276_v48  ;;  %v248_v36 = vld [vmem:[%s601_s22 + $0xf0] sm:$0xff]  ;;  %v249_v37 = vld [vmem:[%s601_s22 + $0xf8] sm:$0xff]  ;;  %v356_v42 = vld [vmem:[%s607_s25 + $0xe0] sm:$0xff] }
  0x23   : > { %v377_v59 = vadd.f32 %v345_v43, %v313_v46  ;;  %v316_v61 = vadd.f32 %v613_v2, %v277_v49  ;;  %438 = vst [vmem:[%s643_s30 + $0x70] sm:$0xff] %v406_v52  ;;  %v378_v63 = vadd.f32 %v346_v47, %v314_v54  ;;  %v279_v3 = vmul.f32 %v595_v0, %v240_v50  ;;  %v355_v41 = vld [vmem:[%s607_s25 + $0xd8] sm:$0xff]  ;;  %v357_v48 = vld [vmem:[%s607_s25 + $0xe8] sm:$0xff] }
  0x24   : > { %439 = vst [vmem:[%s643_s30 + $0x78] sm:$0xff] %v407_v53  ;;  %v317_v1 = vadd.f32 %v613_v2, %v278_v57  ;;  %v280_v4 = vmul.f32 %v595_v0, %v241_v51  ;;  %v408_v7 = vmax.f32 %v376_v58, 0.0  ;;  %v379_v9 = vadd.f32 %v347_v55, %v315_v60  ;;  %v358_v57 = vld [vmem:[%s607_s25 + $0xf0] sm:$0xff]  ;;  %v359_v58 = vld [vmem:[%s607_s25 + $0xf8] sm:$0xff] }
  0x25   : > { %v409_v8 = vmax.f32 %v377_v59, 0.0  ;;  %v380_v10 = vadd.f32 %v348_v56, %v316_v61  ;;  %v410_v14 = vmax.f32 %v378_v63, 0.0  ;;  %v318_v16 = vadd.f32 %v613_v2, %v279_v3 }
  0x26   : > { %v381_v15 = vadd.f32 %v349_v62, %v317_v1  ;;  %v319_v17 = vadd.f32 %v613_v2, %v280_v4  ;;  %440 = vst [vmem:[%s643_s30 + $0x80] sm:$0xff] %v408_v7  ;;  %v411_v20 = vmax.f32 %v379_v9, 0.0  ;;  %v281_v22 = vmul.f32 %v595_v0, %v242_v5 }
  0x27   : > { %441 = vst [vmem:[%s643_s30 + $0x88] sm:$0xff] %v409_v8  ;;  %v412_v21 = vmax.f32 %v380_v10, 0.0  ;;  %v282_v23 = vmul.f32 %v595_v0, %v243_v6  ;;  %442 = vst [vmem:[%s643_s30 + $0x90] sm:$0xff] %v410_v14  ;;  %v382_v26 = vadd.f32 %v350_v11, %v318_v16  ;;  %v283_v30 = vmul.f32 %v595_v0, %v244_v13 }
  0x28   : > { %v413_v25 = vmax.f32 %v381_v15, 0.0  ;;  %v383_v27 = vadd.f32 %v351_v12, %v319_v17  ;;  %443 = vst [vmem:[%s643_s30 + $0x98] sm:$0xff] %v411_v20  ;;  %v320_v31 = vadd.f32 %v613_v2, %v281_v22  ;;  %v284_v34 = vmul.f32 %v595_v0, %v245_v18 }
  0x29   : > { %444 = vst [vmem:[%s643_s30 + $0xa0] sm:$0xff] %v412_v21  ;;  %v321_v32 = vadd.f32 %v613_v2, %v282_v23  ;;  %v285_v35 = vmul.f32 %v595_v0, %v246_v19  ;;  %v414_v38 = vmax.f32 %v382_v26, 0.0  ;;  %v322_v40 = vadd.f32 %v613_v2, %v283_v30 }
  0x2a   : > { %445 = vst [vmem:[%s643_s30 + $0xa8] sm:$0xff] %v413_v25  ;;  %v415_v39 = vmax.f32 %v383_v27, 0.0  ;;  %v286_v43 = vmul.f32 %v595_v0, %v247_v24  ;;  %v384_v44 = vadd.f32 %v352_v28, %v320_v31  ;;  %v323_v46 = vadd.f32 %v613_v2, %v284_v34 }
  0x2b   : > { %v385_v45 = vadd.f32 %v353_v29, %v321_v32  ;;  %v324_v47 = vadd.f32 %v613_v2, %v285_v35  ;;  %446 = vst [vmem:[%s643_s30 + $0xb0] sm:$0xff] %v414_v38  ;;  %v386_v49 = vadd.f32 %v354_v33, %v322_v40  ;;  %v287_v51 = vmul.f32 %v595_v0, %v248_v36 }
  0x2c   : > { %447 = vst [vmem:[%s643_s30 + $0xb8] sm:$0xff] %v415_v39  ;;  %v325_v50 = vadd.f32 %v613_v2, %v286_v43  ;;  %v288_v52 = vmul.f32 %v595_v0, %v249_v37  ;;  %v416_v53 = vmax.f32 %v384_v44, 0.0  ;;  %v387_v55 = vadd.f32 %v355_v41, %v323_v46 }
  0x2d   : > { %v417_v54 = vmax.f32 %v385_v45, 0.0  ;;  %v388_v56 = vadd.f32 %v356_v42, %v324_v47  ;;  %v418_v59 = vmax.f32 %v386_v49, 0.0  ;;  %v326_v61 = vadd.f32 %v613_v2, %v287_v51 }
  0x2e   : > { %v389_v60 = vadd.f32 %v357_v48, %v325_v50  ;;  %v327_v62 = vadd.f32 %v613_v2, %v288_v52  ;;  %448 = vst [vmem:[%s643_s30 + $0xc0] sm:$0xff] %v416_v53  ;;  %v419_v0 = vmax.f32 %v387_v55, 0.0 }
  0x2f   : > { %449 = vst [vmem:[%s643_s30 + $0xc8] sm:$0xff] %v417_v54  ;;  %v420_v63 = vmax.f32 %v388_v56, 0.0  ;;  %450 = vst [vmem:[%s643_s30 + $0xd0] sm:$0xff] %v418_v59  ;;  %v390_v3 = vadd.f32 %v358_v57, %v326_v61 }
  0x30   : > { %v421_v1 = vmax.f32 %v389_v60, 0.0  ;;  %v391_v4 = vadd.f32 %v359_v58, %v327_v62  ;;  %451 = vst [vmem:[%s643_s30 + $0xd8] sm:$0xff] %v419_v0 }
  0x31   : > { %452 = vst [vmem:[%s643_s30 + $0xe0] sm:$0xff] %v420_v63  ;;  %v422_v5 = vmax.f32 %v390_v3, 0.0 }
  0x32   : > { %453 = vst [vmem:[%s643_s30 + $0xe8] sm:$0xff] %v421_v1  ;;  %v423_v6 = vmax.f32 %v391_v4, 0.0 }
  0x33   : > { %454 = vst [vmem:[%s643_s30 + $0xf0] sm:$0xff] %v422_v5 }
  0x34   : > { %455 = vst [vmem:[%s643_s30 + $0xf8] sm:$0xff] %v423_v6 }
  0x35 PF: > { %s14_s15 = sadd.s32 1, %s555_s15  }
  0x36   : > { %p11_p4 = scmp.ge.s32.totalorder %s14_s15, 4  }
  0x38   :  { %13 = sbr.rel (!%p11_p4) target bundleno = 1 (0x1), region = 69 }

// kernel: resblock_forward.3
= control target key start
LH: loop header
LB: loop body
LE: loop exit
PB: predicated region body
PF: predicated region fallthrough
CT: control target
= control target key end

     0   :  { %s2882_s15 = smov 0   ;;  %s4486_s0 = inlined_call_operand.vmem [shape: f32[2,18,18,128], index: 0, kind: input, shape index: {}]   ;;  %s4487_s1 = inlined_call_operand.vmem [shape: f32[1152,128], index: 1, kind: input, shape index: {}]   ;;  %s4488_s2 = inlined_call_operand.vmem [shape: f32[2,16,16,128], index: 2, kind: output, shape index: {0}]   ;;  %s4489_s3 = inlined_call_operand.vmem [shape: f32[2,1,128], index: 3, kind: output, shape index: {1}]   ;;  %s4490_s4 = inlined_call_operand.vmem [shape: f32[2,1,128], index: 4, kind: output, shape index: {2}]  }
   0x1 LB: > { %s2667_s16 = sadd.s32 4294967295, %s2854_s15   ;;  %p2671_p0 = scmp.ge.s32.totalorder %s2854_s15, 1  ;;  %s2854_s15 = sphi %s2882_s15, %s15_s15  }
   0x2   : > { %p167_p1 = scmp.lt.s32.totalorder %s2854_s15, 3 }
   0x4   : > { %p168_p2 = pnand %p2671_p0, %p167_p1 }
   0x6   : > { %171 = sbr.rel (%p168_p2) target bundleno = 609 (0x261), region = 28 }
   0xb   : > { %v284_v0 = vld [vmem:[%s4487_s1 + $0x78] sm:$0xff]  ;;  %v2856_v2 = vmov 0.0   ;;  %v283_v3 = vld [vmem:[%s4487_s1 + $0x70] sm:$0xff]  ;;  %v282_v5 = vld [vmem:[%s4487_s1 + $0x68] sm:$0xff]  ;;  %p199_p3 = scmp.lt.s32.totalorder %s2667_s16, 1  ;;  %vm493_vm0 = vcmask 1046528  }
   0xc   : > { %v316_v1 = vld [vmem:[%s4487_s1 + $0x178] sm:$0xff]  ;;  %1297 = vmatprep.subr.mxu0 %v2856_v2  ;;  %1522 = vmatprep.subr.mxu1 %v2856_v2  ;;  %v315_v4 = vld [vmem:[%s4487_s1 + $0x170] sm:$0xff]  ;;  %v314_v6 = vld [vmem:[%s4487_s1 + $0x168] sm:$0xff]  ;;  %vm638_vm1 = vcmask 1045504  }
   0xd   : > { %1298 = vmatpush1.msra.mxu0 %v284_v0  ;;  %1523 = vmatpush1.msra.mxu1 %v316_v1  ;;  %v281_v7 = vld [vmem:[%s4487_s1 + $0x60] sm:$0xff]  ;;  %v280_v9 = vld [vmem:[%s4487_s1 + $0x58] sm:$0xff]  ;;  %v279_v11 = vld [vmem:[%s4487_s1 + $0x50] sm:$0xff]  ;;  %s4637_s16 = smov (!%p199_p3, %s2667_s16), 1 }
   0xe   : > { %1299 = vmatprep.subr.mxu0 %v2856_v2  ;;  %1524 = vmatprep.subr.mxu1 %v2856_v2  ;;  %v313_v8 = vld [vmem:[%s4487_s1 + $0x160] sm:$0xff]  ;;  %v312_v10 = vld [vmem:[%s4487_s1 + $0x158] sm:$0xff]  ;;  %v311_v12 = vld [vmem:[%s4487_s1 + $0x150] sm:$0xff]  ;;  %s2838_s21 = smul.u32 432, %s4637_s16  ;;  %s211_s8 = scalar_lea.vmem %s4489_s3, %s4637_s16 }
   0xf   : > { %1300 = vmatpush1.msra.mxu0 %v283_v3  ;;  %1525 = vmatpush1.msra.mxu1 %v315_v4  ;;  %v278_v13 = vld [vmem:[%s4487_s1 + $0x48] sm:$0xff]  ;;  %v277_v15 = vld [vmem:[%s4487_s1 + $0x40] sm:$0xff]  ;;  %v276_v17 = vld [vmem:[%s4487_s1 + $0x38] sm:$0xff]  ;;  %s214_s11 = scalar_lea.vmem %s4490_s4, %s4637_s16 }
  0x10   : > { %1301 = vmatprep.subr.mxu0 %v2856_v2  ;;  %1526 = vmatprep.subr.mxu1 %v2856_v2  ;;  %v310_v14 = vld [vmem:[%s4487_s1 + $0x148] sm:$0xff]  ;;  %v309_v16 = vld [vmem:[%s4487_s1 + $0x140] sm:$0xff]  ;;  %v308_v18 = vld [vmem:[%s4487_s1 + $0x138] sm:$0xff]  ;;  %s3114_s6 = scalar_lea.vmem %s4486_s0, %s2838_s21 }
  0x11   : > { %1302 = vmatpush1.msra.mxu0 %v282_v5  ;;  %1527 = vmatpush1.msra.mxu1 %v314_v6  ;;  %v275_v19 = vld [vmem:[%s4487_s1 + $0x30] sm:$0xff]  ;;  %v274_v21 = vld [vmem:[%s4487_s1 + $0x28] sm:$0xff]  ;;  %v273_v23 = vld [vmem:[%s4487_s1 + $0x20] sm:$0xff] }
  0x12   : > { %1303 = vmatprep.subr.mxu0 %v2856_v2  ;;  %1528 = vmatprep.subr.mxu1 %v2856_v2  ;;  %v307_v20 = vld [vmem:[%s4487_s1 + $0x130] sm:$0xff]  ;;  %v306_v22 = vld [vmem:[%s4487_s1 + $0x128] sm:$0xff]  ;;  %v305_v24 = vld [vmem:[%s4487_s1 + $0x120] sm:$0xff] }
  0x13   : > { %1304 = vmatpush1.msra.mxu0 %v281_v7  ;;  %1529 = vmatpush1.msra.mxu1 %v313_v8  ;;  %v272_v25 = vld [vmem:[%s4487_s1 + $0x18] sm:$0xff]  ;;  %v271_v27 = vld [vmem:[%s4487_s1 + $0x10] sm:$0xff]  ;;  %v270_v29 = vld [vmem:[%s4487_s1 + $0x8] sm:$0xff] }
  0x14   : > { %1305 = vmatprep.subr.mxu0 %v2856_v2  ;;  %1530 = vmatprep.subr.mxu1 %v2856_v2  ;;  %v304_v26 = vld [vmem:[%s4487_s1 + $0x118] sm:$0xff]  ;;  %v303_v28 = vld [vmem:[%s4487_s1 + $0x110] sm:$0xff]  ;;  %v302_v30 = vld [vmem:[%s4487_s1 + $0x108] sm:$0xff] }
  0x15   : > { %1306 = vmatpush1.msra.mxu0 %v280_v9  ;;  %1531 = vmatpush1.msra.mxu1 %v312_v10  ;;  %v269_v31 = vld [vmem:[%s4487_s1] sm:$0xff]  ;;  %v300_v33 = vld [vmem:[%s4487_s1 + $0xf8] sm:$0xff]  ;;  %v299_v35 = vld [vmem:[%s4487_s1 + $0xf0] sm:$0xff] }
  0x16   : > { %1307 = vmatprep.subr.mxu0 %v2856_v2  ;;  %1532 = vmatprep.subr.mxu1 %v2856_v2  ;;  %v301_v32 = vld [vmem:[%s4487_s1 + $0x100] sm:$0xff]  ;;  %v332_v34 = vld [vmem:[%s4487_s1 + $0x1f8] sm:$0xff]  ;;  %v331_v36 = vld [vmem:[%s4487_s1 + $0x1f0] sm:$0xff] }
  0x17   : > { %1308 = vmatpush1.msra.mxu0 %v279_v11  ;;  %1533 = vmatpush1.msra.mxu1 %v311_v12  ;;  %v298_v37 = vld [vmem:[%s4487_s1 + $0xe8] sm:$0xff]  ;;  %v297_v39 = vld [vmem:[%s4487_s1 + $0xe0] sm:$0xff]  ;;  %v296_v41 = vld [vmem:[%s4487_s1 + $0xd8] sm:$0xff] }
  0x18   : > { %1309 = vmatprep.subr.mxu0 %v2856_v2  ;;  %1534 = vmatprep.subr.mxu1 %v2856_v2  ;;  %v330_v38 = vld [vmem:[%s4487_s1 + $0x1e8] sm:$0xff]  ;;  %v329_v40 = vld [vmem:[%s4487_s1 + $0x1e0] sm:$0xff]  ;;  %v328_v42 = vld [vmem:[%s4487_s1 + $0x1d8] sm:$0xff] }
  0x19   : > { %1310 = vmatpush1.msra.mxu0 %v278_v13  ;;  %1535 = vmatpush1.msra.mxu1 %v310_v14  ;;  %v295_v43 = vld [vmem:[%s4487_s1 + $0xd0] sm:$0xff]  ;;  %v294_v45 = vld [vmem:[%s4487_s1 + $0xc8] sm:$0xff]  ;;  %v293_v47 = vld [vmem:[%s4487_s1 + $0xc0] sm:$0xff] }
  0x1a   : > { %1311 = vmatprep.subr.mxu0 %v2856_v2  ;;  %1536 = vmatprep.subr.mxu1 %v2856_v2  ;;  %v327_v44 = vld [vmem:[%s4487_s1 + $0x1d0] sm:$0xff]  ;;  %v326_v46 = vld [vmem:[%s4487_s1 + $0x1c8] sm:$0xff]  ;;  %v325_v48 = vld [vmem:[%s4487_s1 + $0x1c0] sm:$0xff] }
  0x1b   : > { %1312 = vmatpush1.msra.mxu0 %v277_v15  ;;  %1537 = vmatpush1.msra.mxu1 %v309_v16  ;;  %v292_v49 = vld [vmem:[%s4487_s1 + $0xb8] sm:$0xff]  ;;  %v291_v51 = vld [vmem:[%s4487_s1 + $0xb0] sm:$0xff]  ;;  %v290_v53 = vld [vmem:[%s4487_s1 + $0xa8] sm:$0xff] }
  0x1c   : > { %1313 = vmatprep.subr.mxu0 %v2856_v2  ;;  %1538 = vmatprep.subr.mxu1 %v2856_v2  ;;  %v324_v50 = vld [vmem:[%s4487_s1 + $0x1b8] sm:$0xff]  ;;  %v323_v52 = vld [vmem:[%s4487_s1 + $0x1b0] sm:$0xff]  ;;  %v322_v54 = vld [vmem:[%s4487_s1 + $0x1a8] sm:$0xff] }
  0x1d   : > { %1314 = vmatpush1.msra.mxu0 %v276_v17  ;;  %1539 = vmatpush1.msra.mxu1 %v308_v18  ;;  %v289_v55 = vld [vmem:[%s4487_s1 + $0xa0] sm:$0xff]  ;;  %v3126_v58 = vld [vmem:[%s3114_s6 + $0x8] sm:$0xff]  ;;  %v288_v59 = vld [vmem:[%s4487_s1 + $0x98] sm:$0xff] }
  0x1e   : > { %1315 = vmatprep.subr.mxu0 %v2856_v2  ;;  %1540 = vmatprep.subr.mxu1 %v2856_v2  ;;  %v321_v56 = vld [vmem:[%s4487_s1 + $0x1a0] sm:$0xff]  ;;  %v320_v60 = vld [vmem:[%s4487_s1 + $0x198] sm:$0xff]  ;;  %v287_v61 = vld [vmem:[%s4487_s1 + $0x90] sm:$0xff]  ;;  %v495_v0 = vrot.slane %v3126_v58, 1  ;;  %v640_v6 = vrot.slane %v3126_v58, 2 }
  0x1f   : > { %1316 = vmatpush1.msra.mxu0 %v275_v19  ;;  %1541 = vmatpush1.msra.mxu1 %v307_v20  ;;  %v215_v57 = vld [vmem:[%s3114_s6] sm:$0xff]  ;;  %v319_v62 = vld [vmem:[%s4487_s1 + $0x190] sm:$0xff]  ;;  %v286_v3 = vld [vmem:[%s4487_s1 + $0x88] sm:$0xff] }
  0x20   : > { %1317 = vmatprep.subr.mxu0 %v2856_v2  ;;  %1542 = vmatprep.subr.mxu1 %v2856_v2  ;;  %v494_v63 = vrot.slane %v215_v57, 1  ;;  %v217_v1 = vld [vmem:[%s3114_s6 + $0x10] sm:$0x3]  ;;  %v318_v4 = vld [vmem:[%s4487_s1 + $0x188] sm:$0xff]  ;;  %v639_v5 = vrot.slane %v215_v57, 2  ;;  %v285_v8 = vld [vmem:[%s4487_s1 + $0x80] sm:$0xff] }
  0x21   : > { %1318 = vmatpush1.msra.mxu0 %v274_v21  ;;  %1543 = vmatpush1.msra.mxu1 %v306_v22  ;;  %v497_v7 = vrot.slane %v217_v1, 1  ;;  %v3162_v10 = vld [vmem:[%s3114_s6 + $0x20] sm:$0xff]  ;;  %v218_v12 = vld [vmem:[%s3114_s6 + $0x18] sm:$0xff]  ;;  %v642_v14 = vrot.slane %v217_v1, 2  ;;  %v220_v19 = vld [vmem:[%s3114_s6 + $0x28] sm:$0x3] }
  0x22   : > { %1319 = vmatprep.subr.mxu0 %v2856_v2  ;;  %1544 = vmatprep.subr.mxu1 %v2856_v2  ;;  %v496_v9 = vsel %vm493_vm0, %v494_v63, %v495_v0  ;;  %v317_v11 = vld [vmem:[%s4487_s1 + $0x180] sm:$0xff]  ;;  %v641_v13 = vsel %vm638_vm1, %v639_v5, %v640_v6  ;;  %v499_v16 = vrot.slane %v218_v12, 1  ;;  %v500_v17 = vrot.slane %v3162_v10, 1  ;;  %v348_v18 = vld [vmem:[%s4487_s1 + $0x278] sm:$0xff] }
  0x23   : > { %1320 = vmatpush1.msra.mxu0 %v273_v23  ;;  %1545 = vmatpush1.msra.mxu1 %v305_v24  ;;  %v498_v15 = vsel %vm493_vm0, %v495_v0, %v497_v7  ;;  %v643_v20 = vsel %vm638_vm1, %v640_v6, %v642_v14  ;;  %v644_v21 = vrot.slane %v218_v12, 2  ;;  %v645_v22 = vrot.slane %v3162_v10, 2  ;;  %v347_v23 = vld [vmem:[%s4487_s1 + $0x270] sm:$0xff]  ;;  %v376_v63 = vld [vmem:[%s4487_s1 + $0x358] sm:$0xff]  ;;  %v341_v7 = vld [vmem:[%s4487_s1 + $0x240] sm:$0xff] }
  0x24   : > { %1321 = vmatprep.subr.mxu0 %v2856_v2  ;;  %1546 = vmatprep.subr.mxu1 %v2856_v2  ;;  %v3185_v24 = vsel %vm493_vm0, %v499_v16, %v500_v17  ;;  %v229_v6 = vld [vmem:[%s3114_s6 + $0x70] sm:$0x3]  ;;  %v340_v16 = vld [vmem:[%s4487_s1 + $0x238] sm:$0xff] }
  0x25   : > { %1322 = vmatpush1.msra.mxu0 %v272_v25  ;;  %1547 = vmatpush1.msra.mxu1 %v304_v26  ;;  %v502_v25 = vrot.slane %v220_v19, 1  ;;  %v3189_v26 = vld [vmem:[%s3114_s6 + $0x30] sm:$0xff]  ;;  %v517_v14 = vrot.slane %v229_v6, 1 }
  0x26   : > { %1323 = vmatprep.subr.mxu0 %v2856_v2  ;;  %1548 = vmatprep.subr.mxu1 %v2856_v2 }
  0x27   : > { %1324 = vmatpush1.msra.mxu0 %v271_v27  ;;  %1549 = vmatpush1.msra.mxu1 %v303_v28  ;;  %v3192_v27 = vld [vmem:[%s3114_s6 + $0x38] sm:$0xff]  ;;  %v346_v28 = vld [vmem:[%s4487_s1 + $0x268] sm:$0xff] }
  0x28   : > { %1325 = vmatprep.subr.mxu0 %v2856_v2  ;;  %1550 = vmatprep.subr.mxu1 %v2856_v2 }
  0x29   : > { %1326 = vmatpush1.msra.mxu0 %v270_v29  ;;  %1551 = vmatpush1.msra.mxu1 %v302_v30  ;;  %v380_v29 = vld [vmem:[%s4487_s1 + $0x378] sm:$0xff]  ;;  %v3204_v30 = vsel %vm638_vm1, %v644_v21, %v645_v22 }
  0x2a   : > { %1327 = vmatprep.subr.mxu0 %v2856_v2  ;;  %1552 = vmatprep.subr.mxu1 %v2856_v2 }
  0x2b   : > { %1328 = vmatpush1.msra.mxu0 %v269_v31  ;;  %1553 = vmatpush1.msra.mxu1 %v301_v32  ;;  %v647_v31 = vrot.slane %v220_v19, 2  ;;  %v3209_v32 = vsel %vm493_vm0, %v500_v17, %v502_v25  ;;  %v374_v17 = vld [vmem:[%s4487_s1 + $0x348] sm:$0xff]  ;;  %v662_v19 = vrot.slane %v229_v6, 2  ;;  %v339_v25 = vld [vmem:[%s4487_s1 + $0x230] sm:$0xff] }
  0x2c   : > { %1329 = vmatprep.subr.mxu0 %v2856_v2  ;;  %1554 = vmatprep.subr.mxu1 %v2856_v2 }
  0x2d   : > { %1330 = vmatpush2.msra.mxu0 %v300_v33  ;;  %1555 = vmatpush2.msra.mxu1 %v332_v34  ;;  %v504_v33 = vrot.slane %v3189_v26, 1  ;;  %v505_v34 = vrot.slane %v3192_v27, 1 }
  0x2e   : > { %1331 = vmatprep.subr.mxu0 %v2856_v2  ;;  %1556 = vmatprep.subr.mxu1 %v2856_v2 }
  0x2f   : > { %1332 = vmatpush2.msra.mxu0 %v299_v35  ;;  %1557 = vmatpush2.msra.mxu1 %v331_v36  ;;  %v223_v35 = vld [vmem:[%s3114_s6 + $0x40] sm:$0x3] }
  0x30   : > { %1333 = vmatprep.subr.mxu0 %v2856_v2  ;;  %1558 = vmatprep.subr.mxu1 %v2856_v2  ;;  %v345_v36 = vld [vmem:[%s4487_s1 + $0x260] sm:$0xff] }
  0x31   : > { %1334 = vmatpush2.msra.mxu0 %v298_v37  ;;  %1559 = vmatpush2.msra.mxu1 %v330_v38  ;;  %v379_v37 = vld [vmem:[%s4487_s1 + $0x370] sm:$0xff]  ;;  %v3224_v38 = vsel %vm638_vm1, %v645_v22, %v647_v31 }
  0x32   : > { %1335 = vmatprep.subr.mxu0 %v2856_v2  ;;  %1560 = vmatprep.subr.mxu1 %v2856_v2 }
  0x33   : > { %1336 = vmatpush2.msra.mxu0 %v297_v39  ;;  %1561 = vmatpush2.msra.mxu1 %v329_v40  ;;  %v649_v39 = vrot.slane %v3189_v26, 2  ;;  %v650_v40 = vrot.slane %v3192_v27, 2 }
  0x34   : > { %1337 = vmatprep.subr.mxu0 %v2856_v2  ;;  %1562 = vmatprep.subr.mxu1 %v2856_v2 }
  0x35   : > { %1338 = vmatpush2.msra.mxu0 %v296_v41  ;;  %1563 = vmatpush2.msra.mxu1 %v328_v42  ;;  %v3230_v41 = vsel %vm493_vm0, %v504_v33, %v505_v34  ;;  %v3233_v42 = vld [vmem:[%s3114_s6 + $0x48] sm:$0xff] }
  0x36   : > { %1339 = vmatprep.subr.mxu0 %v2856_v2  ;;  %1564 = vmatprep.subr.mxu1 %v2856_v2 }
  0x37   : > { %1340 = vmatpush2.msra.mxu0 %v295_v43  ;;  %1565 = vmatpush2.msra.mxu1 %v327_v44  ;;  %v507_v43 = vrot.slane %v223_v35, 1  ;;  %v3237_v44 = vld [vmem:[%s3114_s6 + $0x50] sm:$0xff] }
  0x38   : > { %1341 = vmatprep.subr.mxu0 %v2856_v2  ;;  %1566 = vmatprep.subr.mxu1 %v2856_v2 }
  0x39   : > { %1342 = vmatpush2.msra.mxu0 %v294_v45  ;;  %1567 = vmatpush2.msra.mxu1 %v326_v46  ;;  %v344_v45 = vld [vmem:[%s4487_s1 + $0x258] sm:$0xff]  ;;  %v378_v46 = vld [vmem:[%s4487_s1 + $0x368] sm:$0xff] }
  0x3a   : > { %1343 = vmatprep.subr.mxu0 %v2856_v2  ;;  %1568 = vmatprep.subr.mxu1 %v2856_v2 }
  0x3b   : > { %1344 = vmatpush2.msra.mxu0 %v293_v47  ;;  %1569 = vmatpush2.msra.mxu1 %v325_v48  ;;  %v3250_v47 = vsel %vm638_vm1, %v649_v39, %v650_v40  ;;  %v652_v48 = vrot.slane %v223_v35, 2  ;;  %v3374_v35 = vld [vmem:[%s3114_s6 + $0x90] sm:$0xff]  ;;  %v338_v39 = vld [vmem:[%s4487_s1 + $0x228] sm:$0xff] }
  0x3c   : > { %1345 = vmatprep.subr.mxu0 %v2856_v2  ;;  %1570 = vmatprep.subr.mxu1 %v2856_v2 }
  0x3d   : > { %1346 = vmatpush2.msra.mxu0 %v292_v49  ;;  %1571 = vmatpush2.msra.mxu1 %v324_v50  ;;  %v3254_v49 = vsel %vm493_vm0, %v505_v34, %v507_v43  ;;  %v509_v50 = vrot.slane %v3233_v42, 1 }
  0x3e   : > { %1347 = vmatprep.subr.mxu0 %v2856_v2  ;;  %1572 = vmatprep.subr.mxu1 %v2856_v2 }
  0x3f   : > { %1348 = vmatpush2.msra.mxu0 %v291_v51  ;;  %1573 = vmatpush2.msra.mxu1 %v323_v52  ;;  %v510_v51 = vrot.slane %v3237_v44, 1  ;;  %v226_v52 = vld [vmem:[%s3114_s6 + $0x58] sm:$0x3] }
  0x40   : > { %1349 = vmatprep.subr.mxu0 %v2856_v2  ;;  %1574 = vmatprep.subr.mxu1 %v2856_v2  ;;  %v657_v1 = vrot.slane %v226_v52, 2 }
  0x41   : > { %1350 = vmatpush2.msra.mxu0 %v290_v53  ;;  %1575 = vmatpush2.msra.mxu1 %v322_v54  ;;  %v343_v53 = vld [vmem:[%s4487_s1 + $0x250] sm:$0xff]  ;;  %v377_v54 = vld [vmem:[%s4487_s1 + $0x360] sm:$0xff] }
  0x42   : > { %1351 = vmatprep.subr.mxu0 %v2856_v2  ;;  %1576 = vmatprep.subr.mxu1 %v2856_v2 }
  0x43   : > { %1352 = vmatpush2.msra.mxu0 %v289_v55  ;;  %1577 = vmatpush2.msra.mxu1 %v321_v56  ;;  %v3271_v55 = vsel %vm638_vm1, %v650_v40, %v652_v48  ;;  %v654_v56 = vrot.slane %v3233_v42, 2  ;;  %v372_v40 = vld [vmem:[%s4487_s1 + $0x338] sm:$0xff]  ;;  %v524_v48 = vrot.slane %v3374_v35, 1 }
  0x44   : > { %1353 = vmatprep.subr.mxu0 %v2856_v2  ;;  %1578 = vmatprep.subr.mxu1 %v2856_v2 }
  0x45   : > { %1354 = vmatpush2.msra.mxu0 %v288_v59  ;;  %1579 = vmatpush2.msra.mxu1 %v320_v60  ;;  %v3280_v59 = vld [vmem:[%s3114_s6 + $0x60] sm:$0xff]  ;;  %v512_v60 = vrot.slane %v226_v52, 1 }
  0x46   : > { %1355 = vmatprep.subr.mxu0 %v2856_v2  ;;  %1580 = vmatprep.subr.mxu1 %v2856_v2  ;;  %v337_v52 = vld [vmem:[%s4487_s1 + $0x220] sm:$0xff] }
  0x47   : > { %1356 = vmatpush2.msra.mxu0 %v287_v61  ;;  %1581 = vmatpush2.msra.mxu1 %v319_v62  ;;  %v3284_v61 = vld [vmem:[%s3114_s6 + $0x68] sm:$0xff] }
  0x48   : > { %1357 = vmatprep.subr.mxu0 %v2856_v2  ;;  %1582 = vmatprep.subr.mxu1 %v2856_v2  ;;  %v342_v62 = vld [vmem:[%s4487_s1 + $0x248] sm:$0xff]  ;;  %v515_v5 = vrot.slane %v3284_v61, 1 }
  0x49   : > { %1358 = vmatpush2.msra.mxu0 %v286_v3  ;;  %1583 = vmatpush2.msra.mxu1 %v318_v4  ;;  %v3301_v3 = vsel %vm493_vm0, %v510_v51, %v512_v60  ;;  %v514_v4 = vrot.slane %v3280_v59, 1 }
  0x4a   : > { %1359 = vmatprep.subr.mxu0 %v2856_v2  ;;  %1584 = vmatprep.subr.mxu1 %v2856_v2 }
  0x4b   : > { %1360 = vmatpush2.msra.mxu0 %v285_v8  ;;  %1361 = vmatprep.mubr.f32.mxu0 %v496_v9  ;;  %v375_v8 = vld [vmem:[%s4487_s1 + $0x350] sm:$0xff] }
  0x4c   : > { %1585 = vmatpush2.msra.mxu1 %v317_v11  ;;  %1586 = vmatprep.mubr.f32.mxu1 %v218_v12  ;;  %v660_v11 = vrot.slane %v3284_v61, 2 }
  0x4d   : > { %1362 = vmatmul.mubr.f32.vlgmr.msra.gmra.mxu0 %v215_v57  ;;  %1587 = vmatmul.mubr.f32.vlgmr.msra.gmra.mxu1 %v641_v13  ;;  %v655_v57 = vrot.slane %v3237_v44, 2  ;;  %v3327_v13 = vld [vmem:[%s3114_s6 + $0x78] sm:$0xff] }
  0x4e   : > { %1747 = vmatprep.subr.mxu0 %v2856_v2  ;;  %1366 = vmatprep.mubr.f32.mxu0 %v498_v15  ;;  %v3331_v15 = vld [vmem:[%s3114_s6 + $0x80] sm:$0xff]  ;;  %v519_v21 = vrot.slane %v3327_v13, 1  ;;  %v664_v31 = vrot.slane %v3327_v13, 2 }
  0x4f   : > { %1748 = vmatpush1.msra.mxu0 %v348_v18  ;;  %1591 = vmatprep.mubr.f32.mxu1 %v3162_v10  ;;  %v3297_v0 = vsel %vm638_vm1, %v654_v56, %v655_v57  ;;  %v3318_v9 = vsel %vm638_vm1, %v655_v57, %v657_v1  ;;  %v520_v22 = vrot.slane %v3331_v15, 1  ;;  %v665_v33 = vrot.slane %v3331_v15, 2  ;;  %v3425_v1 = vld [vmem:[%s3114_s6 + $0xb0] sm:$0xff] }
  0x50   : > { %1749 = vmatprep.subr.mxu0 %v2856_v2  ;;  %1972 = vmatprep.subr.mxu1 %v2856_v2  ;;  %v669_v56 = vrot.slane %v3374_v35, 2 }
  0x51   : > { %1367 = vmatmul.mubr.f32.gmra.mxu0 %v3126_v58  ;;  %1592 = vmatmul.mubr.f32.gmra.mxu1 %v643_v20  ;;  %v3277_v58 = vsel %vm493_vm0, %v509_v50, %v510_v51  ;;  %v3348_v20 = vsel %vm493_vm0, %v515_v5, %v517_v14  ;;  %v3371_v34 = vsel %vm493_vm0, %v519_v21, %v520_v22  ;;  %v235_v51 = vld [vmem:[%s3114_s6 + $0xa0] sm:$0x3]  ;;  %v238_v14 = vld [vmem:[%s3114_s6 + $0xb8] sm:$0x3] }
  0x52   : > { %1750 = vmatpush1.msra.mxu0 %v347_v23  ;;  %1371 = vmatprep.mubr.f32.mxu0 %v3185_v24  ;;  %v232_v23 = vld [vmem:[%s3114_s6 + $0x88] sm:$0x3]  ;;  %v3391_v43 = vsel %vm638_vm1, %v664_v31, %v665_v33 }
  0x53   : > { %1596 = vmatprep.mubr.f32.mxu1 %v3189_v26  ;;  %1751 = vmatprep.subr.mxu0 %v2856_v2  ;;  %v3472_v31 = vld [vmem:[%s3114_s6 + $0xc8] sm:$0xff] }
  0x54   : > { %1752 = vmatpush1.msra.mxu0 %v346_v28  ;;  %1973 = vmatpush1.msra.mxu1 %v380_v29  ;;  %v373_v28 = vld [vmem:[%s4487_s1 + $0x340] sm:$0xff]  ;;  %v3365_v29 = vsel %vm638_vm1, %v660_v11, %v662_v19 }
  0x55   : > { %1372 = vmatmul.mubr.f32.gmra.mxu0 %v218_v12  ;;  %1597 = vmatmul.mubr.f32.gmra.mxu1 %v3204_v30  ;;  %v3324_v12 = vsel %vm493_vm0, %v514_v4, %v515_v5  ;;  %v336_v4 = vld [vmem:[%s4487_s1 + $0x218] sm:$0xff]  ;;  %v370_v5 = vld [vmem:[%s4487_s1 + $0x328] sm:$0xff] }
  0x56   : > { %1376 = vmatprep.mubr.f32.mxu0 %v3209_v32  ;;  %1601 = vmatprep.mubr.f32.mxu1 %v3192_v27 }
  0x57   : > { %1753 = vmatprep.subr.mxu0 %v2856_v2  ;;  %1974 = vmatprep.subr.mxu1 %v2856_v2 }
  0x58   : > { %1754 = vmatpush1.msra.mxu0 %v345_v36  ;;  %1975 = vmatpush1.msra.mxu1 %v379_v37  ;;  %v522_v36 = vrot.slane %v232_v23, 1  ;;  %v3378_v37 = vld [vmem:[%s3114_s6 + $0x98] sm:$0xff] }
  0x59   : > { %1377 = vmatmul.mubr.f32.gmra.mxu0 %v3162_v10  ;;  %1602 = vmatmul.mubr.f32.gmra.mxu1 %v3224_v38  ;;  %v659_v10 = vrot.slane %v3280_v59, 2  ;;  %v525_v50 = vrot.slane %v3378_v37, 1  ;;  %v670_v57 = vrot.slane %v3378_v37, 2 }
  0x5a   : > { %1381 = vmatprep.mubr.f32.mxu0 %v3230_v41  ;;  %1606 = vmatprep.mubr.f32.mxu1 %v3233_v42 }
  0x5b   : > { %1755 = vmatprep.subr.mxu0 %v2856_v2  ;;  %1976 = vmatprep.subr.mxu1 %v2856_v2  ;;  %v3344_v18 = vsel %vm638_vm1, %v659_v10, %v660_v11  ;;  %v3418_v60 = vsel %vm493_vm0, %v524_v48, %v525_v50  ;;  %v3438_v6 = vsel %vm638_vm1, %v669_v56, %v670_v57  ;;  %v530_v11 = vrot.slane %v3425_v1, 1 }
  0x5c   : > { %1756 = vmatpush1.msra.mxu0 %v344_v45  ;;  %1977 = vmatpush1.msra.mxu1 %v378_v46  ;;  %v667_v45 = vrot.slane %v232_v23, 2  ;;  %v3395_v46 = vsel %vm493_vm0, %v520_v22, %v522_v36  ;;  %v675_v22 = vrot.slane %v3425_v1, 2  ;;  %v368_v36 = vld [vmem:[%s4487_s1 + $0x318] sm:$0xff] }
  0x5d   : > { %1382 = vmatmul.mubr.f32.gmra.mxu0 %v3189_v26  ;;  %1607 = vmatmul.mubr.f32.gmra.mxu1 %v3250_v47 }
  0x5e   : > { %1386 = vmatprep.mubr.f32.mxu0 %v3254_v49  ;;  %1611 = vmatprep.mubr.f32.mxu1 %v3237_v44 }
  0x5f   : > { %1757 = vmatprep.subr.mxu0 %v2856_v2  ;;  %1978 = vmatprep.subr.mxu1 %v2856_v2 }
  0x60   : > { %1758 = vmatpush1.msra.mxu0 %v343_v53  ;;  %1979 = vmatpush1.msra.mxu1 %v377_v54  ;;  %v371_v53 = vld [vmem:[%s4487_s1 + $0x330] sm:$0xff]  ;;  %v3412_v54 = vsel %vm638_vm1, %v665_v33, %v667_v45  ;;  %v334_v33 = vld [vmem:[%s4487_s1 + $0x208] sm:$0xff] }
  0x61   : > { %1387 = vmatmul.mubr.f32.gmra.mxu0 %v3192_v27  ;;  %1612 = vmatmul.mubr.f32.gmra.mxu1 %v3271_v55 }
  0x62   : > { %1391 = vmatprep.mubr.f32.mxu0 %v3277_v58  ;;  %1616 = vmatprep.mubr.f32.mxu1 %v3280_v59 }
  0x63   : > { %1759 = vmatprep.subr.mxu0 %v2856_v2  ;;  %1980 = vmatprep.subr.mxu1 %v2856_v2 }
  0x64   : > { %1760 = vmatpush1.msra.mxu0 %v342_v62  ;;  %1981 = vmatpush1.msra.mxu1 %v376_v63  ;;  %v3421_v62 = vld [vmem:[%s3114_s6 + $0xa8] sm:$0xff]  ;;  %v527_v63 = vrot.slane %v235_v51, 1 }
  0x65   : > { %1392 = vmatmul.mubr.f32.gmra.mxu0 %v3233_v42  ;;  %1617 = vmatmul.mubr.f32.gmra.mxu1 %v3297_v0  ;;  %v529_v10 = vrot.slane %v3421_v62, 1  ;;  %v674_v21 = vrot.slane %v3421_v62, 2 }
  0x66   : > { %1396 = vmatprep.mubr.f32.mxu0 %v3301_v3  ;;  %1621 = vmatprep.mubr.f32.mxu1 %v3284_v61 }
  0x67   : > { %1761 = vmatprep.subr.mxu0 %v2856_v2  ;;  %1982 = vmatprep.subr.mxu1 %v2856_v2  ;;  %v3465_v23 = vsel %vm493_vm0, %v529_v10, %v530_v11  ;;  %v3519_v10 = vld [vmem:[%s3114_s6 + $0xe0] sm:$0xff] }
  0x68   : > { %1762 = vmatpush1.msra.mxu0 %v341_v7  ;;  %1983 = vmatpush1.msra.mxu1 %v375_v8  ;;  %v672_v7 = vrot.slane %v235_v51, 2  ;;  %v3442_v8 = vsel %vm493_vm0, %v525_v50, %v527_v63  ;;  %v535_v50 = vrot.slane %v3472_v31, 1  ;;  %v241_v51 = vld [vmem:[%s3114_s6 + $0xd0] sm:$0x3]  ;;  %v680_v63 = vrot.slane %v3472_v31, 2  ;;  %4551 = vst [vmem:[#allocation4_spill] sm:$0xff] %v3519_v10 }
  0x69   : > { %1397 = vmatmul.mubr.f32.gmra.mxu0 %v3237_v44  ;;  %1622 = vmatmul.mubr.f32.gmra.mxu1 %v3318_v9 }
  0x6a   : > { %1401 = vmatprep.mubr.f32.mxu0 %v3324_v12  ;;  %1626 = vmatprep.mubr.f32.mxu1 %v3327_v13  ;;  %v3459_v19 = vsel %vm638_vm1, %v670_v57, %v672_v7  ;;  %v537_v7 = vrot.slane %v241_v51, 1 }
  0x6b   : > { %1763 = vmatprep.subr.mxu0 %v2856_v2  ;;  %1984 = vmatprep.subr.mxu1 %v2856_v2 }
  0x6c   : > { %1764 = vmatpush1.msra.mxu0 %v340_v16  ;;  %1985 = vmatpush1.msra.mxu1 %v374_v17  ;;  %v335_v16 = vld [vmem:[%s4487_s1 + $0x210] sm:$0xff]  ;;  %v369_v17 = vld [vmem:[%s4487_s1 + $0x320] sm:$0xff] }
  0x6d   : > { %1402 = vmatmul.mubr.f32.gmra.mxu0 %v3280_v59  ;;  %1627 = vmatmul.mubr.f32.gmra.mxu1 %v3344_v18 }
  0x6e   : > { %1406 = vmatprep.mubr.f32.mxu0 %v3348_v20  ;;  %1631 = vmatprep.mubr.f32.mxu1 %v3331_v15 }
  0x6f   : > { %1765 = vmatprep.subr.mxu0 %v2856_v2  ;;  %1986 = vmatprep.subr.mxu1 %v2856_v2 }
  0x70   : > { %1766 = vmatpush1.msra.mxu0 %v339_v25  ;;  %1987 = vmatpush1.msra.mxu1 %v373_v28  ;;  %v3468_v25 = vld [vmem:[%s3114_s6 + $0xc0] sm:$0xff]  ;;  %v532_v28 = vrot.slane %v238_v14, 1 }
  0x71   : > { %1407 = vmatmul.mubr.f32.gmra.mxu0 %v3284_v61  ;;  %1632 = vmatmul.mubr.f32.gmra.mxu1 %v3365_v29  ;;  %v534_v48 = vrot.slane %v3468_v25, 1  ;;  %v679_v57 = vrot.slane %v3468_v25, 2 }
  0x72   : > { %1411 = vmatprep.mubr.f32.mxu0 %v3371_v34  ;;  %1636 = vmatprep.mubr.f32.mxu1 %v3374_v35  ;;  %v3489_v45 = vsel %vm493_vm0, %v530_v11, %v532_v28  ;;  %v364_v11 = vld [vmem:[%s4487_s1 + $0x2f8] sm:$0xff]  ;;  %v540_v28 = vrot.slane %v3519_v10, 1 }
  0x73   : > { %1767 = vmatprep.subr.mxu0 %v2856_v2  ;;  %1988 = vmatprep.subr.mxu1 %v2856_v2 }
  0x74   : > { %1768 = vmatpush1.msra.mxu0 %v338_v39  ;;  %1989 = vmatpush1.msra.mxu1 %v372_v40  ;;  %v3485_v39 = vsel %vm638_vm1, %v674_v21, %v675_v22  ;;  %v677_v40 = vrot.slane %v238_v14, 2  ;;  %v366_v14 = vld [vmem:[%s4487_s1 + $0x308] sm:$0xff]  ;;  %v3536_v21 = vsel %vm493_vm0, %v535_v50, %v537_v7  ;;  %v3566_v7 = vld [vmem:[%s3114_s6 + $0xf8] sm:$0xff] }
  0x75   : > { %1412 = vmatmul.mubr.f32.gmra.mxu0 %v3327_v13  ;;  %1637 = vmatmul.mubr.f32.gmra.mxu1 %v3391_v43  ;;  %4554 = vst [vmem:[#allocation7_spill] sm:$0xff] %v3566_v7 }
  0x76   : > { %1416 = vmatprep.mubr.f32.mxu0 %v3395_v46  ;;  %1641 = vmatprep.mubr.f32.mxu1 %v3378_v37  ;;  %v3506_v56 = vsel %vm638_vm1, %v675_v22, %v677_v40  ;;  %v365_v40 = vld [vmem:[%s4487_s1 + $0x300] sm:$0xff] }
  0x77   : > { %1769 = vmatprep.subr.mxu0 %v2856_v2  ;;  %1990 = vmatprep.subr.mxu1 %v2856_v2 }
  0x78   : > { %1770 = vmatpush1.msra.mxu0 %v337_v52  ;;  %1991 = vmatpush1.msra.mxu1 %v371_v53  ;;  %v333_v52 = vld [vmem:[%s4487_s1 + $0x200] sm:$0xff]  ;;  %v367_v53 = vld [vmem:[%s4487_s1 + $0x310] sm:$0xff] }
  0x79   : > { %1417 = vmatmul.mubr.f32.gmra.mxu0 %v3331_v15  ;;  %1642 = vmatmul.mubr.f32.gmra.mxu1 %v3412_v54 }
  0x7a   : > { %1421 = vmatprep.mubr.f32.mxu0 %v3418_v60  ;;  %1646 = vmatprep.mubr.f32.mxu1 %v3421_v62 }
  0x7b   : > { %1771 = vmatprep.subr.mxu0 %v2856_v2  ;;  %1992 = vmatprep.subr.mxu1 %v2856_v2 }
  0x7c   : > { %1772 = vmatpush1.msra.mxu0 %v336_v4  ;;  %1993 = vmatpush1.msra.mxu1 %v370_v5  ;;  %v3512_v4 = vsel %vm493_vm0, %v534_v48, %v535_v50  ;;  %v3515_v5 = vld [vmem:[%s3114_s6 + $0xd8] sm:$0xff] }
  0x7d   : > { %1422 = vmatmul.mubr.f32.gmra.mxu0 %v3374_v35  ;;  %1647 = vmatmul.mubr.f32.gmra.mxu1 %v3438_v6  ;;  %4550 = vst [vmem:[#allocation3_spill] sm:$0xff] %v3515_v5  ;;  %v539_v22 = vrot.slane %v3515_v5, 1  ;;  %v684_v50 = vrot.slane %v3515_v5, 2 }
  0x7e   : > { %1426 = vmatprep.mubr.f32.mxu0 %v3442_v8  ;;  %1651 = vmatprep.mubr.f32.mxu1 %v3425_v1 }
  0x7f   : > { %1773 = vmatprep.subr.mxu0 %v2856_v2  ;;  %1994 = vmatprep.subr.mxu1 %v2856_v2 }
  0x80   : > { %1774 = vmatpush1.msra.mxu0 %v335_v16  ;;  %1995 = vmatpush1.msra.mxu1 %v369_v17  ;;  %v3532_v16 = vsel %vm638_vm1, %v679_v57, %v680_v63  ;;  %v682_v17 = vrot.slane %v241_v51, 2  ;;  %v685_v51 = vrot.slane %v3519_v10, 2 }
  0x81   : > { %1427 = vmatmul.mubr.f32.gmra.mxu0 %v3378_v37  ;;  %1652 = vmatmul.mubr.f32.gmra.mxu1 %v3459_v19 }
  0x82   : > { %1431 = vmatprep.mubr.f32.mxu0 %v3465_v23  ;;  %1656 = vmatprep.mubr.f32.mxu1 %v3468_v25  ;;  %v3553_v48 = vsel %vm638_vm1, %v680_v63, %v682_v17  ;;  %v362_v63 = vld [vmem:[%s4487_s1 + $0x2e8] sm:$0xff] }
  0x83   : > { %1775 = vmatprep.subr.mxu0 %v2856_v2  ;;  %1996 = vmatprep.subr.mxu1 %v2856_v2  ;;  %4552 = vst [vmem:[#allocation5_spill] sm:$0xff] %v3553_v48 }
  0x84   : > { %1776 = vmatpush1.msra.mxu0 %v334_v33  ;;  %1997 = vmatpush1.msra.mxu1 %v368_v36  ;;  %v244_v33 = vld [vmem:[%s3114_s6 + $0xe8] sm:$0x3]  ;;  %v363_v36 = vld [vmem:[%s4487_s1 + $0x2f0] sm:$0xff] }
  0x85   : > { %1432 = vmatmul.mubr.f32.gmra.mxu0 %v3421_v62  ;;  %1657 = vmatmul.mubr.f32.gmra.mxu1 %v3485_v39  ;;  %v542_v57 = vrot.slane %v244_v33, 1  ;;  %v687_v17 = vrot.slane %v244_v33, 2  ;;  %v395_v33 = vld [vmem:[%s4487_s1 + $0x3f0] sm:$0xff] }
  0x86   : > { %1436 = vmatprep.mubr.f32.mxu0 %v3489_v45  ;;  %1661 = vmatprep.mubr.f32.mxu1 %v3472_v31 }
  0x87   : > { %1777 = vmatprep.subr.mxu0 %v2856_v2  ;;  %1998 = vmatprep.subr.mxu1 %v2856_v2 }
  0x88   : > { %1778 = vmatpush1.msra.mxu0 %v333_v52  ;;  %1999 = vmatpush1.msra.mxu1 %v367_v53  ;;  %v3559_v52 = vsel %vm493_vm0, %v539_v22, %v540_v28  ;;  %v3562_v53 = vld [vmem:[%s3114_s6 + $0xf0] sm:$0xff]  ;;  %v3583_v22 = vsel %vm493_vm0, %v540_v28, %v542_v57  ;;  %v361_v28 = vld [vmem:[%s4487_s1 + $0x2e0] sm:$0xff] }
  0x89   : > { %1437 = vmatmul.mubr.f32.gmra.mxu0 %v3425_v1  ;;  %1662 = vmatmul.mubr.f32.gmra.mxu1 %v3506_v56  ;;  %4553 = vst [vmem:[#allocation6_spill] sm:$0xff] %v3562_v53  ;;  %4556 = vst [vmem:[#allocation9_spill] sm:$0xff] %v3583_v22  ;;  %v689_v57 = vrot.slane %v3562_v53, 2 }
  0x8a   : > { %1441 = vmatprep.mubr.f32.mxu0 %v3512_v4  ;;  %1666 = vmatprep.mubr.f32.mxu1 %v3515_v5 }
  0x8b   : > { %1779 = vmatprep.subr.mxu0 %v2856_v2  ;;  %2000 = vmatprep.subr.mxu1 %v2856_v2 }
  0x8c   : > { %1780 = vmatpush2.msra.mxu0 %v364_v11  ;;  %2001 = vmatpush1.msra.mxu1 %v366_v14  ;;  %v396_v11 = vld [vmem:[%s4487_s1 + $0x3f8] sm:$0xff]  ;;  %v3579_v14 = vsel %vm638_vm1, %v684_v50, %v685_v51  ;;  %v3600_v50 = vsel %vm638_vm1, %v685_v51, %v687_v17  ;;  %v394_v17 = vld [vmem:[%s4487_s1 + $0x3e8] sm:$0xff] }
  0x8d   : > { %1442 = vmatmul.mubr.f32.gmra.mxu0 %v3468_v25  ;;  %1667 = vmatmul.mubr.f32.gmra.mxu1 %v3532_v16  ;;  %4555 = vst [vmem:[#allocation8_spill] sm:$0xff] %v3579_v14  ;;  %4557 = vst [vmem:[#allocation10_spill] sm:$0xff] %v3600_v50  ;;  %v360_v51 = vld [vmem:[%s4487_s1 + $0x2d8] sm:$0xff] }
  0x8e   : > { %1446 = vmatprep.mubr.f32.mxu0 %v3536_v21  ;;  %1671 = vmatprep.mubr.f32.mxu1 %v3519_v10 }
  0x8f   : > { %1781 = vmatprep.subr.mxu0 %v2856_v2  ;;  %2002 = vmatprep.subr.mxu1 %v2856_v2 }
  0x90   : > { %1782 = vmatpush2.msra.mxu0 %v363_v36  ;;  %2003 = vmatpush1.msra.mxu1 %v365_v40  ;;  %v544_v36 = vrot.slane %v3562_v53, 1  ;;  %v545_v40 = vrot.slane %v3566_v7, 1 }
  0x91   : > { %1447 = vmatmul.mubr.f32.gmra.mxu0 %v3472_v31  ;;  %1672 = vmatmul.mubr.f32.gmra.mxu1 %v3553_v48  ;;  %v247_v48 = vld [vmem:[%s3114_s6 + $0x100] sm:$0x3] }
  0x92   : > { %1451 = vmatprep.mubr.f32.mxu0 %v3559_v52  ;;  %1676 = vmatprep.mubr.f32.mxu1 %v3562_v53 }
  0x93   : > { %1783 = vmatprep.subr.mxu0 %v2856_v2  ;;  %2004 = vmatprep.subr.mxu1 %v2856_v2 }
  0x94   : > { %1784 = vmatpush2.msra.mxu0 %v362_v63  ;;  %2005 = vmatpush2.msra.mxu1 %v396_v11  ;;  %v690_v63 = vrot.slane %v3566_v7, 2  ;;  %v3606_v11 = vsel %vm493_vm0, %v544_v36, %v545_v40 }
  0x95   : > { %1452 = vmatmul.mubr.f32.gmra.mxu0 %v3515_v5  ;;  %1677 = vmatmul.mubr.f32.gmra.mxu1 %v3579_v14  ;;  %4558 = vst [vmem:[#allocation11_spill] sm:$0xff] %v3606_v11  ;;  %v3609_v14 = vld [vmem:[%s3114_s6 + $0x108] sm:$0xff]  ;;  %v547_v5 = vrot.slane %v247_v48, 1 }
  0x96   : > { %1456 = vmatprep.mubr.f32.mxu0 %v3583_v22  ;;  %1681 = vmatprep.mubr.f32.mxu1 %v3566_v7  ;;  %4559 = vst [vmem:[#allocation12_spill] sm:$0xff] %v3609_v14  ;;  %v3613_v22 = vld [vmem:[%s3114_s6 + $0x110] sm:$0xff]  ;;  %v3626_v36 = vsel %vm638_vm1, %v689_v57, %v690_v63  ;;  %v694_v57 = vrot.slane %v3609_v14, 2 }
  0x97   : > { %1785 = vmatprep.subr.mxu0 %v2856_v2  ;;  %2006 = vmatprep.subr.mxu1 %v2856_v2  ;;  %4560 = vst [vmem:[#allocation13_spill] sm:$0xff] %v3613_v22  ;;  %4561 = vst [vmem:[#allocation14_spill] sm:$0xff] %v3626_v36 }
  0x98   : > { %1786 = vmatpush2.msra.mxu0 %v361_v28  ;;  %2007 = vmatpush2.msra.mxu1 %v395_v33  ;;  %v692_v28 = vrot.slane %v247_v48, 2  ;;  %v3630_v33 = vsel %vm493_vm0, %v545_v40, %v547_v5  ;;  %v359_v5 = vld [vmem:[%s4487_s1 + $0x2d0] sm:$0xff]  ;;  %v393_v48 = vld [vmem:[%s4487_s1 + $0x3e0] sm:$0xff] }
  0x99   : > { %1457 = vmatmul.mubr.f32.gmra.mxu0 %v3519_v10  ;;  %1682 = vmatmul.mubr.f32.gmra.mxu1 %v3600_v50  ;;  %4562 = vst [vmem:[#allocation15_spill] sm:$0xff] %v3630_v33  ;;  %v549_v50 = vrot.slane %v3609_v14, 1  ;;  %v550_v10 = vrot.slane %v3613_v22, 1 }
  0x9a   : > { %1461 = vmatprep.mubr.f32.mxu0 %v3606_v11  ;;  %1686 = vmatprep.mubr.f32.mxu1 %v3609_v14  ;;  %v250_v11 = vld [vmem:[%s3114_s6 + $0x118] sm:$0x3]  ;;  %v3647_v40 = vsel %vm638_vm1, %v690_v63, %v692_v28  ;;  %v358_v63 = vld [vmem:[%s4487_s1 + $0x2c8] sm:$0xff] }
  0x9b   : > { %1787 = vmatprep.subr.mxu0 %v2856_v2  ;;  %2008 = vmatprep.subr.mxu1 %v2856_v2  ;;  %4563 = vst [vmem:[#allocation16_spill] sm:$0xff] %v3647_v40 }
  0x9c   : > { %1788 = vmatpush2.msra.mxu0 %v360_v51  ;;  %2009 = vmatpush2.msra.mxu1 %v394_v17  ;;  %v695_v51 = vrot.slane %v3613_v22, 2  ;;  %v3653_v17 = vsel %vm493_vm0, %v549_v50, %v550_v10  ;;  %v392_v50 = vld [vmem:[%s4487_s1 + $0x3d8] sm:$0xff] }
  0x9d   : > { %1462 = vmatmul.mubr.f32.gmra.mxu0 %v3562_v53  ;;  %1687 = vmatmul.mubr.f32.gmra.mxu1 %v3626_v36  ;;  %4564 = vst [vmem:[#allocation17_spill] sm:$0xff] %v3653_v17  ;;  %v3656_v36 = vld [vmem:[%s3114_s6 + $0x120] sm:$0xff]  ;;  %v552_v53 = vrot.slane %v250_v11, 1 }
  0x9e   : > { %1466 = vmatprep.mubr.f32.mxu0 %v3630_v33  ;;  %1691 = vmatprep.mubr.f32.mxu1 %v3613_v22  ;;  %4565 = vst [vmem:[#allocation18_spill] sm:$0xff] %v3656_v36  ;;  %v3660_v33 = vld [vmem:[%s3114_s6 + $0x128] sm:$0xff]  ;;  %v3673_v28 = vsel %vm638_vm1, %v694_v57, %v695_v51  ;;  %v699_v57 = vrot.slane %v3656_v36, 2 }
  0x9f   : > { %1789 = vmatprep.subr.mxu0 %v2856_v2  ;;  %2010 = vmatprep.subr.mxu1 %v2856_v2  ;;  %4566 = vst [vmem:[#allocation19_spill] sm:$0xff] %v3660_v33  ;;  %4567 = vst [vmem:[#allocation20_spill] sm:$0xff] %v3673_v28 }
  0xa0   : > { %1790 = vmatpush2.msra.mxu0 %v359_v5  ;;  %2011 = vmatpush2.msra.mxu1 %v393_v48  ;;  %v697_v5 = vrot.slane %v250_v11, 2  ;;  %v3677_v48 = vsel %vm493_vm0, %v550_v10, %v552_v53  ;;  %v357_v10 = vld [vmem:[%s4487_s1 + $0x2c0] sm:$0xff]  ;;  %v391_v53 = vld [vmem:[%s4487_s1 + $0x3d0] sm:$0xff] }
  0xa1   : > { %1467 = vmatmul.mubr.f32.gmra.mxu0 %v3566_v7  ;;  %1692 = vmatmul.mubr.f32.gmra.mxu1 %v3647_v40  ;;  %4568 = vst [vmem:[#allocation21_spill] sm:$0xff] %v3677_v48  ;;  %v554_v40 = vrot.slane %v3656_v36, 1  ;;  %v555_v7 = vrot.slane %v3660_v33, 1 }
  0xa2   : > { %1471 = vmatprep.mubr.f32.mxu0 %v3653_v17  ;;  %1696 = vmatprep.mubr.f32.mxu1 %v3656_v36  ;;  %v253_v17 = vld [vmem:[%s3114_s6 + $0x130] sm:$0x3]  ;;  %v3694_v11 = vsel %vm638_vm1, %v695_v51, %v697_v5  ;;  %v356_v51 = vld [vmem:[%s4487_s1 + $0x2b8] sm:$0xff] }
  0xa3   : > { %1791 = vmatprep.subr.mxu0 %v2856_v2  ;;  %2012 = vmatprep.subr.mxu1 %v2856_v2  ;;  %4569 = vst [vmem:[#allocation22_spill] sm:$0xff] %v3694_v11 }
  0xa4   : > { %1792 = vmatpush2.msra.mxu0 %v358_v63  ;;  %2013 = vmatpush2.msra.mxu1 %v392_v50  ;;  %v700_v63 = vrot.slane %v3660_v33, 2  ;;  %v3700_v50 = vsel %vm493_vm0, %v554_v40, %v555_v7  ;;  %v390_v40 = vld [vmem:[%s4487_s1 + $0x3c8] sm:$0xff] }
  0xa5   : > { %1472 = vmatmul.mubr.f32.gmra.mxu0 %v3609_v14  ;;  %1697 = vmatmul.mubr.f32.gmra.mxu1 %v3673_v28  ;;  %4570 = vst [vmem:[#allocation23_spill] sm:$0xff] %v3700_v50  ;;  %v3703_v28 = vld [vmem:[%s3114_s6 + $0x138] sm:$0xff]  ;;  %v557_v14 = vrot.slane %v253_v17, 1 }
  0xa6   : > { %1476 = vmatprep.mubr.f32.mxu0 %v3677_v48  ;;  %1701 = vmatprep.mubr.f32.mxu1 %v3660_v33  ;;  %4571 = vst [vmem:[#allocation24_spill] sm:$0xff] %v3703_v28  ;;  %v3707_v48 = vld [vmem:[%s3114_s6 + $0x140] sm:$0xff]  ;;  %v3720_v5 = vsel %vm638_vm1, %v699_v57, %v700_v63  ;;  %v704_v57 = vrot.slane %v3703_v28, 2 }
  0xa7   : > { %1793 = vmatprep.subr.mxu0 %v2856_v2  ;;  %2014 = vmatprep.subr.mxu1 %v2856_v2  ;;  %4572 = vst [vmem:[#allocation25_spill] sm:$0xff] %v3707_v48  ;;  %4573 = vst [vmem:[#allocation26_spill] sm:$0xff] %v3720_v5 }
  0xa8   : > { %1794 = vmatpush2.msra.mxu0 %v357_v10  ;;  %2015 = vmatpush2.msra.mxu1 %v391_v53  ;;  %v702_v10 = vrot.slane %v253_v17, 2  ;;  %v3724_v53 = vsel %vm493_vm0, %v555_v7, %v557_v14  ;;  %v355_v7 = vld [vmem:[%s4487_s1 + $0x2b0] sm:$0xff]  ;;  %v389_v14 = vld [vmem:[%s4487_s1 + $0x3c0] sm:$0xff] }
  0xa9   : > { %1477 = vmatmul.mubr.f32.gmra.mxu0 %v3613_v22  ;;  %1702 = vmatmul.mubr.f32.gmra.mxu1 %v3694_v11  ;;  %4574 = vst [vmem:[#allocation27_spill] sm:$0xff] %v3724_v53  ;;  %v559_v11 = vrot.slane %v3703_v28, 1  ;;  %v560_v22 = vrot.slane %v3707_v48, 1 }
  0xaa   : > { %1481 = vmatprep.mubr.f32.mxu0 %v3700_v50  ;;  %1706 = vmatprep.mubr.f32.mxu1 %v3703_v28  ;;  %v256_v50 = vld [vmem:[%s3114_s6 + $0x148] sm:$0x3]  ;;  %v3741_v17 = vsel %vm638_vm1, %v700_v63, %v702_v10 }
  0xab   : > { %1795 = vmatprep.subr.mxu0 %v2856_v2  ;;  %2016 = vmatprep.subr.mxu1 %v2856_v2  ;;  %4575 = vst [vmem:[#allocation28_spill] sm:$0xff] %v3741_v17  ;;  %v354_v63 = vld [vmem:[%s4487_s1 + $0x2a8] sm:$0xff] }
  0xac   : > { %1796 = vmatpush2.msra.mxu0 %v356_v51  ;;  %2017 = vmatpush2.msra.mxu1 %v390_v40  ;;  %v705_v51 = vrot.slane %v3707_v48, 2  ;;  %v3747_v40 = vsel %vm493_vm0, %v559_v11, %v560_v22  ;;  %v388_v11 = vld [vmem:[%s4487_s1 + $0x3b8] sm:$0xff] }
  0xad   : > { %1482 = vmatmul.mubr.f32.gmra.mxu0 %v3656_v36  ;;  %1707 = vmatmul.mubr.f32.gmra.mxu1 %v3720_v5  ;;  %4576 = vst [vmem:[#allocation29_spill] sm:$0xff] %v3747_v40  ;;  %v3750_v5 = vld [vmem:[%s3114_s6 + $0x150] sm:$0xff]  ;;  %v562_v36 = vrot.slane %v256_v50, 1 }
  0xae   : > { %1486 = vmatprep.mubr.f32.mxu0 %v3724_v53  ;;  %1711 = vmatprep.mubr.f32.mxu1 %v3707_v48  ;;  %4577 = vst [vmem:[#allocation30_spill] sm:$0xff] %v3750_v5  ;;  %v3754_v53 = vld [vmem:[%s3114_s6 + $0x158] sm:$0xff]  ;;  %v3767_v10 = vsel %vm638_vm1, %v704_v57, %v705_v51  ;;  %v709_v57 = vrot.slane %v3750_v5, 2 }
  0xaf   : > { %1797 = vmatprep.subr.mxu0 %v2856_v2  ;;  %2018 = vmatprep.subr.mxu1 %v2856_v2  ;;  %4578 = vst [vmem:[#allocation31_spill] sm:$0xff] %v3767_v10 }
  0xb0   : > { %1798 = vmatpush2.msra.mxu0 %v355_v7  ;;  %2019 = vmatpush2.msra.mxu1 %v389_v14  ;;  %v707_v7 = vrot.slane %v256_v50, 2  ;;  %v3771_v14 = vsel %vm493_vm0, %v560_v22, %v562_v36  ;;  %v353_v22 = vld [vmem:[%s4487_s1 + $0x2a0] sm:$0xff]  ;;  %v387_v36 = vld [vmem:[%s4487_s1 + $0x3b0] sm:$0xff] }
  0xb1   : > { %1487 = vmatmul.mubr.f32.gmra.mxu0 %v3660_v33  ;;  %1712 = vmatmul.mubr.f32.gmra.mxu1 %v3741_v17  ;;  %4579 = vst [vmem:[#allocation32_spill] sm:$0xff] %v3771_v14  ;;  %v564_v17 = vrot.slane %v3750_v5, 1  ;;  %v565_v33 = vrot.slane %v3754_v53, 1 }
  0xb2   : > { %1491 = vmatprep.mubr.f32.mxu0 %v3747_v40  ;;  %1716 = vmatprep.mubr.f32.mxu1 %v3750_v5  ;;  %v259_v40 = vld [vmem:[%s3114_s6 + $0x160] sm:$0x3]  ;;  %v3788_v50 = vsel %vm638_vm1, %v705_v51, %v707_v7  ;;  %v352_v51 = vld [vmem:[%s4487_s1 + $0x298] sm:$0xff] }
  0xb3   : > { %1799 = vmatprep.subr.mxu0 %v2856_v2  ;;  %2020 = vmatprep.subr.mxu1 %v2856_v2  ;;  %4580 = vst [vmem:[#allocation33_spill] sm:$0xff] %v3788_v50 }
  0xb4   : > { %1800 = vmatpush2.msra.mxu0 %v354_v63  ;;  %2021 = vmatpush2.msra.mxu1 %v388_v11  ;;  %v710_v63 = vrot.slane %v3754_v53, 2  ;;  %v3794_v11 = vsel %vm493_vm0, %v564_v17, %v565_v33  ;;  %v386_v17 = vld [vmem:[%s4487_s1 + $0x3a8] sm:$0xff] }
  0xb5   : > { %1492 = vmatmul.mubr.f32.gmra.mxu0 %v3703_v28  ;;  %1717 = vmatmul.mubr.f32.gmra.mxu1 %v3767_v10  ;;  %4581 = vst [vmem:[#allocation34_spill] sm:$0xff] %v3794_v11  ;;  %v3797_v10 = vld [vmem:[%s3114_s6 + $0x168] sm:$0xff]  ;;  %v567_v28 = vrot.slane %v259_v40, 1 }
  0xb6   : > { %1496 = vmatprep.mubr.f32.mxu0 %v3771_v14  ;;  %1721 = vmatprep.mubr.f32.mxu1 %v3754_v53  ;;  %v3801_v14 = vld [vmem:[%s3114_s6 + $0x170] sm:$0xff]  ;;  %v3814_v7 = vsel %vm638_vm1, %v709_v57, %v710_v63  ;;  %v714_v57 = vrot.slane %v3797_v10, 2 }
  0xb7   : > { %1801 = vmatprep.subr.mxu0 %v2856_v2  ;;  %2022 = vmatprep.subr.mxu1 %v2856_v2  ;;  %4582 = vst [vmem:[#allocation35_spill] sm:$0xff] %v3814_v7 }
  0xb8   : > { %1802 = vmatpush2.msra.mxu0 %v353_v22  ;;  %2023 = vmatpush2.msra.mxu1 %v387_v36  ;;  %v712_v22 = vrot.slane %v259_v40, 2  ;;  %v3818_v36 = vsel %vm493_vm0, %v565_v33, %v567_v28  ;;  %v351_v40 = vld [vmem:[%s4487_s1 + $0x290] sm:$0xff]  ;;  %v385_v33 = vld [vmem:[%s4487_s1 + $0x3a0] sm:$0xff] }
  0xb9   : > { %1497 = vmatmul.mubr.f32.gmra.mxu0 %v3707_v48  ;;  %1722 = vmatmul.mubr.f32.gmra.mxu1 %v3788_v50  ;;  %v569_v50 = vrot.slane %v3797_v10, 1  ;;  %v570_v48 = vrot.slane %v3801_v14, 1 }
  0xba   : > { %1501 = vmatprep.mubr.f32.mxu0 %v3794_v11  ;;  %1726 = vmatprep.mubr.f32.mxu1 %v3797_v10  ;;  %v262_v11 = vld [vmem:[%s3114_s6 + $0x178] sm:$0x3]  ;;  %v3835_v28 = vsel %vm638_vm1, %v710_v63, %v712_v22  ;;  %v350_v63 = vld [vmem:[%s4487_s1 + $0x288] sm:$0xff] }
  0xbb   : > { %1803 = vmatprep.subr.mxu0 %v2856_v2  ;;  %2024 = vmatprep.subr.mxu1 %v2856_v2  ;;  %4583 = vst [vmem:[#allocation36_spill] sm:$0xff] %v3835_v28  ;;  %v384_v22 = vld [vmem:[%s4487_s1 + $0x398] sm:$0xff] }
  0xbc   : > { %1804 = vmatpush2.msra.mxu0 %v352_v51  ;;  %2025 = vmatpush2.msra.mxu1 %v386_v17  ;;  %v715_v51 = vrot.slane %v3801_v14, 2  ;;  %v3842_v17 = vsel %vm493_vm0, %v569_v50, %v570_v48 }
  0xbd   : > { %1502 = vmatmul.mubr.f32.gmra.mxu0 %v3750_v5  ;;  %1727 = vmatmul.mubr.f32.gmra.mxu1 %v3814_v7  ;;  %4584 = vst [vmem:[#allocation37_spill] sm:$0xff] %v3842_v17  ;;  %v3845_v7 = vld [vmem:[%s3114_s6 + $0x180] sm:$0xff]  ;;  %v572_v5 = vrot.slane %v262_v11, 1 }
  0xbe   : > { %1506 = vmatprep.mubr.f32.mxu0 %v3818_v36  ;;  %1731 = vmatprep.mubr.f32.mxu1 %v3801_v14  ;;  %v3858_v50 = vsel %vm638_vm1, %v714_v57, %v715_v51  ;;  %v381_v57 = vld [vmem:[%s4487_s1 + $0x380] sm:$0xff] }
  0xbf   : > { %1805 = vmatprep.subr.mxu0 %v2856_v2  ;;  %2026 = vmatprep.subr.mxu1 %v2856_v2 }
  0xc0   : > { %1806 = vmatpush2.msra.mxu0 %v351_v40  ;;  %2027 = vmatpush2.msra.mxu1 %v385_v33  ;;  %v717_v40 = vrot.slane %v262_v11, 2  ;;  %v3863_v33 = vsel %vm493_vm0, %v570_v48, %v572_v5  ;;  %v349_v48 = vld [vmem:[%s4487_s1 + $0x280] sm:$0xff]  ;;  %v382_v5 = vld [vmem:[%s4487_s1 + $0x388] sm:$0xff] }
  0xc1   : > { %1507 = vmatmul.mubr.f32.gmra.mxu0 %v3754_v53  ;;  %1732 = vmatmul.mubr.f32.gmra.mxu1 %v3835_v28  ;;  %v3866_v28 = vld [vmem:[%s3114_s6 + $0x188] sm:$0xff] }
  0xc2   : > { %1511 = vmatprep.mubr.f32.mxu0 %v3842_v17  ;;  %1736 = vmatprep.mubr.f32.mxu1 %v3845_v7  ;;  %v383_v17 = vld [vmem:[%s4487_s1 + $0x390] sm:$0xff]  ;;  %v3876_v11 = vsel %vm638_vm1, %v715_v51, %v717_v40  ;;  %v412_v51 = vld [vmem:[%s4487_s1 + $0x478] sm:$0xff] }
  0xc3   : > { %1807 = vmatprep.subr.mxu0 %v2856_v2  ;;  %2028 = vmatprep.subr.mxu1 %v2856_v2 }
  0xc4   : > { %1808 = vmatpush2.msra.mxu0 %v350_v63  ;;  %2029 = vmatpush2.msra.mxu1 %v384_v22 }
  0xc5   : > { %1512 = vmatmul.mubr.f32.gmra.mxu0 %v3797_v10  ;;  %1737 = vmatmul.mubr.f32.gmra.mxu1 %v3858_v50 }
  0xc6   : > { %2030 = vmatprep.subr.mxu1 %v2856_v2  ;;  %1516 = vmatprep.mubr.f32.mxu0 %v3863_v33 }
  0xc7   : > { %1741 = vmatprep.mubr.f32.mxu1 %v3866_v28  ;;  %2031 = vmatpush2.msra.mxu1 %v383_v17  ;;  %v411_v17 = vld [vmem:[%s4487_s1 + $0x470] sm:$0xff] }
  0xc8   : > { %1809 = vmatprep.subr.mxu0 %v2856_v2  ;;  %2032 = vmatprep.subr.mxu1 %v2856_v2 }
  0xc9   : > { %1517 = vmatmul.mubr.f32.gmra.mxu0 %v3801_v14  ;;  %1742 = vmatmul.mubr.f32.gmra.mxu1 %v3876_v11 }
  0xca   : > { %1810 = vmatpush2.msra.mxu0 %v349_v48  ;;  %2033 = vmatpush2.msra.mxu1 %v382_v5  ;;  %v4597_v5 = vld [vmem:[#allocation12_spill] sm:$0xff] }
  0xcb   : > { %2034 = vmatprep.subr.mxu1 %v2856_v2  ;;  %1811 = vmatprep.mubr.f32.mxu0 %v3204_v30  ;;  %v410_v2 = vld [vmem:[%s4487_s1 + $0x468] sm:$0xff] }
  0xcc   : > { %2035 = vmatpush2.msra.mxu1 %v381_v57  ;;  %2036 = vmatprep.mubr.f32.mxu1 %v3230_v41  ;;  %v406_v30 = vld [vmem:[%s4487_s1 + $0x448] sm:$0xff] }
  0xcd   : > { %1812 = vmatmul.mubr.f32.vlgmr.msra.gmra.mxu0 %v3185_v24  ;;  %2037 = vmatmul.mubr.f32.vlgmr.msra.gmra.mxu1 %v3189_v26  ;;  %v409_v24 = vld [vmem:[%s4487_s1 + $0x460] sm:$0xff]  ;;  %v408_v26 = vld [vmem:[%s4487_s1 + $0x458] sm:$0xff] }
  0xce   : > { %2726 = vmatprep.subr.mxu0 %v412_v51  ;;  %1816 = vmatprep.mubr.f32.mxu0 %v3224_v38  ;;  %v404_v38 = vld [vmem:[%s4487_s1 + $0x438] sm:$0xff] }
  0xcf   : > { %2727 = vmatpush3.msra.mxu0 %v412_v51  ;;  %2041 = vmatprep.mubr.f32.mxu1 %v3254_v49 }
  0xd0   : > { %2728 = vmatprep.subr.mxu0 %v411_v17  ;;  %2806 = vmatprep.subr.mxu1 %v412_v51 }
  0xd1   : > { %1817 = vmatmul.mubr.f32.gmra.mxu0 %v3209_v32  ;;  %2042 = vmatmul.mubr.f32.gmra.mxu1 %v3192_v27  ;;  %v407_v27 = vld [vmem:[%s4487_s1 + $0x450] sm:$0xff]  ;;  %v405_v32 = vld [vmem:[%s4487_s1 + $0x440] sm:$0xff] }
  0xd2   : > { %1821 = vmatprep.mubr.f32.mxu0 %v3250_v47  ;;  %2046 = vmatprep.mubr.f32.mxu1 %v3277_v58 }
  0xd3   : > { %2729 = vmatpush3.msra.mxu0 %v411_v17  ;;  %2822 = vmatpush3.msra.mxu1 %v412_v51  ;;  %v4598_v51 = vld [vmem:[#allocation16_spill] sm:$0xff] }
  0xd4   : > { %2730 = vmatprep.subr.mxu0 %v410_v2  ;;  %2807 = vmatprep.subr.mxu1 %v411_v17 }
  0xd5   : > { %1822 = vmatmul.mubr.f32.gmra.mxu0 %v3230_v41  ;;  %2047 = vmatmul.mubr.f32.gmra.mxu1 %v3233_v42  ;;  %v403_v41 = vld [vmem:[%s4487_s1 + $0x430] sm:$0xff]  ;;  %v402_v42 = vld [vmem:[%s4487_s1 + $0x428] sm:$0xff] }
  0xd6   : > { %1826 = vmatprep.mubr.f32.mxu0 %v3271_v55  ;;  %2051 = vmatprep.mubr.f32.mxu1 %v3301_v3 }
  0xd7   : > { %2731 = vmatpush3.msra.mxu0 %v410_v2  ;;  %2823 = vmatpush3.msra.mxu1 %v411_v17  ;;  %v4599_v17 = vld [vmem:[#allocation21_spill] sm:$0xff] }
  0xd8   : > { %2732 = vmatprep.subr.mxu0 %v409_v24  ;;  %2808 = vmatprep.subr.mxu1 %v410_v2 }
  0xd9   : > { %1827 = vmatmul.mubr.f32.gmra.mxu0 %v3254_v49  ;;  %2052 = vmatmul.mubr.f32.gmra.mxu1 %v3237_v44  ;;  %v401_v44 = vld [vmem:[%s4487_s1 + $0x420] sm:$0xff]  ;;  %v400_v49 = vld [vmem:[%s4487_s1 + $0x418] sm:$0xff] }
  0xda   : > { %1831 = vmatprep.mubr.f32.mxu0 %v3297_v0  ;;  %2056 = vmatprep.mubr.f32.mxu1 %v3324_v12 }
  0xdb   : > { %2733 = vmatpush3.msra.mxu0 %v409_v24  ;;  %2824 = vmatpush3.msra.mxu1 %v410_v2 }
  0xdc   : > { %2734 = vmatprep.subr.mxu0 %v408_v26  ;;  %2809 = vmatprep.subr.mxu1 %v409_v24 }
  0xdd   : > { %1832 = vmatmul.mubr.f32.gmra.mxu0 %v3277_v58  ;;  %2057 = vmatmul.mubr.f32.gmra.mxu1 %v3280_v59  ;;  %v399_v58 = vld [vmem:[%s4487_s1 + $0x410] sm:$0xff]  ;;  %v398_v59 = vld [vmem:[%s4487_s1 + $0x408] sm:$0xff] }
  0xde   : > { %1836 = vmatprep.mubr.f32.mxu0 %v3318_v9  ;;  %2061 = vmatprep.mubr.f32.mxu1 %v3348_v20 }
  0xdf   : > { %2735 = vmatpush3.msra.mxu0 %v408_v26  ;;  %2825 = vmatpush3.msra.mxu1 %v409_v24 }
  0xe0   : > { %2736 = vmatprep.subr.mxu0 %v407_v27  ;;  %2810 = vmatprep.subr.mxu1 %v408_v26 }
  0xe1   : > { %1837 = vmatmul.mubr.f32.gmra.mxu0 %v3301_v3  ;;  %2062 = vmatmul.mubr.f32.gmra.mxu1 %v3284_v61  ;;  %v4585_v61 = vld [vmem:[#allocation3_spill] sm:$0xff] }
  0xe2   : > { %1841 = vmatprep.mubr.f32.mxu0 %v3344_v18  ;;  %2066 = vmatprep.mubr.f32.mxu1 %v3371_v34  ;;  %v397_v3 = vld [vmem:[%s4487_s1 + $0x400] sm:$0xff] }
  0xe3   : > { %2737 = vmatpush3.msra.mxu0 %v407_v27  ;;  %2826 = vmatpush3.msra.mxu1 %v408_v26 }
  0xe4   : > { %2738 = vmatprep.subr.mxu0 %v406_v30  ;;  %2811 = vmatprep.subr.mxu1 %v407_v27 }
  0xe5   : > { %1842 = vmatmul.mubr.f32.gmra.mxu0 %v3324_v12  ;;  %2067 = vmatmul.mubr.f32.gmra.mxu1 %v3327_v13  ;;  %v4586_v12 = vld [vmem:[#allocation5_spill] sm:$0xff] }
  0xe6   : > { %1846 = vmatprep.mubr.f32.mxu0 %v3365_v29  ;;  %2071 = vmatprep.mubr.f32.mxu1 %v3395_v46  ;;  %v4587_v13 = vld [vmem:[#allocation9_spill] sm:$0xff] }
  0xe7   : > { %2739 = vmatpush3.msra.mxu0 %v406_v30  ;;  %2827 = vmatpush3.msra.mxu1 %v407_v27 }
  0xe8   : > { %2740 = vmatprep.subr.mxu0 %v405_v32  ;;  %2812 = vmatprep.subr.mxu1 %v406_v30 }
  0xe9   : > { %1847 = vmatmul.mubr.f32.gmra.mxu0 %v3348_v20  ;;  %2072 = vmatmul.mubr.f32.gmra.mxu1 %v3331_v15  ;;  %v4588_v15 = vld [vmem:[#allocation4_spill] sm:$0xff] }
  0xea   : > { %1851 = vmatprep.mubr.f32.mxu0 %v3391_v43  ;;  %2076 = vmatprep.mubr.f32.mxu1 %v3418_v60  ;;  %v4589_v20 = vld [vmem:[#allocation8_spill] sm:$0xff] }
  0xeb   : > { %2741 = vmatpush3.msra.mxu0 %v405_v32  ;;  %2828 = vmatpush3.msra.mxu1 %v406_v30  ;;  %v4600_v30 = vld [vmem:[#allocation13_spill] sm:$0xff] }
  0xec   : > { %2742 = vmatprep.subr.mxu0 %v404_v38  ;;  %2813 = vmatprep.subr.mxu1 %v405_v32 }
  0xed   : > { %1852 = vmatmul.mubr.f32.gmra.mxu0 %v3371_v34  ;;  %2077 = vmatmul.mubr.f32.gmra.mxu1 %v3374_v35  ;;  %v4590_v34 = vld [vmem:[#allocation11_spill] sm:$0xff] }
  0xee   : > { %1856 = vmatprep.mubr.f32.mxu0 %v3412_v54  ;;  %2081 = vmatprep.mubr.f32.mxu1 %v3442_v8 }
  0xef   : > { %2743 = vmatpush3.msra.mxu0 %v404_v38  ;;  %2829 = vmatpush3.msra.mxu1 %v405_v32 }
  0xf0   : > { %2744 = vmatprep.subr.mxu0 %v403_v41  ;;  %2814 = vmatprep.subr.mxu1 %v404_v38 }
  0xf1   : > { %1857 = vmatmul.mubr.f32.gmra.mxu0 %v3395_v46  ;;  %2082 = vmatmul.mubr.f32.gmra.mxu1 %v3378_v37  ;;  %v4591_v46 = vld [vmem:[#allocation6_spill] sm:$0xff] }
  0xf2   : > { %1861 = vmatprep.mubr.f32.mxu0 %v3438_v6  ;;  %2086 = vmatprep.mubr.f32.mxu1 %v3465_v23 }
  0xf3   : > { %2745 = vmatpush3.msra.mxu0 %v403_v41  ;;  %2830 = vmatpush3.msra.mxu1 %v404_v38  ;;  %v4601_v38 = vld [vmem:[#allocation20_spill] sm:$0xff] }
  0xf4   : > { %2746 = vmatprep.subr.mxu0 %v402_v42  ;;  %2815 = vmatprep.subr.mxu1 %v403_v41 }
  0xf5   : > { %1862 = vmatmul.mubr.f32.gmra.mxu0 %v3418_v60  ;;  %2087 = vmatmul.mubr.f32.gmra.mxu1 %v3421_v62  ;;  %v4592_v62 = vld [vmem:[#allocation10_spill] sm:$0xff] }
  0xf6   : > { %1866 = vmatprep.mubr.f32.mxu0 %v3459_v19  ;;  %2091 = vmatprep.mubr.f32.mxu1 %v3489_v45 }
  0xf7   : > { %2747 = vmatpush3.msra.mxu0 %v402_v42  ;;  %2831 = vmatpush3.msra.mxu1 %v403_v41  ;;  %v4602_v41 = vld [vmem:[#allocation23_spill] sm:$0xff] }
  0xf8   : > { %2748 = vmatprep.subr.mxu0 %v401_v44  ;;  %2816 = vmatprep.subr.mxu1 %v402_v42 }
  0xf9   : > { %1867 = vmatmul.mubr.f32.gmra.mxu0 %v3442_v8  ;;  %2092 = vmatmul.mubr.f32.gmra.mxu1 %v3425_v1  ;;  %v4593_v1 = vld [vmem:[#allocation15_spill] sm:$0xff] }
  0xfa   : > { %1871 = vmatprep.mubr.f32.mxu0 %v3485_v39  ;;  %2096 = vmatprep.mubr.f32.mxu1 %v3512_v4 }
  0xfb   : > { %2749 = vmatpush3.msra.mxu0 %v401_v44  ;;  %2832 = vmatpush3.msra.mxu1 %v402_v42 }
  0xfc   : > { %2750 = vmatprep.subr.mxu0 %v400_v49  ;;  %2817 = vmatprep.subr.mxu1 %v401_v44 }
  0xfd   : > { %1872 = vmatmul.mubr.f32.gmra.mxu0 %v3465_v23  ;;  %2097 = vmatmul.mubr.f32.gmra.mxu1 %v3468_v25 }
  0xfe   : > { %1876 = vmatprep.mubr.f32.mxu0 %v3506_v56  ;;  %2101 = vmatprep.mubr.f32.mxu1 %v3536_v21 }
  0xff   : > { %2751 = vmatpush3.msra.mxu0 %v400_v49  ;;  %2833 = vmatpush3.msra.mxu1 %v401_v44 }
 0x100   : > { %2752 = vmatprep.subr.mxu0 %v399_v58  ;;  %2818 = vmatprep.subr.mxu1 %v400_v49 }
 0x101   : > { %1877 = vmatmul.mubr.f32.gmra.mxu0 %v3489_v45  ;;  %2102 = vmatmul.mubr.f32.gmra.mxu1 %v3472_v31  ;;  %v4594_v45 = vld [vmem:[#allocation7_spill] sm:$0xff] }
 0x102   : > { %1881 = vmatprep.mubr.f32.mxu0 %v3532_v16  ;;  %2106 = vmatprep.mubr.f32.mxu1 %v3559_v52 }
 0x103   : > { %2753 = vmatpush3.msra.mxu0 %v399_v58  ;;  %2834 = vmatpush3.msra.mxu1 %v400_v49 }
 0x104   : > { %2754 = vmatprep.subr.mxu0 %v398_v59  ;;  %2819 = vmatprep.subr.mxu1 %v399_v58 }
 0x105   : > { %1882 = vmatmul.mubr.f32.gmra.mxu0 %v3512_v4  ;;  %2107 = vmatmul.mubr.f32.gmra.mxu1 %v4585_v61 }
 0x106   : > { %1886 = vmatprep.mubr.f32.mxu0 %v4586_v12  ;;  %2111 = vmatprep.mubr.f32.mxu1 %v4587_v13 }
 0x107   : > { %2755 = vmatpush3.msra.mxu0 %v398_v59  ;;  %2835 = vmatpush3.msra.mxu1 %v399_v58 }
 0x108   : > { %2756 = vmatprep.subr.mxu0 %v397_v3  ;;  %2820 = vmatprep.subr.mxu1 %v398_v59 }
 0x109   : > { %1887 = vmatmul.mubr.f32.gmra.mxu0 %v3536_v21  ;;  %2112 = vmatmul.mubr.f32.gmra.mxu1 %v4588_v15  ;;  %v4595_v21 = vld [vmem:[#allocation14_spill] sm:$0xff] }
 0x10a   : > { %1891 = vmatprep.mubr.f32.mxu0 %v4589_v20  ;;  %2116 = vmatprep.mubr.f32.mxu1 %v4590_v34 }
 0x10b   : > { %2757 = vmatpush3.msra.mxu0 %v397_v3  ;;  %2836 = vmatpush3.msra.mxu1 %v398_v59  ;;  %v4603_v59 = vld [vmem:[#allocation18_spill] sm:$0xff] }
 0x10c   : > { %2821 = vmatprep.subr.mxu1 %v397_v3 }
 0x10d   : > { %v1363_v35 = vpop.f32.mrf.mxu0  ;;  %v1588_v37 = vpop.f32.mrf.mxu1  ;;  %1892 = vmatmul.mubr.f32.gmra.mxu0 %v3559_v52  ;;  %2117 = vmatmul.mubr.f32.gmra.mxu1 %v4591_v46  ;;  %v4596_v52 = vld [vmem:[#allocation17_spill] sm:$0xff]  ;;  %v4606_v46 = vld [vmem:[#allocation19_spill] sm:$0xff] }
 0x10e   : > { %v4009_v60 = vadd.f32 %v1588_v37, %v1363_v35  ;;  %1896 = vmatprep.mubr.f32.mxu0 %v4592_v62  ;;  %2121 = vmatprep.mubr.f32.mxu1 %v4593_v1 }
 0x10f   : > { %v1365_v8 = vpop.f32.mrf.mxu0  ;;  %v1590_v23 = vpop.f32.mrf.mxu1  ;;  %2837 = vmatpush3.msra.mxu1 %v397_v3  ;;  %v4604_v3 = vld [vmem:[#allocation22_spill] sm:$0xff] }
 0x110   : > { %v4607_v8 = vld [vmem:[#allocation26_spill] sm:$0xff]  ;;  %v4608_v23 = vld [vmem:[#allocation29_spill] sm:$0xff] }
 0x111   : > { %v1368_v25 = vpop.f32.mrf.mxu0  ;;  %v1593_v31 = vpop.f32.mrf.mxu1  ;;  %1897 = vmatmul.mubr.f32.gmra.mxu0 %v4587_v13  ;;  %2122 = vmatmul.mubr.f32.gmra.mxu1 %v4594_v45  ;;  %v4605_v13 = vld [vmem:[#allocation27_spill] sm:$0xff] }
 0x112   : > { %v4015_v4 = vadd.f32 %v1593_v31, %v1368_v25  ;;  %1901 = vmatprep.mubr.f32.mxu0 %v4595_v21  ;;  %2126 = vmatprep.mubr.f32.mxu1 %v4596_v52 }
 0x113   : > { %v1370_v63 = vpop.f32.mrf.mxu0  ;;  %v1595_v22 = vpop.f32.mrf.mxu1 }
 0x114   : > { %v4609_v63 = vld [vmem:[#allocation24_spill] sm:$0xff] }
 0x115   : > { %v1373_v40 = vpop.f32.mrf.mxu0  ;;  %v1598_v48 = vpop.f32.mrf.mxu1  ;;  %1902 = vmatmul.mubr.f32.gmra.mxu0 %v4590_v34  ;;  %2127 = vmatmul.mubr.f32.gmra.mxu1 %v4597_v5 }
 0x116   : > { %v4021_v57 = vadd.f32 %v1598_v48, %v1373_v40  ;;  %1906 = vmatprep.mubr.f32.mxu0 %v4598_v51  ;;  %2131 = vmatprep.mubr.f32.mxu1 %v4599_v17  ;;  %v4610_v40 = vld [vmem:[#allocation28_spill] sm:$0xff] }
 0x117   : > { %v1375_v2 = vpop.f32.mrf.mxu0  ;;  %v1600_v24 = vpop.f32.mrf.mxu1  ;;  %v4611_v48 = vld [vmem:[#allocation32_spill] sm:$0xff] }
 0x119   : > { %v1378_v26 = vpop.f32.mrf.mxu0  ;;  %v1603_v27 = vpop.f32.mrf.mxu1  ;;  %1907 = vmatmul.mubr.f32.gmra.mxu0 %v4593_v1  ;;  %2132 = vmatmul.mubr.f32.gmra.mxu1 %v4600_v30  ;;  %v4613_v30 = vld [vmem:[#allocation31_spill] sm:$0xff] }
 0x11a   : > { %v4027_v32 = vadd.f32 %v1603_v27, %v1378_v26  ;;  %1911 = vmatprep.mubr.f32.mxu0 %v4601_v38  ;;  %2136 = vmatprep.mubr.f32.mxu1 %v4602_v41  ;;  %v4612_v26 = vld [vmem:[#allocation25_spill] sm:$0xff] }
 0x11b   : > { %v1380_v42 = vpop.f32.mrf.mxu0  ;;  %v1605_v44 = vpop.f32.mrf.mxu1 }
 0x11d   : > { %v1383_v49 = vpop.f32.mrf.mxu0  ;;  %v1608_v58 = vpop.f32.mrf.mxu1  ;;  %1912 = vmatmul.mubr.f32.gmra.mxu0 %v4596_v52  ;;  %2137 = vmatmul.mubr.f32.gmra.mxu1 %v4603_v59  ;;  %v4615_v59 = vld [vmem:[#allocation30_spill] sm:$0xff] }
 0x11e   : > { %v4033_v61 = vadd.f32 %v1608_v58, %v1383_v49  ;;  %1916 = vmatprep.mubr.f32.mxu0 %v4604_v3  ;;  %2141 = vmatprep.mubr.f32.mxu1 %v4605_v13 }
 0x11f   : > { %v1385_v15 = vpop.f32.mrf.mxu0  ;;  %v1610_v34 = vpop.f32.mrf.mxu1 }
 0x120   : > { %v4616_v34 = vld [vmem:[#allocation33_spill] sm:$0xff] }
 0x121   : > { %v1388_v35 = vpop.f32.mrf.mxu0  ;;  %v1613_v37 = vpop.f32.mrf.mxu1  ;;  %1917 = vmatmul.mubr.f32.gmra.mxu0 %v4599_v17  ;;  %2142 = vmatmul.mubr.f32.gmra.mxu1 %v4606_v46 }
 0x122   : > { %v4039_v1 = vadd.f32 %v1613_v37, %v1388_v35  ;;  %1921 = vmatprep.mubr.f32.mxu0 %v4607_v8  ;;  %2146 = vmatprep.mubr.f32.mxu1 %v4608_v23 }
 0x123   : > { %v1390_v25 = vpop.f32.mrf.mxu0  ;;  %v1615_v31 = vpop.f32.mrf.mxu1 }
 0x124   : > { %v4618_v31 = vld [vmem:[#allocation37_spill] sm:$0xff] }
 0x125   : > { %v1393_v45 = vpop.f32.mrf.mxu0  ;;  %v1618_v52 = vpop.f32.mrf.mxu1  ;;  %1922 = vmatmul.mubr.f32.gmra.mxu0 %v4602_v41  ;;  %2147 = vmatmul.mubr.f32.gmra.mxu1 %v4609_v63  ;;  %v4614_v41 = vld [vmem:[#allocation34_spill] sm:$0xff]  ;;  %v818_v63 = vrot.slane %v3845_v7, 1 }
 0x126   : > { %v4045_v22 = vadd.f32 %v1618_v52, %v1393_v45  ;;  %1926 = vmatprep.mubr.f32.mxu0 %v4610_v40  ;;  %2151 = vmatprep.mubr.f32.mxu1 %v4611_v48 }
 0x127   : > { %v1395_v5 = vpop.f32.mrf.mxu0  ;;  %v1620_v17 = vpop.f32.mrf.mxu1 }
 0x128   : > { %v819_v5 = vrot.slane %v3866_v28, 1  ;;  %v265_v17 = vld [vmem:[%s3114_s6 + $0x190] sm:$0x3] }
 0x129   : > { %v1398_v2 = vpop.f32.mrf.mxu0  ;;  %v1623_v24 = vpop.f32.mrf.mxu1  ;;  %1927 = vmatmul.mubr.f32.gmra.mxu0 %v4605_v13  ;;  %2152 = vmatmul.mubr.f32.gmra.mxu1 %v4612_v26  ;;  %v821_v26 = vrot.slane %v265_v17, 1 }
 0x12a   : > { %v4051_v27 = vadd.f32 %v1623_v24, %v1398_v2  ;;  %1931 = vmatprep.mubr.f32.mxu0 %v4613_v30  ;;  %2156 = vmatprep.mubr.f32.mxu1 %v4614_v41 }
 0x12b   : > { %v1400_v42 = vpop.f32.mrf.mxu0  ;;  %v1625_v44 = vpop.f32.mrf.mxu1 }
 0x12d   : > { %v1403_v49 = vpop.f32.mrf.mxu0  ;;  %v1628_v58 = vpop.f32.mrf.mxu1  ;;  %1932 = vmatmul.mubr.f32.gmra.mxu0 %v4608_v23  ;;  %2157 = vmatmul.mubr.f32.gmra.mxu1 %v4615_v59  ;;  %v4617_v23 = vld [vmem:[#allocation35_spill] sm:$0xff] }
 0x12e   : > { %v4057_v15 = vadd.f32 %v1628_v58, %v1403_v49  ;;  %1936 = vmatprep.mubr.f32.mxu0 %v4616_v34  ;;  %2161 = vmatprep.mubr.f32.mxu1 %v3818_v36  ;;  %v820_v49 = vsel %vm493_vm0, %v818_v63, %v819_v5  ;;  %v4078_v58 = vld [vmem:[%s3114_s6 + $0x198] sm:$0xff]  ;;  %v4081_v59 = vld [vmem:[%s3114_s6 + $0x1a0] sm:$0xff] }
 0x12f   : > { %v1405_v13 = vpop.f32.mrf.mxu0  ;;  %v1630_v35 = vpop.f32.mrf.mxu1  ;;  %v931_v63 = vrot.slane %v4078_v58, 1 }
 0x130   : > { %v822_v35 = vsel %vm493_vm0, %v819_v5, %v821_v26 }
 0x131   : > { %v1408_v37 = vpop.f32.mrf.mxu0  ;;  %v1633_v46 = vpop.f32.mrf.mxu1  ;;  %1937 = vmatmul.mubr.f32.gmra.mxu0 %v4611_v48  ;;  %2162 = vmatmul.mubr.f32.gmra.mxu1 %v3754_v53  ;;  %v4619_v48 = vld [vmem:[#allocation36_spill] sm:$0xff] }
 0x132   : > { %v4063_v25 = vadd.f32 %v1633_v46, %v1408_v37  ;;  %1941 = vmatprep.mubr.f32.mxu0 %v4617_v23  ;;  %2166 = vmatprep.mubr.f32.mxu1 %v4618_v31 }
 0x133   : > { %v1410_v45 = vpop.f32.mrf.mxu0  ;;  %v1635_v52 = vpop.f32.mrf.mxu1 }
 0x134   : > { %v857_v45 = vrot.slane %v3845_v7, 2  ;;  %v858_v52 = vrot.slane %v3866_v28, 2 }
 0x135   : > { %v1413_v2 = vpop.f32.mrf.mxu0  ;;  %v1638_v24 = vpop.f32.mrf.mxu1  ;;  %1942 = vmatmul.mubr.f32.gmra.mxu0 %v4614_v41  ;;  %2167 = vmatmul.mubr.f32.gmra.mxu1 %v3797_v10 }
 0x136   : > { %v4072_v53 = vadd.f32 %v1638_v24, %v1413_v2  ;;  %1946 = vmatprep.mubr.f32.mxu0 %v4619_v48  ;;  %2171 = vmatprep.mubr.f32.mxu1 %v3863_v33  ;;  %v932_v2 = vrot.slane %v4081_v59, 1 }
 0x137   : > { %v1415_v42 = vpop.f32.mrf.mxu0  ;;  %v1640_v44 = vpop.f32.mrf.mxu1 }
 0x138   : > { %v4102_v44 = vsel %vm638_vm1, %v857_v45, %v858_v52 }
 0x139   : > { %v1418_v13 = vpop.f32.mrf.mxu0  ;;  %v1643_v41 = vpop.f32.mrf.mxu1  ;;  %1947 = vmatmul.mubr.f32.gmra.mxu0 %v3818_v36  ;;  %2172 = vmatmul.mubr.f32.gmra.mxu1 %v3801_v14  ;;  %v4094_v36 = vld [vmem:[%s3114_s6 + $0x1a8] sm:$0x3]  ;;  %s2677_s6 = sshll.u32 %s4637_s16, 8 }
 0x13a   : > { %v4085_v10 = vadd.f32 %v1643_v41, %v1418_v13  ;;  %1951 = vmatprep.mubr.f32.mxu0 %v3858_v50  ;;  %2176 = vmatprep.mubr.f32.mxu1 %v820_v49  ;;  %v933_v13 = vsel %vm493_vm0, %v931_v63, %v932_v2  ;;  %v860_v41 = vrot.slane %v265_v17, 2  ;;  %s4297_s30 = scalar_lea.vmem %s4488_s2, %s2677_s6 }
 0x13b   : > { %v1420_v37 = vpop.f32.mrf.mxu0  ;;  %v1645_v46 = vpop.f32.mrf.mxu1 }
 0x13c   : > { %4620 = vst [vmem:[#allocation3_spill] sm:$0xff] %v4085_v10  ;;  %v934_v37 = vrot.slane %v4094_v36, 1  ;;  %v4112_v45 = vsel %vm638_vm1, %v858_v52, %v860_v41 }
 0x13d   : > { %v1423_v14 = vpop.f32.mrf.mxu0  ;;  %v1648_v24 = vpop.f32.mrf.mxu1  ;;  %1952 = vmatmul.mubr.f32.gmra.mxu0 %v4618_v31  ;;  %2177 = vmatmul.mubr.f32.gmra.mxu1 %v3845_v7 }
 0x13e   : > { %v4098_v42 = vadd.f32 %v1648_v24, %v1423_v14  ;;  %1956 = vmatprep.mubr.f32.mxu0 %v3876_v11  ;;  %2181 = vmatprep.mubr.f32.mxu1 %v822_v35  ;;  %v935_v17 = vsel %vm493_vm0, %v932_v2, %v934_v37 }
 0x13f   : > { %v1425_v5 = vpop.f32.mrf.mxu0  ;;  %v1650_v26 = vpop.f32.mrf.mxu1 }
 0x141   : > { %v1428_v46 = vpop.f32.mrf.mxu0  ;;  %v1653_v10 = vpop.f32.mrf.mxu1  ;;  %1957 = vmatmul.mubr.f32.gmra.mxu0 %v3863_v33  ;;  %2182 = vmatmul.mubr.f32.gmra.mxu1 %v3866_v28 }
 0x142   : > { %v4108_v7 = vadd.f32 %v1653_v10, %v1428_v46  ;;  %1961 = vmatprep.mubr.f32.mxu0 %v4102_v44  ;;  %2186 = vmatprep.mubr.f32.mxu1 %v933_v13 }
 0x143   : > { %v1430_v31 = vpop.f32.mrf.mxu0  ;;  %v1655_v14 = vpop.f32.mrf.mxu1 }
 0x145   : > { %v1433_v63 = vpop.f32.mrf.mxu0  ;;  %v1658_v24 = vpop.f32.mrf.mxu1  ;;  %1962 = vmatmul.mubr.f32.gmra.mxu0 %v820_v49  ;;  %2187 = vmatmul.mubr.f32.gmra.mxu1 %v4078_v58 }
 0x146   : > { %v4116_v33 = vadd.f32 %v1658_v24, %v1433_v63  ;;  %1966 = vmatprep.mubr.f32.mxu0 %v4112_v45  ;;  %2191 = vmatprep.mubr.f32.mxu1 %v935_v17 }
 0x147   : > { %v1435_v28 = vpop.f32.mrf.mxu0  ;;  %v1660_v10 = vpop.f32.mrf.mxu1 }
 0x149   : > { %v1438_v5 = vpop.f32.mrf.mxu0  ;;  %v1663_v26 = vpop.f32.mrf.mxu1  ;;  %1967 = vmatmul.mubr.f32.gmra.mxu0 %v822_v35  ;;  %2192 = vmatmul.mubr.f32.gmra.mxu1 %v4081_v59 }
 0x14a   : > { %v4120_v52 = vadd.f32 %v1663_v26, %v1438_v5  ;;  %2758 = vmatprep.mubr.f32.mxu0 %v3250_v47  ;;  %2782 = vmatprep.mubr.f32.mxu1 %v4595_v21 }
 0x14b   : > { %v1440_v49 = vpop.f32.mrf.mxu0  ;;  %v1665_v2 = vpop.f32.mrf.mxu1 }
 0x14d   : > { %v1443_v13 = vpop.f32.mrf.mxu0  ;;  %v1668_v41 = vpop.f32.mrf.mxu1  ;;  %2759 = vmatmul.mubr.f32.vlgmr.msra.gmra.mxu0 %v3271_v55  ;;  %2783 = vmatmul.mubr.f32.vlgmr.msra.gmra.mxu1 %v4598_v51 }
 0x14e   : > { %v4126_v37 = vadd.f32 %v1668_v41, %v1443_v13  ;;  %2761 = vmatprep.mubr.f32.mxu0 %v3297_v0  ;;  %2785 = vmatprep.mubr.f32.mxu1 %v4601_v38 }
 0x14f   : > { %v1445_v35 = vpop.f32.mrf.mxu0  ;;  %v1670_v46 = vpop.f32.mrf.mxu1 }
 0x151   : > { %v1448_v31 = vpop.f32.mrf.mxu0  ;;  %v1673_v47 = vpop.f32.mrf.mxu1  ;;  %2762 = vmatmul.mubr.f32.gmra.mxu0 %v3318_v9  ;;  %2786 = vmatmul.mubr.f32.gmra.mxu1 %v4604_v3 }
 0x152   : > { %v4132_v21 = vadd.f32 %v1673_v47, %v1448_v31  ;;  %2764 = vmatprep.mubr.f32.mxu0 %v3344_v18  ;;  %2788 = vmatprep.mubr.f32.mxu1 %v4607_v8 }
 0x153   : > { %v1450_v55 = vpop.f32.mrf.mxu0  ;;  %v1675_v51 = vpop.f32.mrf.mxu1 }
 0x155   : > { %v1453_v14 = vpop.f32.mrf.mxu0  ;;  %v1678_v0 = vpop.f32.mrf.mxu1  ;;  %2765 = vmatmul.mubr.f32.gmra.mxu0 %v3365_v29  ;;  %2789 = vmatmul.mubr.f32.gmra.mxu1 %v4610_v40 }
 0x156   : > { %v4138_v38 = vadd.f32 %v1678_v0, %v1453_v14  ;;  %2767 = vmatprep.mubr.f32.mxu0 %v3391_v43  ;;  %2791 = vmatprep.mubr.f32.mxu1 %v4613_v30 }
 0x157   : > { %v1455_v9 = vpop.f32.mrf.mxu0  ;;  %v1680_v3 = vpop.f32.mrf.mxu1 }
 0x159   : > { %v1458_v17 = vpop.f32.mrf.mxu0  ;;  %v1683_v18 = vpop.f32.mrf.mxu1  ;;  %2768 = vmatmul.mubr.f32.gmra.mxu0 %v3412_v54  ;;  %2792 = vmatmul.mubr.f32.gmra.mxu1 %v4616_v34 }
 0x15a   : > { %v4144_v8 = vadd.f32 %v1683_v18, %v1458_v17  ;;  %2770 = vmatprep.mubr.f32.mxu0 %v3438_v6  ;;  %2794 = vmatprep.mubr.f32.mxu1 %v4617_v23  ;;  %v970_v6 = vrot.slane %v4078_v58, 2  ;;  %v971_v23 = vrot.slane %v4081_v59, 2 }
 0x15b   : > { %v1460_v29 = vpop.f32.mrf.mxu0  ;;  %v1685_v40 = vpop.f32.mrf.mxu1 }
 0x15c   : > { %v972_v58 = vsel %vm638_vm1, %v970_v6, %v971_v23 }
 0x15d   : > { %v1463_v63 = vpop.f32.mrf.mxu0  ;;  %v1688_v43 = vpop.f32.mrf.mxu1  ;;  %2771 = vmatmul.mubr.f32.gmra.mxu0 %v3459_v19  ;;  %2795 = vmatmul.mubr.f32.gmra.mxu1 %v4619_v48 }
 0x15e   : > { %v4150_v30 = vadd.f32 %v1688_v43, %v1463_v63  ;;  %2773 = vmatprep.mubr.f32.mxu0 %v3485_v39  ;;  %2797 = vmatprep.mubr.f32.mxu1 %v3858_v50  ;;  %v973_v39 = vrot.slane %v4094_v36, 2 }
 0x15f   : > { %v1465_v54 = vpop.f32.mrf.mxu0  ;;  %v1690_v34 = vpop.f32.mrf.mxu1 }
 0x161   : > { %v1468_v24 = vpop.f32.mrf.mxu0  ;;  %v1693_v28 = vpop.f32.mrf.mxu1  ;;  %2774 = vmatmul.mubr.f32.gmra.mxu0 %v3506_v56  ;;  %2798 = vmatmul.mubr.f32.gmra.mxu1 %v3876_v11 }
 0x162   : > { %v4158_v19 = vadd.f32 %v1693_v28, %v1468_v24  ;;  %2776 = vmatprep.mubr.f32.mxu0 %v3532_v16  ;;  %2800 = vmatprep.mubr.f32.mxu1 %v4102_v44  ;;  %v974_v16 = vsel %vm638_vm1, %v971_v23, %v973_v39 }
 0x163   : > { %v1470_v50 = vpop.f32.mrf.mxu0  ;;  %v1695_v48 = vpop.f32.mrf.mxu1 }
 0x165   : > { %v1473_v10 = vpop.f32.mrf.mxu0  ;;  %v1698_v59 = vpop.f32.mrf.mxu1  ;;  %2777 = vmatmul.mubr.f32.gmra.mxu0 %v4586_v12  ;;  %2801 = vmatmul.mubr.f32.gmra.mxu1 %v4112_v45 }
 0x166   : > { %v4166_v56 = vadd.f32 %v1698_v59, %v1473_v10  ;;  %2779 = vmatprep.mubr.f32.mxu0 %v4589_v20  ;;  %2803 = vmatprep.mubr.f32.mxu1 %v972_v58 }
 0x167   : > { %v1475_v11 = vpop.f32.mrf.mxu0  ;;  %v1700_v44 = vpop.f32.mrf.mxu1 }
 0x169   : > { %v1478_v36 = vpop.f32.mrf.mxu0  ;;  %v1703_v5 = vpop.f32.mrf.mxu1  ;;  %2780 = vmatmul.mubr.f32.gmra.mxu0 %v4592_v62  ;;  %2804 = vmatmul.mubr.f32.gmra.mxu1 %v974_v16 }
 0x16a   : > { %v4171_v26 = vadd.f32 %v1703_v5, %v1478_v36 }
 0x16b   : > { %v1480_v49 = vpop.f32.mrf.mxu0  ;;  %v1705_v12 = vpop.f32.mrf.mxu1 }
 0x16d   : > { %v1483_v2 = vpop.f32.mrf.mxu0  ;;  %v1708_v45 = vpop.f32.mrf.mxu1 }
 0x16e   : > { %v4173_v13 = vadd.f32 %v1708_v45, %v1483_v2 }
 0x16f   : > { %v1485_v41 = vpop.f32.mrf.mxu0  ;;  %v1710_v20 = vpop.f32.mrf.mxu1 }
 0x171   : > { %v1488_v35 = vpop.f32.mrf.mxu0  ;;  %v1713_v46 = vpop.f32.mrf.mxu1 }
 0x172   : > { %v4175_v31 = vadd.f32 %v1713_v46, %v1488_v35 }
 0x173   : > { %v1490_v47 = vpop.f32.mrf.mxu0  ;;  %v1715_v55 = vpop.f32.mrf.mxu1 }
 0x175   : > { %v1493_v51 = vpop.f32.mrf.mxu0  ;;  %v1718_v14 = vpop.f32.mrf.mxu1 }
 0x176   : > { %v4177_v62 = vadd.f32 %v1718_v14, %v1493_v51 }
 0x177   : > { %v1495_v0 = vpop.f32.mrf.mxu0  ;;  %v1720_v9 = vpop.f32.mrf.mxu1 }
 0x179   : > { %v1498_v3 = vpop.f32.mrf.mxu0  ;;  %v1723_v17 = vpop.f32.mrf.mxu1 }
 0x17a   : > { %v4179_v18 = vadd.f32 %v1723_v17, %v1498_v3 }
 0x17b   : > { %v1500_v29 = vpop.f32.mrf.mxu0  ;;  %v1725_v40 = vpop.f32.mrf.mxu1 }
 0x17d   : > { %v1503_v63 = vpop.f32.mrf.mxu0  ;;  %v1728_v43 = vpop.f32.mrf.mxu1 }
 0x17e   : > { %v4181_v54 = vadd.f32 %v1728_v43, %v1503_v63 }
 0x17f   : > { %v1505_v34 = vpop.f32.mrf.mxu0  ;;  %v1730_v6 = vpop.f32.mrf.mxu1 }
 0x181   : > { %v1508_v23 = vpop.f32.mrf.mxu0  ;;  %v1733_v24 = vpop.f32.mrf.mxu1 }
 0x182   : > { %v4183_v28 = vadd.f32 %v1733_v24, %v1508_v23 }
 0x183   : > { %v1510_v39 = vpop.f32.mrf.mxu0  ;;  %v1735_v50 = vpop.f32.mrf.mxu1 }
 0x185   : > { %v1513_v48 = vpop.f32.mrf.mxu0  ;;  %v1738_v58 = vpop.f32.mrf.mxu1 }
 0x186   : > { %v4185_v10 = vadd.f32 %v1738_v58, %v1513_v48 }
 0x187   : > { %v1515_v59 = vpop.f32.mrf.mxu0  ;;  %v1740_v16 = vpop.f32.mrf.mxu1 }
 0x188   : > { %4621 = vst [vmem:[#allocation5_spill] sm:$0xff] %v4185_v10 }
 0x189   : > { %v1518_v11 = vpop.f32.mrf.mxu0  ;;  %v1743_v44 = vpop.f32.mrf.mxu1 }
 0x18a   : > { %v4187_v36 = vadd.f32 %v1743_v44, %v1518_v11 }
 0x18b   : > { %v1520_v5 = vpop.f32.mrf.mxu0  ;;  %v1745_v49 = vpop.f32.mrf.mxu1 }
 0x18c   : > { %4622 = vst [vmem:[#allocation9_spill] sm:$0xff] %v4187_v36 }
 0x18d   : > { %v1813_v12 = vpop.f32.mrf.mxu0  ;;  %v2038_v2 = vpop.f32.mrf.mxu1 }
 0x18e   : > { %v1814_v45 = vadd.f32 %v1813_v12, %v4009_v60 }
 0x18f   : > { %v1815_v41 = vpop.f32.mrf.mxu0  ;;  %v2040_v20 = vpop.f32.mrf.mxu1 }
 0x190   : > { %v4190_v35 = vadd.f32 %v2038_v2, %v1814_v45 }
 0x191   : > { %v1818_v46 = vpop.f32.mrf.mxu0  ;;  %v2043_v47 = vpop.f32.mrf.mxu1 }
 0x192   : > { %v1819_v55 = vadd.f32 %v1818_v46, %v4015_v4 }
 0x193   : > { %v1820_v51 = vpop.f32.mrf.mxu0  ;;  %v2045_v14 = vpop.f32.mrf.mxu1 }
 0x194   : > { %v4193_v0 = vadd.f32 %v2043_v47, %v1819_v55 }
 0x195   : > { %v1823_v9 = vpop.f32.mrf.mxu0  ;;  %v2048_v3 = vpop.f32.mrf.mxu1 }
 0x196   : > { %v1824_v17 = vadd.f32 %v1823_v9, %v4021_v57 }
 0x197   : > { %v1825_v29 = vpop.f32.mrf.mxu0  ;;  %v2050_v40 = vpop.f32.mrf.mxu1 }
 0x198   : > { %v4196_v63 = vadd.f32 %v2048_v3, %v1824_v17 }
 0x199   : > { %v1828_v60 = vpop.f32.mrf.mxu0  ;;  %v2053_v43 = vpop.f32.mrf.mxu1 }
 0x19a   : > { %v1829_v34 = vadd.f32 %v1828_v60, %v4027_v32 }
 0x19b   : > { %v1830_v6 = vpop.f32.mrf.mxu0  ;;  %v2055_v23 = vpop.f32.mrf.mxu1 }
 0x19c   : > { %v4199_v24 = vadd.f32 %v2053_v43, %v1829_v34 }
 0x19d   : > { %v1833_v4 = vpop.f32.mrf.mxu0  ;;  %v2058_v39 = vpop.f32.mrf.mxu1 }
 0x19e   : > { %v1834_v50 = vadd.f32 %v1833_v4, %v4033_v61 }
 0x19f   : > { %v1835_v48 = vpop.f32.mrf.mxu0  ;;  %v2060_v58 = vpop.f32.mrf.mxu1 }
 0x1a0   : > { %v4202_v59 = vadd.f32 %v2058_v39, %v1834_v50 }
 0x1a1   : > { %v1838_v57 = vpop.f32.mrf.mxu0  ;;  %v2063_v16 = vpop.f32.mrf.mxu1 }
 0x1a2   : > { %v1839_v11 = vadd.f32 %v1838_v57, %v4039_v1 }
 0x1a3   : > { %v1840_v44 = vpop.f32.mrf.mxu0  ;;  %v2065_v5 = vpop.f32.mrf.mxu1 }
 0x1a4   : > { %v4205_v49 = vadd.f32 %v2063_v16, %v1839_v11  ;;  %v4623_v16 = vld [vmem:[#allocation3_spill] sm:$0xff] }
 0x1a5   : > { %v1843_v32 = vpop.f32.mrf.mxu0  ;;  %v2068_v12 = vpop.f32.mrf.mxu1 }
 0x1a6   : > { %v1844_v2 = vadd.f32 %v1843_v32, %v4045_v22 }
 0x1a7   : > { %v1845_v45 = vpop.f32.mrf.mxu0  ;;  %v2070_v41 = vpop.f32.mrf.mxu1 }
 0x1a8   : > { %v4208_v20 = vadd.f32 %v2068_v12, %v1844_v2 }
 0x1a9   : > { %v1848_v61 = vpop.f32.mrf.mxu0  ;;  %v2073_v46 = vpop.f32.mrf.mxu1 }
 0x1aa   : > { %v1849_v47 = vadd.f32 %v1848_v61, %v4051_v27 }
 0x1ab   : > { %v1850_v55 = vpop.f32.mrf.mxu0  ;;  %v2075_v51 = vpop.f32.mrf.mxu1 }
 0x1ac   : > { %v4211_v14 = vadd.f32 %v2073_v46, %v1849_v47 }
 0x1ad   : > { %v1853_v1 = vpop.f32.mrf.mxu0  ;;  %v2078_v9 = vpop.f32.mrf.mxu1 }
 0x1ae   : > { %v1854_v3 = vadd.f32 %v1853_v1, %v4057_v15 }
 0x1af   : > { %v1855_v17 = vpop.f32.mrf.mxu0  ;;  %v2080_v29 = vpop.f32.mrf.mxu1 }
 0x1b0   : > { %v4214_v40 = vadd.f32 %v2078_v9, %v1854_v3 }
 0x1b1   : > { %v1858_v22 = vpop.f32.mrf.mxu0  ;;  %v2083_v60 = vpop.f32.mrf.mxu1 }
 0x1b2   : > { %v1859_v43 = vadd.f32 %v1858_v22, %v4063_v25 }
 0x1b3   : > { %v1860_v34 = vpop.f32.mrf.mxu0  ;;  %v2085_v6 = vpop.f32.mrf.mxu1 }
 0x1b4   : > { %v4217_v23 = vadd.f32 %v2083_v60, %v1859_v43 }
 0x1b5   : > { %v1863_v27 = vpop.f32.mrf.mxu0  ;;  %v2088_v4 = vpop.f32.mrf.mxu1 }
 0x1b6   : > { %v1864_v39 = vadd.f32 %v1863_v27, %v4072_v53 }
 0x1b7   : > { %v1865_v50 = vpop.f32.mrf.mxu0  ;;  %v2090_v48 = vpop.f32.mrf.mxu1 }
 0x1b8   : > { %v4220_v58 = vadd.f32 %v2088_v4, %v1864_v39 }
 0x1b9   : > { %v1868_v15 = vpop.f32.mrf.mxu0  ;;  %v2093_v57 = vpop.f32.mrf.mxu1 }
 0x1ba   : > { %v1869_v11 = vadd.f32 %v1868_v15, %v4623_v16 }
 0x1bb   : > { %v1870_v44 = vpop.f32.mrf.mxu0  ;;  %v2095_v5 = vpop.f32.mrf.mxu1 }
 0x1bc   : > { %v4223_v32 = vadd.f32 %v2093_v57, %v1869_v11 }
 0x1bd   : > { %v1873_v25 = vpop.f32.mrf.mxu0  ;;  %v2098_v12 = vpop.f32.mrf.mxu1 }
 0x1be   : > { %v1874_v2 = vadd.f32 %v1873_v25, %v4098_v42 }
 0x1bf   : > { %v1875_v45 = vpop.f32.mrf.mxu0  ;;  %v2100_v41 = vpop.f32.mrf.mxu1 }
 0x1c0   : > { %v4226_v61 = vadd.f32 %v2098_v12, %v1874_v2 }
 0x1c1   : > { %v1878_v53 = vpop.f32.mrf.mxu0  ;;  %v2103_v46 = vpop.f32.mrf.mxu1 }
 0x1c2   : > { %4624 = vst [vmem:[#allocation4_spill] sm:$0xff] %v4226_v61  ;;  %v1879_v47 = vadd.f32 %v1878_v53, %v4108_v7 }
 0x1c3   : > { %v1880_v55 = vpop.f32.mrf.mxu0  ;;  %v2105_v51 = vpop.f32.mrf.mxu1 }
 0x1c4   : > { %v4229_v1 = vadd.f32 %v2103_v46, %v1879_v47 }
 0x1c5   : > { %v1883_v9 = vpop.f32.mrf.mxu0  ;;  %v2108_v3 = vpop.f32.mrf.mxu1 }
 0x1c6   : > { %4625 = vst [vmem:[#allocation8_spill] sm:$0xff] %v4229_v1  ;;  %v1884_v17 = vadd.f32 %v1883_v9, %v4116_v33 }
 0x1c7   : > { %v1885_v29 = vpop.f32.mrf.mxu0  ;;  %v2110_v22 = vpop.f32.mrf.mxu1 }
 0x1c8   : > { %v4232_v60 = vadd.f32 %v2108_v3, %v1884_v17 }
 0x1c9   : > { %v1888_v42 = vpop.f32.mrf.mxu0  ;;  %v2113_v43 = vpop.f32.mrf.mxu1 }
 0x1ca   : > { %4626 = vst [vmem:[#allocation11_spill] sm:$0xff] %v4232_v60  ;;  %v1889_v34 = vadd.f32 %v1888_v42, %v4120_v52 }
 0x1cb   : > { %v1890_v6 = vpop.f32.mrf.mxu0  ;;  %v2115_v27 = vpop.f32.mrf.mxu1 }
 0x1cc   : > { %v4235_v4 = vadd.f32 %v2113_v43, %v1889_v34 }
 0x1cd   : > { %v1893_v7 = vpop.f32.mrf.mxu0  ;;  %v2118_v39 = vpop.f32.mrf.mxu1 }
 0x1ce   : > { %4627 = vst [vmem:[#allocation6_spill] sm:$0xff] %v4235_v4  ;;  %v1894_v50 = vadd.f32 %v1893_v7, %v4126_v37 }
 0x1cf   : > { %v1895_v48 = vpop.f32.mrf.mxu0  ;;  %v2120_v15 = vpop.f32.mrf.mxu1 }
 0x1d0   : > { %v4238_v57 = vadd.f32 %v2118_v39, %v1894_v50 }
 0x1d1   : > { %v1898_v33 = vpop.f32.mrf.mxu0  ;;  %v2123_v16 = vpop.f32.mrf.mxu1 }
 0x1d3   : > { %v1900_v11 = vpop.f32.mrf.mxu0  ;;  %v2125_v44 = vpop.f32.mrf.mxu1 }
 0x1d5   : > { %v1903_v5 = vpop.f32.mrf.mxu0  ;;  %v4240_v25 = vpop.f32.mrf.mxu1 }
 0x1d6   : > { %v1904_v36 = vadd.f32 %v1903_v5, %v4138_v38 }
 0x1d7   : > { %v1905_v52 = vpop.f32.mrf.mxu0  ;;  %v2130_v12 = vpop.f32.mrf.mxu1 }
 0x1d8   : > { %v2129_v5 = vadd.f32 %v4240_v25, %v1904_v36 }
 0x1d9   : > { %v1908_v2 = vpop.f32.mrf.mxu0  ;;  %v4242_v45 = vpop.f32.mrf.mxu1 }
 0x1db   : > { %v1910_v41 = vpop.f32.mrf.mxu0  ;;  %v2135_v53 = vpop.f32.mrf.mxu1 }
 0x1dd   : > { %v4244_v46 = vpop.f32.mrf.mxu0  ;;  %v4246_v37 = vpop.f32.mrf.mxu1 }
 0x1de   : > { %v1914_v36 = vadd.f32 %v4244_v46, %v4150_v30 }
 0x1df   : > { %v1915_v47 = vpop.f32.mrf.mxu0  ;;  %v2140_v55 = vpop.f32.mrf.mxu1 }
 0x1e1   : > { %v1918_v51 = vpop.f32.mrf.mxu0  ;;  %v4248_v9 = vpop.f32.mrf.mxu1 }
 0x1e3   : > { %v1920_v3 = vpop.f32.mrf.mxu0  ;;  %v2145_v17 = vpop.f32.mrf.mxu1 }
 0x1e5   : > { %v4250_v29 = vpop.f32.mrf.mxu0  ;;  %v4252_v22 = vpop.f32.mrf.mxu1 }
 0x1e7   : > { %v1925_v42 = vpop.f32.mrf.mxu0  ;;  %v2150_v43 = vpop.f32.mrf.mxu1 }
 0x1e9   : > { %v4254_v34 = vpop.f32.mrf.mxu0  ;;  %v4256_v6 = vpop.f32.mrf.mxu1 }
 0x1eb   : > { %v1930_v27 = vpop.f32.mrf.mxu0  ;;  %v2155_v7 = vpop.f32.mrf.mxu1 }
 0x1ed   : > { %v4258_v39 = vpop.f32.mrf.mxu0  ;;  %v4260_v50 = vpop.f32.mrf.mxu1 }
 0x1ef   : > { %v1935_v48 = vpop.f32.mrf.mxu0  ;;  %v2160_v15 = vpop.f32.mrf.mxu1 }
 0x1f1   : > { %v4262_v11 = vpop.f32.mrf.mxu0  ;;  %v4264_v44 = vpop.f32.mrf.mxu1 }
 0x1f3   : > { %v1940_v52 = vpop.f32.mrf.mxu0  ;;  %v2165_v12 = vpop.f32.mrf.mxu1 }
 0x1f5   : > { %v4266_v41 = vpop.f32.mrf.mxu0  ;;  %v4268_v53 = vpop.f32.mrf.mxu1 }
 0x1f7   : > { %v1945_v47 = vpop.f32.mrf.mxu0  ;;  %v2170_v55 = vpop.f32.mrf.mxu1 }
 0x1f9   : > { %v4270_v3 = vpop.f32.mrf.mxu0  ;;  %v4272_v17 = vpop.f32.mrf.mxu1 }
 0x1fb   : > { %v1950_v42 = vpop.f32.mrf.mxu0  ;;  %v2175_v43 = vpop.f32.mrf.mxu1 }
 0x1fc   : > { %v1899_v43 = vadd.f32 %v1898_v33, %v4132_v21 }
 0x1fd   : > { %v4274_v27 = vpop.f32.mrf.mxu0  ;;  %v4276_v7 = vpop.f32.mrf.mxu1 }
 0x1fe   : > { %4628 = vst [vmem:[#allocation10_spill] sm:$0xff] %v4276_v7  ;;  %v2124_v7 = vadd.f32 %v2123_v16, %v1899_v43 }
 0x1ff   : > { %v1955_v48 = vpop.f32.mrf.mxu0  ;;  %v2180_v15 = vpop.f32.mrf.mxu1 }
 0x201   : > { %v4278_v52 = vpop.f32.mrf.mxu0  ;;  %v4280_v12 = vpop.f32.mrf.mxu1 }
 0x203   : > { %v1960_v60 = vpop.f32.mrf.mxu0  ;;  %v2185_v47 = vpop.f32.mrf.mxu1 }
 0x204   : > { %v1909_v60 = vadd.f32 %v1908_v2, %v4144_v8 }
 0x205   : > { %v4282_v55 = vpop.f32.mrf.mxu0  ;;  %v4284_v4 = vpop.f32.mrf.mxu1 }
 0x206   : > { %v2134_v2 = vadd.f32 %v4242_v45, %v1909_v60 }
 0x207   : > { %v1965_v61 = vpop.f32.mrf.mxu0  ;;  %v2190_v42 = vpop.f32.mrf.mxu1 }
 0x209   : > { %v4287_v10 = vpop.f32.mrf.mxu0  ;;  %v4289_v1 = vpop.f32.mrf.mxu1 }
 0x20b   : > { %v1970_v48 = vpop.f32.mrf.mxu0  ;;  %v2195_v15 = vpop.f32.mrf.mxu1 }
 0x20d   : > { %v2760_v21 = vpop.f32.mrf.mxu0  ;;  %v2784_v61 = vpop.f32.mrf.mxu1 }
 0x20e   : > { %v2269_v33 = vadd.f32 %v2760_v21, %v4193_v0  ;;  %v4300_v47 = vadd.f32 %v2784_v61, %v2124_v7  ;;  %v1919_v0 = vadd.f32 %v1918_v51, %v4158_v19 }
 0x20f   : > { %v2263_v16 = vpop.f32.mrf.mxu0  ;;  %v2343_v42 = vpop.f32.mrf.mxu1 }
 0x210   : > { %2423 = vst [vmem:[%s4297_s30 + $0x8] sm:$0xff] %v2269_v33  ;;  %2439 = vst [vmem:[%s4297_s30 + $0x88] sm:$0xff] %v4300_v47  ;;  %v2264_v38 = vadd.f32 %v2263_v16, %v4190_v35  ;;  %v4307_v8 = vadd.f32 %v2343_v42, %v4238_v57  ;;  %v2492_v48 = vmul.f32 %v2269_v33, %v2269_v33 }
 0x211   : > { %v2763_v7 = vpop.f32.mrf.mxu0  ;;  %v2787_v43 = vpop.f32.mrf.mxu1  ;;  %v2144_v61 = vadd.f32 %v4248_v9, %v1919_v0  ;;  %v2139_v42 = vadd.f32 %v4246_v37, %v1914_v36  ;;  %v1924_v9 = vadd.f32 %v4250_v29, %v4166_v56 }
 0x212   : > { %2422 = vst [vmem:[%s4297_s30] sm:$0xff] %v2264_v38  ;;  %v2454_v15 = vadd.f32 %v2269_v33, %v2264_v38  ;;  %v2491_v21 = vmul.f32 %v2264_v38, %v2264_v38  ;;  %2438 = vst [vmem:[%s4297_s30 + $0x80] sm:$0xff] %v4307_v8  ;;  %v2279_v35 = vadd.f32 %v2763_v7, %v4199_v24 }
 0x213   : > { %v4318_v57 = vadd.f32 %v2787_v43, %v2134_v2  ;;  %v2273_v25 = vpop.f32.mrf.mxu0  ;;  %v2353_v19 = vpop.f32.mrf.mxu1  ;;  %v1929_v33 = vadd.f32 %v4254_v34, %v4171_v26 }
 0x214   : > { %v2523_v45 = vadd.f32 %v2492_v48, %v2491_v21  ;;  %2425 = vst [vmem:[%s4297_s30 + $0x18] sm:$0xff] %v2279_v35  ;;  %v2274_v51 = vadd.f32 %v2273_v25, %v4196_v63  ;;  %v4322_v60 = vadd.f32 %v2353_v19, %v2129_v5  ;;  %v2494_v5 = vmul.f32 %v2279_v35, %v2279_v35 }
 0x215   : > { %2441 = vst [vmem:[%s4297_s30 + $0x98] sm:$0xff] %v4318_v57  ;;  %v2766_v30 = vpop.f32.mrf.mxu0  ;;  %v2790_v24 = vpop.f32.mrf.mxu1  ;;  %v2154_v43 = vadd.f32 %v4256_v6, %v1929_v33  ;;  %v1934_v6 = vadd.f32 %v4258_v39, %v4173_v13 }
 0x216   : > { %2424 = vst [vmem:[%s4297_s30 + $0x10] sm:$0xff] %v2274_v51  ;;  %v2455_v46 = vadd.f32 %v2454_v15, %v2274_v51  ;;  %v2493_v16 = vmul.f32 %v2274_v51, %v2274_v51  ;;  %2440 = vst [vmem:[%s4297_s30 + $0x90] sm:$0xff] %v4322_v60  ;;  %v2289_v63 = vadd.f32 %v2766_v30, %v4205_v49 }
 0x217   : > { %v4336_v26 = vadd.f32 %v2790_v24, %v2144_v61  ;;  %v2283_v34 = vpop.f32.mrf.mxu0  ;;  %v2363_v38 = vpop.f32.mrf.mxu1  ;;  %v1939_v49 = vadd.f32 %v4262_v11, %v4175_v31 }
 0x218   : > { %v2524_v2 = vadd.f32 %v2523_v45, %v2493_v16  ;;  %2427 = vst [vmem:[%s4297_s30 + $0x28] sm:$0xff] %v2289_v63  ;;  %v2284_v0 = vadd.f32 %v2283_v34, %v4202_v59  ;;  %v2456_v7 = vadd.f32 %v2455_v46, %v2279_v35  ;;  %v4345_v37 = vadd.f32 %v2363_v38, %v2139_v42 }
 0x219   : > { %2443 = vst [vmem:[%s4297_s30 + $0xa8] sm:$0xff] %v4336_v26  ;;  %v2769_v56 = vpop.f32.mrf.mxu0  ;;  %v2793_v29 = vpop.f32.mrf.mxu1  ;;  %v2149_v35 = vadd.f32 %v4252_v22, %v1924_v9  ;;  %v2496_v25 = vmul.f32 %v2289_v63, %v2289_v63  ;;  %v1949_v22 = vadd.f32 %v4270_v3, %v4179_v18  ;;  %v2159_v46 = vadd.f32 %v4260_v50, %v1934_v6 }
 0x21a   : > { %2426 = vst [vmem:[%s4297_s30 + $0x20] sm:$0xff] %v2284_v0  ;;  %v2457_v48 = vadd.f32 %v2456_v7, %v2284_v0  ;;  %v2495_v15 = vmul.f32 %v2284_v0, %v2284_v0  ;;  %v2525_v21 = vadd.f32 %v2524_v2, %v2494_v5  ;;  %v2299_v59 = vadd.f32 %v2769_v56, %v4211_v14 }
 0x21b   : > { %2442 = vst [vmem:[%s4297_s30 + $0xa0] sm:$0xff] %v4345_v37  ;;  %v4354_v31 = vadd.f32 %v2793_v29, %v2154_v43  ;;  %v2293_v11 = vpop.f32.mrf.mxu0  ;;  %v2373_v36 = vpop.f32.mrf.mxu1  ;;  %v2164_v14 = vadd.f32 %v4264_v44, %v1939_v49  ;;  %v1944_v44 = vadd.f32 %v4266_v41, %v4177_v62  ;;  %v1959_v50 = vadd.f32 %v4278_v52, %v4183_v28 }
 0x21c   : > { %v2526_v19 = vadd.f32 %v2525_v21, %v2495_v15  ;;  %2429 = vst [vmem:[%s4297_s30 + $0x38] sm:$0xff] %v2299_v59  ;;  %v2294_v45 = vadd.f32 %v2293_v11, %v4208_v20  ;;  %v2458_v51 = vadd.f32 %v2457_v48, %v2289_v63  ;;  %v4363_v13 = vadd.f32 %v2373_v36, %v2149_v35  ;;  %v4630_v11 = vld [vmem:[#allocation8_spill] sm:$0xff]  ;;  %v4631_v36 = vld [vmem:[#allocation10_spill] sm:$0xff] }
 0x21d   : > { %2445 = vst [vmem:[%s4297_s30 + $0xb8] sm:$0xff] %v4354_v31  ;;  %v2772_v39 = vpop.f32.mrf.mxu0  ;;  %v2796_v61 = vpop.f32.mrf.mxu1  ;;  %v2498_v63 = vmul.f32 %v2299_v59, %v2299_v59  ;;  %v2169_v7 = vadd.f32 %v4268_v53, %v1944_v44  ;;  %v4629_v53 = vld [vmem:[#allocation9_spill] sm:$0xff] }
 0x21e   : > { %2428 = vst [vmem:[%s4297_s30 + $0x30] sm:$0xff] %v2294_v45  ;;  %v2459_v33 = vadd.f32 %v2458_v51, %v2294_v45  ;;  %v2497_v30 = vmul.f32 %v2294_v45, %v2294_v45  ;;  %v2527_v24 = vadd.f32 %v2526_v19, %v2496_v25  ;;  %v2309_v20 = vadd.f32 %v2772_v39, %v4217_v23  ;;  %v4633_v39 = vld [vmem:[#allocation4_spill] sm:$0xff] }
 0x21f   : > { %2444 = vst [vmem:[%s4297_s30 + $0xb0] sm:$0xff] %v4363_v13  ;;  %v4372_v18 = vadd.f32 %v2796_v61, %v2164_v14  ;;  %v2303_v3 = vpop.f32.mrf.mxu0  ;;  %v2383_v16 = vpop.f32.mrf.mxu1  ;;  %v2174_v23 = vadd.f32 %v4272_v17, %v1949_v22  ;;  %v1954_v17 = vadd.f32 %v4274_v27, %v4181_v54  ;;  %v1969_v15 = vadd.f32 %v4287_v10, %v4629_v53 }
 0x220   : > { %v2528_v42 = vadd.f32 %v2527_v24, %v2497_v30  ;;  %2431 = vst [vmem:[%s4297_s30 + $0x48] sm:$0xff] %v2309_v20  ;;  %v2304_v9 = vadd.f32 %v2303_v3, %v4214_v40  ;;  %v2460_v34 = vadd.f32 %v2459_v33, %v2299_v59  ;;  %v4381_v62 = vadd.f32 %v2383_v16, %v2159_v46  ;;  %v4634_v16 = vld [vmem:[#allocation6_spill] sm:$0xff] }
 0x221   : > { %2447 = vst [vmem:[%s4297_s30 + $0xc8] sm:$0xff] %v4372_v18  ;;  %v2775_v41 = vpop.f32.mrf.mxu0  ;;  %v2799_v38 = vpop.f32.mrf.mxu1  ;;  %v2500_v49 = vmul.f32 %v2309_v20, %v2309_v20  ;;  %v2179_v25 = vadd.f32 %v4631_v36, %v1954_v17  ;;  %v2194_v30 = vadd.f32 %v4289_v1, %v1969_v15  ;;  %v2509_v53 = vmul.f32 %v4322_v60, %v4322_v60 }
 0x222   : > { %2430 = vst [vmem:[%s4297_s30 + $0x40] sm:$0xff] %v2304_v9  ;;  %v2461_v5 = vadd.f32 %v2460_v34, %v2304_v9  ;;  %v2499_v2 = vmul.f32 %v2304_v9, %v2304_v9  ;;  %v2529_v0 = vadd.f32 %v2528_v42, %v2498_v63  ;;  %v2319_v40 = vadd.f32 %v2775_v41, %v4223_v32  ;;  %v4635_v41 = vld [vmem:[#allocation11_spill] sm:$0xff] }
 0x223   : > { %2446 = vst [vmem:[%s4297_s30 + $0xc0] sm:$0xff] %v4381_v62  ;;  %v4390_v28 = vadd.f32 %v2799_v38, %v2174_v23  ;;  %v2313_v52 = vpop.f32.mrf.mxu0  ;;  %v2393_v43 = vpop.f32.mrf.mxu1  ;;  %v2184_v32 = vadd.f32 %v4280_v12, %v1959_v50  ;;  %v4632_v12 = vld [vmem:[#allocation5_spill] sm:$0xff] }
 0x224   : > { %v2530_v56 = vadd.f32 %v2529_v0, %v2499_v2  ;;  %2433 = vst [vmem:[%s4297_s30 + $0x58] sm:$0xff] %v2319_v40  ;;  %v2314_v29 = vadd.f32 %v2313_v52, %v4220_v58  ;;  %v2462_v48 = vadd.f32 %v2461_v5, %v2309_v20  ;;  %v4399_v54 = vadd.f32 %v2393_v43, %v2169_v7 }
 0x225   : > { %2449 = vst [vmem:[%s4297_s30 + $0xd8] sm:$0xff] %v4390_v28  ;;  %v2778_v27 = vpop.f32.mrf.mxu0  ;;  %v2802_v21 = vpop.f32.mrf.mxu1  ;;  %v1964_v10 = vadd.f32 %v4282_v55, %v4632_v12  ;;  %v2502_v14 = vmul.f32 %v2319_v40, %v2319_v40  ;;  %v2507_v43 = vmul.f32 %v4307_v8, %v4307_v8 }
 0x226   : > { %2432 = vst [vmem:[%s4297_s30 + $0x50] sm:$0xff] %v2314_v29  ;;  %v2463_v59 = vadd.f32 %v2462_v48, %v2314_v29  ;;  %v2501_v35 = vmul.f32 %v2314_v29, %v2314_v29  ;;  %v2531_v6 = vadd.f32 %v2530_v56, %v2500_v49  ;;  %v2329_v58 = vadd.f32 %v2778_v27, %v4630_v11 }
 0x227   : > { %2448 = vst [vmem:[%s4297_s30 + $0xd0] sm:$0xff] %v4399_v54  ;;  %v4408_v19 = vadd.f32 %v2802_v21, %v2184_v32  ;;  %v2323_v45 = vpop.f32.mrf.mxu0  ;;  %v2403_v51 = vpop.f32.mrf.mxu1  ;;  %v2189_v42 = vadd.f32 %v4284_v4, %v1964_v10  ;;  %v2508_v29 = vmul.f32 %v4300_v47, %v4300_v47  ;;  %v2510_v21 = vmul.f32 %v4318_v57, %v4318_v57 }
 0x228   : > { %v2532_v22 = vadd.f32 %v2531_v6, %v2501_v35  ;;  %2435 = vst [vmem:[%s4297_s30 + $0x68] sm:$0xff] %v2329_v58  ;;  %v2324_v61 = vadd.f32 %v2323_v45, %v4633_v39  ;;  %v2464_v33 = vadd.f32 %v2463_v59, %v2319_v40  ;;  %v4415_v24 = vadd.f32 %v2403_v51, %v2179_v25 }
 0x229   : > { %2451 = vst [vmem:[%s4297_s30 + $0xe8] sm:$0xff] %v4408_v19  ;;  %v2781_v55 = vpop.f32.mrf.mxu0  ;;  %v2805_v20 = vpop.f32.mrf.mxu1  ;;  %v2504_v23 = vmul.f32 %v2329_v58, %v2329_v58 }
 0x22a   : > { %2434 = vst [vmem:[%s4297_s30 + $0x60] sm:$0xff] %v2324_v61  ;;  %v2465_v46 = vadd.f32 %v2464_v33, %v2324_v61  ;;  %v2503_v44 = vmul.f32 %v2324_v61, %v2324_v61  ;;  %v2533_v3 = vadd.f32 %v2532_v22, %v2502_v14  ;;  %v2339_v63 = vadd.f32 %v2781_v55, %v4634_v16 }
 0x22b   : > { %2450 = vst [vmem:[%s4297_s30 + $0xe0] sm:$0xff] %v4415_v24  ;;  %v4422_v1 = vadd.f32 %v2805_v20, %v2194_v30  ;;  %v2333_v9 = vpop.f32.mrf.mxu0  ;;  %v2413_v34 = vpop.f32.mrf.mxu1 }
 0x22c   : > { %v2534_v50 = vadd.f32 %v2533_v3, %v2503_v44  ;;  %2437 = vst [vmem:[%s4297_s30 + $0x78] sm:$0xff] %v2339_v63  ;;  %v2334_v38 = vadd.f32 %v2333_v9, %v4635_v41  ;;  %v2466_v5 = vadd.f32 %v2465_v46, %v2329_v58  ;;  %v2414_v2 = vadd.f32 %v2413_v34, %v2189_v42 }
 0x22d   : > { %2453 = vst [vmem:[%s4297_s30 + $0xf8] sm:$0xff] %v4422_v1  ;;  %v2506_v7 = vmul.f32 %v2339_v63, %v2339_v63 }
 0x22e   : > { %2436 = vst [vmem:[%s4297_s30 + $0x70] sm:$0xff] %v2334_v38  ;;  %v2467_v0 = vadd.f32 %v2466_v5, %v2334_v38  ;;  %v2505_v40 = vmul.f32 %v2334_v38, %v2334_v38  ;;  %v2535_v4 = vadd.f32 %v2534_v50, %v2504_v23  ;;  %2452 = vst [vmem:[%s4297_s30 + $0xf0] sm:$0xff] %v2414_v2 }
 0x22f   : > { %v2521_v16 = vmul.f32 %v2414_v2, %v2414_v2 }
 0x230   : > { %v2468_v17 = vadd.f32 %v2467_v0, %v2339_v63  ;;  %v2536_v52 = vadd.f32 %v2535_v4, %v2505_v40 }
 0x232   : > { %v2469_v49 = vadd.f32 %v2468_v17, %v4307_v8  ;;  %v2537_v56 = vadd.f32 %v2536_v52, %v2506_v7  ;;  %v2511_v8 = vmul.f32 %v4345_v37, %v4345_v37 }
 0x234   : > { %v2470_v48 = vadd.f32 %v2469_v49, %v4300_v47  ;;  %v2538_v32 = vadd.f32 %v2537_v56, %v2507_v43  ;;  %v2512_v47 = vmul.f32 %v4336_v26, %v4336_v26 }
 0x236   : > { %v2471_v15 = vadd.f32 %v2470_v48, %v4322_v60  ;;  %v2539_v27 = vadd.f32 %v2538_v32, %v2508_v29  ;;  %v2513_v60 = vmul.f32 %v4363_v13, %v4363_v13 }
 0x238   : > { %v2472_v59 = vadd.f32 %v2471_v15, %v4318_v57  ;;  %v2540_v35 = vadd.f32 %v2539_v27, %v2509_v53  ;;  %v2514_v57 = vmul.f32 %v4354_v31, %v4354_v31 }
 0x23a   : > { %v2473_v6 = vadd.f32 %v2472_v59, %v4345_v37  ;;  %v2541_v11 = vadd.f32 %v2540_v35, %v2510_v21  ;;  %v2515_v37 = vmul.f32 %v4381_v62, %v4381_v62 }
 0x23c   : > { %v2474_v58 = vadd.f32 %v2473_v6, %v4336_v26  ;;  %v2542_v36 = vadd.f32 %v2541_v11, %v2511_v8  ;;  %v2516_v26 = vmul.f32 %v4372_v18, %v4372_v18 }
 0x23e   : > { %v2543_v25 = vadd.f32 %v2542_v36, %v2512_v47  ;;  %v2475_v12 = vadd.f32 %v2474_v58, %v4363_v13  ;;  %v2517_v13 = vmul.f32 %v4399_v54, %v4399_v54 }
 0x240   : > { %v2476_v10 = vadd.f32 %v2475_v12, %v4354_v31  ;;  %v2544_v45 = vadd.f32 %v2543_v25, %v2513_v60  ;;  %v2518_v31 = vmul.f32 %v4390_v28, %v4390_v28 }
 0x242   : > { %v2477_v51 = vadd.f32 %v2476_v10, %v4381_v62  ;;  %v2545_v14 = vadd.f32 %v2544_v45, %v2514_v57  ;;  %v2519_v62 = vmul.f32 %v4415_v24, %v4415_v24 }
 0x244   : > { %v2478_v22 = vadd.f32 %v2477_v51, %v4372_v18  ;;  %v2546_v39 = vadd.f32 %v2545_v14, %v2515_v37  ;;  %v2520_v18 = vmul.f32 %v4408_v19, %v4408_v19 }
 0x246   : > { %v2479_v61 = vadd.f32 %v2478_v22, %v4399_v54  ;;  %v2547_v33 = vadd.f32 %v2546_v39, %v2516_v26 }
 0x248   : > { %v2480_v30 = vadd.f32 %v2479_v61, %v4390_v28  ;;  %v2548_v55 = vadd.f32 %v2547_v33, %v2517_v13  ;;  %v2522_v28 = vmul.f32 %v4422_v1, %v4422_v1 }
 0x24a   : > { %v2481_v20 = vadd.f32 %v2480_v30, %v4415_v24  ;;  %v2549_v46 = vadd.f32 %v2548_v55, %v2518_v31 }
 0x24c   : > { %v2482_v44 = vadd.f32 %v2481_v20, %v4408_v19  ;;  %v2550_v3 = vadd.f32 %v2549_v46, %v2519_v62 }
 0x24e   : > { %v2483_v54 = vadd.f32 %v2482_v44, %v2414_v2  ;;  %v2551_v63 = vadd.f32 %v2550_v3, %v2520_v18 }
 0x250   : > { %v2484_v42 = vadd.f32 %v2483_v54, %v4422_v1  ;;  %v2552_v9 = vadd.f32 %v2551_v63, %v2521_v16 }
 0x252   : > { %v2485_v34 = vrot.slane %v2484_v42, 4  ;;  %v2553_v24 = vadd.f32 %v2552_v9, %v2522_v28 }
 0x254   : > { %v2486_v23 = vadd.f32 %v2485_v34, %v2484_v42  ;;  %v2554_v50 = vrot.slane %v2553_v24, 4 }
 0x256   : > { %v2487_v41 = vrot.slane %v2486_v23, 2  ;;  %v2555_v38 = vadd.f32 %v2554_v50, %v2553_v24 }
 0x258   : > { %v2488_v5 = vadd.f32 %v2487_v41, %v2486_v23  ;;  %v2556_v19 = vrot.slane %v2555_v38, 2 }
 0x25a   : > { %v2489_v0 = vrot.slane %v2488_v5, 1  ;;  %v2557_v40 = vadd.f32 %v2556_v19, %v2555_v38 }
 0x25c   : > { %v2490_v2 = vadd.f32 %v2489_v0, %v2488_v5  ;;  %v2558_v4 = vrot.slane %v2557_v40, 1 }
 0x25e   : > { %v2559_v1 = vadd.f32 %v2558_v4, %v2557_v40  ;;  %2560 = vst [vmem:[%s211_s8] sm:$0x1] %v2490_v2 }
 0x260   : > { %2561 = vst [vmem:[%s214_s11] sm:$0x1] %v2559_v1 }
 0x261 PF: > { %s15_s15 = sadd.s32 1, %s2854_s15  }
 0x262   : > { %p12_p4 = scmp.ge.s32.totalorder %s15_s15, 4  }
 0x264   :  { %14 = sbr.rel (!%p12_p4) target bundleno = 1 (0x1), region = 82 }

// kernel: resblock_forward.4
= control target key start
LH: loop header
LB: loop body
LE: loop exit
PB: predicated region body
PF: predicated region fallthrough
CT: control target
= control target key end

     0   :  { %s3269_s21 = smov 0   ;;  %s5103_s0 = inlined_call_operand.vmem [shape: f32[2,16,16,128], index: 0, kind: input, shape index: {}]   ;;  %s5104_s1 = inlined_call_operand.vmem [shape: f32[1,128], index: 1, kind: input, shape index: {}]   ;;  %s5105_s2 = inlined_call_operand.vmem [shape: f32[1,128], index: 2, kind: input, shape index: {}]   ;;  %s5106_s3 = inlined_call_operand.vmem [shape: f32[1152,128], index: 3, kind: input, shape index: {}]   ;;  %s5107_s4 = inlined_call_operand.vmem [shape: f32[2,16,16,128], index: 4, kind: output, shape index: {0}]   ;;  %s5108_s5 = inlined_call_operand.vmem [shape: f32[2,1,128], index: 5, kind: output, shape index: {1}]   ;;  %s5109_s6 = inlined_call_operand.vmem [shape: f32[2,1,128], index: 6, kind: output, shape index: {2}]  }
   0x1 LB: > { %s2943_s22 = sadd.s32 4294967295, %s3231_s21   ;;  %p2947_p0 = scmp.ge.s32.totalorder %s3231_s21, 1  ;;  %s3231_s21 = sphi %s3269_s21, %s17_s21  }
   0x2   : > { %p217_p1 = scmp.lt.s32.totalorder %s3231_s21, 3 }
   0x4   : > { %p218_p2 = pnand %p2947_p0, %p217_p1 }
   0x6   : > { %221 = sbr.rel (%p218_p2) target bundleno = 609 (0x261), region = 36 }
   0xb   : > { %v594_v0 = vld [vmem:[%s5106_s3 + $0x78] sm:$0xff]  ;;  %v5110_v2 = vmov 0.0   ;;  %v593_v3 = vld [vmem:[%s5106_s3 + $0x70] sm:$0xff]  ;;  %v592_v5 = vld [vmem:[%s5106_s3 + $0x68] sm:$0xff]  ;;  %p253_p3 = scmp.lt.s32.totalorder %s2943_s22, 1  ;;  %vm444_vm0 = vcmask 1040384  }
   0xc   : > { %v626_v1 = vld [vmem:[%s5106_s3 + $0x178] sm:$0xff]  ;;  %1573 = vmatprep.subr.mxu0 %v5110_v2  ;;  %1798 = vmatprep.subr.mxu1 %v5110_v2  ;;  %v625_v4 = vld [vmem:[%s5106_s3 + $0x170] sm:$0xff]  ;;  %v624_v6 = vld [vmem:[%s5106_s3 + $0x168] sm:$0xff]  ;;  %v3512_v59 = vrot.slane %v5110_v2, 7  ;;  %vm787_vm1 = vcmask 1046528   ;;  %vm932_vm2 = vcmask 1045504  }
   0xd   : > { %1574 = vmatpush1.msra.mxu0 %v594_v0  ;;  %1799 = vmatpush1.msra.mxu1 %v626_v1  ;;  %v591_v7 = vld [vmem:[%s5106_s3 + $0x60] sm:$0xff]  ;;  %v590_v9 = vld [vmem:[%s5106_s3 + $0x58] sm:$0xff]  ;;  %v589_v11 = vld [vmem:[%s5106_s3 + $0x50] sm:$0xff]  ;;  %s5287_s22 = smov (!%p253_p3, %s2943_s22), 1 }
   0xe   : > { %1575 = vmatprep.subr.mxu0 %v5110_v2  ;;  %1800 = vmatprep.subr.mxu1 %v5110_v2  ;;  %v623_v8 = vld [vmem:[%s5106_s3 + $0x160] sm:$0xff]  ;;  %v622_v10 = vld [vmem:[%s5106_s3 + $0x158] sm:$0xff]  ;;  %v621_v12 = vld [vmem:[%s5106_s3 + $0x150] sm:$0xff]  ;;  %s2956_s13 = sshll.u32 %s5287_s22, 8  ;;  %5183 = vst [vmem:[#allocation3_spill] sm:$0xff] %v3512_v59  ;;  %s265_s12 = scalar_lea.vmem %s5108_s5, %s5287_s22 }
   0xf   : > { %1576 = vmatpush1.msra.mxu0 %v593_v3  ;;  %1801 = vmatpush1.msra.mxu1 %v625_v4  ;;  %v588_v13 = vld [vmem:[%s5106_s3 + $0x48] sm:$0xff]  ;;  %v587_v15 = vld [vmem:[%s5106_s3 + $0x40] sm:$0xff]  ;;  %v586_v17 = vld [vmem:[%s5106_s3 + $0x38] sm:$0xff]  ;;  %s3463_s26 = scalar_lea.vmem %s5103_s0, %s2956_s13  ;;  %s4914_s10 = scalar_lea.vmem %s5107_s4, %s2956_s13 }
  0x10   : > { %1577 = vmatprep.subr.mxu0 %v5110_v2  ;;  %1802 = vmatprep.subr.mxu1 %v5110_v2  ;;  %v620_v14 = vld [vmem:[%s5106_s3 + $0x148] sm:$0xff]  ;;  %v619_v16 = vld [vmem:[%s5106_s3 + $0x140] sm:$0xff]  ;;  %v618_v18 = vld [vmem:[%s5106_s3 + $0x138] sm:$0xff] }
  0x11   : > { %1578 = vmatpush1.msra.mxu0 %v592_v5  ;;  %1803 = vmatpush1.msra.mxu1 %v624_v6  ;;  %v585_v19 = vld [vmem:[%s5106_s3 + $0x30] sm:$0xff]  ;;  %v584_v21 = vld [vmem:[%s5106_s3 + $0x28] sm:$0xff]  ;;  %v583_v23 = vld [vmem:[%s5106_s3 + $0x20] sm:$0xff]  ;;  %v545_v5 = vsel %vm444_vm0, 0.0, %v3512_v59 }
  0x12   : > { %1579 = vmatprep.subr.mxu0 %v5110_v2  ;;  %1804 = vmatprep.subr.mxu1 %v5110_v2  ;;  %v617_v20 = vld [vmem:[%s5106_s3 + $0x130] sm:$0xff]  ;;  %v616_v22 = vld [vmem:[%s5106_s3 + $0x128] sm:$0xff]  ;;  %v615_v24 = vld [vmem:[%s5106_s3 + $0x120] sm:$0xff] }
  0x13   : > { %1580 = vmatpush1.msra.mxu0 %v591_v7  ;;  %1805 = vmatpush1.msra.mxu1 %v623_v8  ;;  %v582_v25 = vld [vmem:[%s5106_s3 + $0x18] sm:$0xff]  ;;  %v581_v27 = vld [vmem:[%s5106_s3 + $0x10] sm:$0xff]  ;;  %v580_v29 = vld [vmem:[%s5106_s3 + $0x8] sm:$0xff] }
  0x14   : > { %1581 = vmatprep.subr.mxu0 %v5110_v2  ;;  %1806 = vmatprep.subr.mxu1 %v5110_v2  ;;  %v614_v26 = vld [vmem:[%s5106_s3 + $0x118] sm:$0xff]  ;;  %v613_v28 = vld [vmem:[%s5106_s3 + $0x110] sm:$0xff]  ;;  %v612_v30 = vld [vmem:[%s5106_s3 + $0x108] sm:$0xff] }
  0x15   : > { %1582 = vmatpush1.msra.mxu0 %v590_v9  ;;  %1807 = vmatpush1.msra.mxu1 %v622_v10  ;;  %v579_v31 = vld [vmem:[%s5106_s3] sm:$0xff]  ;;  %v610_v33 = vld [vmem:[%s5106_s3 + $0xf8] sm:$0xff]  ;;  %v609_v35 = vld [vmem:[%s5106_s3 + $0xf0] sm:$0xff] }
  0x16   : > { %1583 = vmatprep.subr.mxu0 %v5110_v2  ;;  %1808 = vmatprep.subr.mxu1 %v5110_v2  ;;  %v611_v32 = vld [vmem:[%s5106_s3 + $0x100] sm:$0xff]  ;;  %v642_v34 = vld [vmem:[%s5106_s3 + $0x1f8] sm:$0xff]  ;;  %v641_v36 = vld [vmem:[%s5106_s3 + $0x1f0] sm:$0xff] }
  0x17   : > { %1584 = vmatpush1.msra.mxu0 %v589_v11  ;;  %1809 = vmatpush1.msra.mxu1 %v621_v12  ;;  %v608_v37 = vld [vmem:[%s5106_s3 + $0xe8] sm:$0xff]  ;;  %v607_v39 = vld [vmem:[%s5106_s3 + $0xe0] sm:$0xff]  ;;  %v606_v41 = vld [vmem:[%s5106_s3 + $0xd8] sm:$0xff]  ;;  %v788_v12 = vrot.slane %v545_v5, 1 }
  0x18   : > { %1585 = vmatprep.subr.mxu0 %v5110_v2  ;;  %1810 = vmatprep.subr.mxu1 %v5110_v2  ;;  %v640_v38 = vld [vmem:[%s5106_s3 + $0x1e8] sm:$0xff]  ;;  %v639_v40 = vld [vmem:[%s5106_s3 + $0x1e0] sm:$0xff]  ;;  %v638_v42 = vld [vmem:[%s5106_s3 + $0x1d8] sm:$0xff] }
  0x19   : > { %1586 = vmatpush1.msra.mxu0 %v588_v13  ;;  %1811 = vmatpush1.msra.mxu1 %v620_v14  ;;  %v605_v43 = vld [vmem:[%s5106_s3 + $0xd0] sm:$0xff]  ;;  %v270_v45 = vld [vmem:[%s3463_s26 + $0x8] sm:$0xff]  ;;  %v269_v48 = vld [vmem:[%s3463_s26] sm:$0xff]  ;;  %v789_v13 = vrot.slane %v3512_v59, 1 }
  0x1a   : > { %1587 = vmatprep.subr.mxu0 %v5110_v2  ;;  %1812 = vmatprep.subr.mxu1 %v5110_v2  ;;  %v637_v44 = vld [vmem:[%s5106_s3 + $0x1d0] sm:$0xff]  ;;  %v604_v46 = vld [vmem:[%s5106_s3 + $0xc8] sm:$0xff]  ;;  %v3478_v49 = vld [vmem:[%s5104_s1] ss:$0 sm:$0xff] }
  0x1b   : > { %1588 = vmatpush1.msra.mxu0 %v587_v15  ;;  %1813 = vmatpush1.msra.mxu1 %v619_v16  ;;  %v636_v47 = vld [vmem:[%s5106_s3 + $0x1c8] sm:$0xff]  ;;  %v603_v50 = vld [vmem:[%s5106_s3 + $0xc0] sm:$0xff]  ;;  %v309_v52 = vmul.f32 %v3478_v49, %v270_v45  ;;  %v602_v53 = vld [vmem:[%s5106_s3 + $0xb8] sm:$0xff]  ;;  %v308_v55 = vmul.f32 %v3478_v49, %v269_v48  ;;  %v562_v16 = vsel %vm444_vm0, %v3512_v59, 0.0 }
  0x1c   : > { %1589 = vmatprep.subr.mxu0 %v5110_v2  ;;  %1814 = vmatprep.subr.mxu1 %v5110_v2  ;;  %v635_v51 = vld [vmem:[%s5106_s3 + $0x1c0] sm:$0xff]  ;;  %v634_v54 = vld [vmem:[%s5106_s3 + $0x1b8] sm:$0xff]  ;;  %v601_v57 = vld [vmem:[%s5106_s3 + $0xb0] sm:$0xff] }
  0x1d   : > { %1590 = vmatpush1.msra.mxu0 %v586_v17  ;;  %1815 = vmatpush1.msra.mxu1 %v618_v18  ;;  %v3501_v56 = vld [vmem:[%s5105_s2] ss:$0 sm:$0xff]  ;;  %v633_v58 = vld [vmem:[%s5106_s3 + $0x1b0] sm:$0xff]  ;;  %v272_v61 = vld [vmem:[%s3463_s26 + $0x18] sm:$0xff] }
  0x1e   : > { %1591 = vmatprep.subr.mxu0 %v5110_v2  ;;  %1816 = vmatprep.subr.mxu1 %v5110_v2  ;;  %v348_v60 = vadd.f32 %v3501_v56, %v309_v52  ;;  %v600_v62 = vld [vmem:[%s5106_s3 + $0xa8] sm:$0xff]  ;;  %v347_v0 = vadd.f32 %v3501_v56, %v308_v55  ;;  %v271_v1 = vld [vmem:[%s3463_s26 + $0x10] sm:$0xff]  ;;  %v599_v3 = vld [vmem:[%s5106_s3 + $0xa0] sm:$0xff]  ;;  %v311_v7 = vmul.f32 %v3478_v49, %v272_v61 }
  0x1f   : > { %1592 = vmatpush1.msra.mxu0 %v585_v19  ;;  %1817 = vmatpush1.msra.mxu1 %v617_v20  ;;  %v632_v63 = vld [vmem:[%s5106_s3 + $0x1a8] sm:$0xff]  ;;  %v631_v4 = vld [vmem:[%s5106_s3 + $0x1a0] sm:$0xff]  ;;  %v598_v8 = vld [vmem:[%s5106_s3 + $0x98] sm:$0xff]  ;;  %v310_v11 = vmul.f32 %v3478_v49, %v271_v1 }
  0x20   : > { %1593 = vmatprep.subr.mxu0 %v5110_v2  ;;  %1818 = vmatprep.subr.mxu1 %v5110_v2  ;;  %v380_v6 = vmax.f32 %v348_v60, 0.0  ;;  %v630_v9 = vld [vmem:[%s5106_s3 + $0x198] sm:$0xff]  ;;  %v379_v10 = vmax.f32 %v347_v0, 0.0  ;;  %v597_v14 = vld [vmem:[%s5106_s3 + $0x90] sm:$0xff]  ;;  %v350_v18 = vadd.f32 %v3501_v56, %v311_v7  ;;  %v274_v19 = vld [vmem:[%s3463_s26 + $0x28] sm:$0xff] }
  0x21   : > { %1594 = vmatpush1.msra.mxu0 %v584_v21  ;;  %1819 = vmatpush1.msra.mxu1 %v616_v22  ;;  %v629_v15 = vld [vmem:[%s5106_s3 + $0x190] sm:$0xff]  ;;  %v596_v20 = vld [vmem:[%s5106_s3 + $0x88] sm:$0xff]  ;;  %vm3591_vm3 = vmneg %vm444_vm0 }
  0x22   : > { %1595 = vmatprep.subr.mxu0 %v5110_v2  ;;  %1820 = vmatprep.subr.mxu1 %v5110_v2  ;;  %v448_v17 = vrot.slane %v380_v6, 7  ;;  %v628_v21 = vld [vmem:[%s5106_s3 + $0x188] sm:$0xff]  ;;  %v3567_v22 = vrot.slane %v379_v10, 7  ;;  %v276_v48 = vld [vmem:[%s3463_s26 + $0x38] sm:$0xff]  ;;  %v657_v55 = vld [vmem:[%s5106_s3 + $0x270] sm:$0xff] }
  0x23   : > { %1596 = vmatpush1.msra.mxu0 %v583_v23  ;;  %1821 = vmatpush1.msra.mxu1 %v615_v24  ;;  %v933_v23 = vrot.slane %v545_v5, 2  ;;  %v934_v24 = vrot.slane %v3512_v59, 2  ;;  %v656_v0 = vld [vmem:[%s5106_s3 + $0x268] sm:$0xff] }
  0x24   : > { %1597 = vmatprep.subr.mxu0 %v5110_v2  ;;  %1822 = vmatprep.subr.mxu1 %v5110_v2 }
  0x25   : > { %1598 = vmatpush1.msra.mxu0 %v582_v25  ;;  %1823 = vmatpush1.msra.mxu1 %v614_v26  ;;  %v349_v25 = vadd.f32 %v3501_v56, %v310_v11  ;;  %v3572_v26 = vsel %vm787_vm1, %v788_v12, %v789_v13 }
  0x26   : > { %1599 = vmatprep.subr.mxu0 %v5110_v2  ;;  %1824 = vmatprep.subr.mxu1 %v5110_v2  ;;  %5184 = vst [vmem:[#allocation4_spill] sm:$0xff] %v3572_v26 }
  0x27   : > { %1600 = vmatpush1.msra.mxu0 %v581_v27  ;;  %1825 = vmatpush1.msra.mxu1 %v613_v28  ;;  %v791_v27 = vrot.slane %v562_v16, 1  ;;  %v273_v28 = vld [vmem:[%s3463_s26 + $0x20] sm:$0xff] }
  0x28   : > { %1601 = vmatprep.subr.mxu0 %v5110_v2  ;;  %1826 = vmatprep.subr.mxu1 %v5110_v2 }
  0x29   : > { %1602 = vmatpush1.msra.mxu0 %v580_v29  ;;  %1827 = vmatpush1.msra.mxu1 %v612_v30  ;;  %v595_v29 = vld [vmem:[%s5106_s3 + $0x80] sm:$0xff]  ;;  %v3582_v30 = vsel %vm444_vm0, %v3567_v22, %v448_v17 }
  0x2a   : > { %1603 = vmatprep.subr.mxu0 %v5110_v2  ;;  %1828 = vmatprep.subr.mxu1 %v5110_v2  ;;  %v939_v52 = vrot.slane %v3582_v30, 2 }
  0x2b   : > { %1604 = vmatpush1.msra.mxu0 %v579_v31  ;;  %1829 = vmatpush1.msra.mxu1 %v611_v32  ;;  %v546_v31 = vsel %vm444_vm0, 0.0, %v3567_v22  ;;  %v382_v32 = vmax.f32 %v350_v18, 0.0 }
  0x2c   : > { %1605 = vmatprep.subr.mxu0 %v5110_v2  ;;  %1830 = vmatprep.subr.mxu1 %v5110_v2 }
  0x2d   : > { %1606 = vmatpush2.msra.mxu0 %v610_v33  ;;  %1831 = vmatpush2.msra.mxu1 %v642_v34  ;;  %v313_v33 = vmul.f32 %v3478_v49, %v274_v19  ;;  %v627_v34 = vld [vmem:[%s5106_s3 + $0x180] sm:$0xff]  ;;  %v451_v45 = vrot.slane %v382_v32, 7 }
  0x2e   : > { %1607 = vmatprep.subr.mxu0 %v5110_v2  ;;  %1832 = vmatprep.subr.mxu1 %v5110_v2 }
  0x2f   : > { %1608 = vmatpush2.msra.mxu0 %v609_v35  ;;  %1833 = vmatpush2.msra.mxu1 %v641_v36  ;;  %v936_v36 = vrot.slane %v562_v16, 2  ;;  %v564_v10 = vsel %vm444_vm0, %v451_v45, 0.0  ;;  %v689_v16 = vld [vmem:[%s5106_s3 + $0x370] sm:$0xff] }
  0x30   : > { %1609 = vmatprep.subr.mxu0 %v5110_v2  ;;  %1834 = vmatprep.subr.mxu1 %v5110_v2 }
  0x31   : > { %1610 = vmatpush2.msra.mxu0 %v608_v37  ;;  %1835 = vmatpush2.msra.mxu1 %v640_v38  ;;  %v3598_v37 = vsel %vm932_vm2, %v933_v23, %v934_v24  ;;  %v381_v38 = vmax.f32 %v349_v25, 0.0  ;;  %v277_v23 = vld [vmem:[%s3463_s26 + $0x40] sm:$0xff] }
  0x32   : > { %1611 = vmatprep.subr.mxu0 %v5110_v2  ;;  %1836 = vmatprep.subr.mxu1 %v5110_v2  ;;  %5187 = vst [vmem:[#allocation5_spill] sm:$0xff] %v3598_v37 }
  0x33   : > { %1612 = vmatpush2.msra.mxu0 %v607_v39  ;;  %1837 = vmatpush2.msra.mxu1 %v639_v40  ;;  %v312_v39 = vmul.f32 %v3478_v49, %v273_v28  ;;  %v3603_v40 = vsel %vm787_vm1, %v789_v13, %v791_v27  ;;  %v655_v13 = vld [vmem:[%s5106_s3 + $0x260] sm:$0xff] }
  0x34   : > { %1613 = vmatprep.subr.mxu0 %v5110_v2  ;;  %1838 = vmatprep.subr.mxu1 %v5110_v2  ;;  %5188 = vst [vmem:[#allocation6_spill] sm:$0xff] %v3603_v40 }
  0x35   : > { %1614 = vmatpush2.msra.mxu0 %v606_v41  ;;  %1839 = vmatpush2.msra.mxu1 %v638_v42  ;;  %v793_v41 = vrot.slane %v546_v31, 1  ;;  %v794_v42 = vrot.slane %v3582_v30, 1 }
  0x36   : > { %1615 = vmatprep.subr.mxu0 %v5110_v2  ;;  %1840 = vmatprep.subr.mxu1 %v5110_v2 }
  0x37   : > { %1616 = vmatpush2.msra.mxu0 %v605_v43  ;;  %1841 = vmatpush2.msra.mxu1 %v637_v44  ;;  %v658_v43 = vld [vmem:[%s5106_s3 + $0x278] sm:$0xff]  ;;  %v563_v44 = vsel %vm444_vm0, %v448_v17, 0.0 }
  0x38   : > { %1617 = vmatprep.subr.mxu0 %v5110_v2  ;;  %1842 = vmatprep.subr.mxu1 %v5110_v2  ;;  %v941_v5 = vrot.slane %v563_v44, 2 }
  0x39   : > { %1618 = vmatpush2.msra.mxu0 %v604_v46  ;;  %1843 = vmatpush2.msra.mxu1 %v636_v47  ;;  %v352_v46 = vadd.f32 %v3501_v56, %v313_v33  ;;  %v3619_v47 = vsel %vm932_vm2, %v934_v24, %v936_v36 }
  0x3a   : > { %1619 = vmatprep.subr.mxu0 %v5110_v2  ;;  %1844 = vmatprep.subr.mxu1 %v5110_v2  ;;  %5189 = vst [vmem:[#allocation7_spill] sm:$0xff] %v3619_v47  ;;  %v3683_v17 = vsel %vm932_vm2, %v939_v52, %v941_v5 }
  0x3b   : > { %1620 = vmatpush2.msra.mxu0 %v603_v50  ;;  %1845 = vmatpush2.msra.mxu1 %v635_v51  ;;  %v3624_v50 = vrot.slane %v381_v38, 7  ;;  %v938_v51 = vrot.slane %v546_v31, 2  ;;  %v688_v31 = vld [vmem:[%s5106_s3 + $0x368] sm:$0xff] }
  0x3c   : > { %1621 = vmatprep.subr.mxu0 %v5110_v2  ;;  %1846 = vmatprep.subr.mxu1 %v5110_v2 }
  0x3d   : > { %1622 = vmatpush2.msra.mxu0 %v602_v53  ;;  %1847 = vmatpush2.msra.mxu1 %v634_v54  ;;  %v351_v53 = vadd.f32 %v3501_v56, %v312_v39  ;;  %v275_v54 = vld [vmem:[%s3463_s26 + $0x30] sm:$0xff]  ;;  %v3639_v60 = vsel %vm444_vm0, %v3624_v50, %v451_v45  ;;  %v547_v61 = vsel %vm444_vm0, 0.0, %v3624_v50 }
  0x3e   : > { %1623 = vmatprep.subr.mxu0 %v5110_v2  ;;  %1848 = vmatprep.subr.mxu1 %v5110_v2  ;;  %v314_v1 = vmul.f32 %v3478_v49, %v275_v54  ;;  %v943_v19 = vrot.slane %v547_v61, 2 }
  0x3f   : > { %1624 = vmatpush2.msra.mxu0 %v601_v57  ;;  %1849 = vmatpush2.msra.mxu1 %v633_v58  ;;  %v3634_v57 = vsel %vm787_vm1, %v793_v41, %v794_v42  ;;  %v796_v58 = vrot.slane %v563_v44, 1  ;;  %v383_v6 = vmax.f32 %v351_v53, 0.0  ;;  %v653_v44 = vld [vmem:[%s5106_s3 + $0x250] sm:$0xff] }
  0x40   : > { %1625 = vmatprep.subr.mxu0 %v5110_v2  ;;  %1850 = vmatprep.subr.mxu1 %v5110_v2 }
  0x41   : > { %1626 = vmatpush2.msra.mxu0 %v600_v62  ;;  %1851 = vmatpush2.msra.mxu1 %v632_v63  ;;  %v384_v62 = vmax.f32 %v352_v46, 0.0  ;;  %v315_v63 = vmul.f32 %v3478_v49, %v276_v48  ;;  %v3663_v7 = vsel %vm787_vm1, %v794_v42, %v796_v58  ;;  %v3685_v18 = vrot.slane %v383_v6, 7  ;;  %v280_v46 = vld [vmem:[%s3463_s26 + $0x58] sm:$0xff]  ;;  %v687_v48 = vld [vmem:[%s5106_s3 + $0x360] sm:$0xff] }
  0x42   : > { %1627 = vmatprep.subr.mxu0 %v5110_v2  ;;  %1852 = vmatprep.subr.mxu1 %v5110_v2  ;;  %v686_v6 = vld [vmem:[%s5106_s3 + $0x358] sm:$0xff] }
  0x43   : > { %1628 = vmatpush2.msra.mxu0 %v599_v3  ;;  %1853 = vmatpush2.msra.mxu1 %v631_v4  ;;  %v690_v3 = vld [vmem:[%s5106_s3 + $0x378] sm:$0xff]  ;;  %v3656_v4 = vsel %vm932_vm2, %v938_v51, %v939_v52  ;;  %v454_v11 = vrot.slane %v384_v62, 7  ;;  %v354_v12 = vadd.f32 %v3501_v56, %v315_v63  ;;  %v548_v25 = vsel %vm444_vm0, 0.0, %v3685_v18 }
  0x44   : > { %1629 = vmatprep.subr.mxu0 %v5110_v2  ;;  %1854 = vmatprep.subr.mxu1 %v5110_v2  ;;  %v803_v38 = vrot.slane %v548_v25, 1  ;;  %v948_v45 = vrot.slane %v548_v25, 2 }
  0x45   : > { %1630 = vmatpush2.msra.mxu0 %v598_v8  ;;  %1855 = vmatpush2.msra.mxu1 %v630_v9  ;;  %v798_v8 = vrot.slane %v547_v61, 1  ;;  %v799_v9 = vrot.slane %v3639_v60, 1  ;;  %v3696_v24 = vsel %vm444_vm0, %v3685_v18, %v454_v11  ;;  %v386_v27 = vmax.f32 %v354_v12, 0.0  ;;  %v279_v61 = vld [vmem:[%s3463_s26 + $0x50] sm:$0xff] }
  0x46   : > { %1631 = vmatprep.subr.mxu0 %v5110_v2  ;;  %1856 = vmatprep.subr.mxu1 %v5110_v2  ;;  %v804_v39 = vrot.slane %v3696_v24, 1  ;;  %v565_v41 = vsel %vm444_vm0, %v454_v11, 0.0  ;;  %v949_v53 = vrot.slane %v3696_v24, 2 }
  0x47   : > { %1632 = vmatpush2.msra.mxu0 %v597_v14  ;;  %1857 = vmatpush2.msra.mxu1 %v629_v15  ;;  %v353_v14 = vadd.f32 %v3501_v56, %v314_v1  ;;  %v278_v15 = vld [vmem:[%s3463_s26 + $0x48] sm:$0xff]  ;;  %v457_v42 = vrot.slane %v386_v27, 7  ;;  %v806_v58 = vrot.slane %v565_v41, 1  ;;  %v319_v1 = vmul.f32 %v3478_v49, %v280_v46 }
  0x48   : > { %1633 = vmatprep.subr.mxu0 %v5110_v2  ;;  %1858 = vmatprep.subr.mxu1 %v5110_v2  ;;  %v317_v28 = vmul.f32 %v3478_v49, %v278_v15  ;;  %v951_v5 = vrot.slane %v565_v41, 2 }
  0x49   : > { %1634 = vmatpush2.msra.mxu0 %v596_v20  ;;  %1859 = vmatpush2.msra.mxu1 %v628_v21  ;;  %v944_v20 = vrot.slane %v3639_v60, 2  ;;  %v3690_v21 = vsel %vm787_vm1, %v798_v8, %v799_v9  ;;  %v385_v33 = vmax.f32 %v353_v14, 0.0  ;;  %v3771_v8 = vsel %vm932_vm2, %v948_v45, %v949_v53 }
  0x4a   : > { %1635 = vmatprep.subr.mxu0 %v5110_v2  ;;  %1860 = vmatprep.subr.mxu1 %v5110_v2  ;;  %v3776_v11 = vsel %vm787_vm1, %v804_v39, %v806_v58  ;;  %v566_v14 = vsel %vm444_vm0, %v457_v42, 0.0 }
  0x4b   : > { %1636 = vmatpush2.msra.mxu0 %v595_v29  ;;  %1637 = vmatprep.mubr.f32.mxu0 %v3572_v26  ;;  %v654_v29 = vld [vmem:[%s5106_s3 + $0x258] sm:$0xff]  ;;  %v3714_v32 = vsel %vm932_vm2, %v943_v19, %v944_v20  ;;  %v3741_v52 = vrot.slane %v385_v33, 7  ;;  %v3787_v19 = vsel %vm932_vm2, %v949_v53, %v951_v5  ;;  %v281_v33 = vld [vmem:[%s3463_s26 + $0x60] sm:$0xff] }
  0x4c   : > { %1861 = vmatpush2.msra.mxu1 %v627_v34  ;;  %2991 = vmatprep.mubr.msk.f32.mxu1 %vm3591_vm3, %v3567_v22  ;;  %v316_v34 = vmul.f32 %v3478_v49, %v277_v23  ;;  %v685_v23 = vld [vmem:[%s5106_s3 + $0x350] sm:$0xff]  ;;  %v284_v5 = vld [vmem:[%s3463_s26 + $0x78] sm:$0xff] }
  0x4d   : > { %2959 = vmatmul.mubr.msk.f32.vlgmr.msra.gmra.mxu0 %vm3591_vm3, %v3512_v59  ;;  %1863 = vmatmul.mubr.f32.vlgmr.msra.gmra.mxu1 %v3598_v37  ;;  %v3753_v62 = vsel %vm444_vm0, %v3741_v52, %v457_v42  ;;  %v549_v63 = vsel %vm444_vm0, 0.0, %v3741_v52  ;;  %v650_v42 = vld [vmem:[%s5106_s3 + $0x238] sm:$0xff] }
  0x4e   : > { %2023 = vmatprep.subr.mxu0 %v5110_v2  ;;  %1642 = vmatprep.mubr.f32.mxu0 %v3603_v40  ;;  %v355_v54 = vadd.f32 %v3501_v56, %v316_v34  ;;  %v808_v12 = vrot.slane %v549_v63, 1  ;;  %v953_v27 = vrot.slane %v549_v63, 2 }
  0x4f   : > { %2024 = vmatpush1.msra.mxu0 %v658_v43  ;;  %1867 = vmatprep.mubr.f32.mxu1 %v3582_v30  ;;  %v356_v43 = vadd.f32 %v3501_v56, %v317_v28  ;;  %v954_v28 = vrot.slane %v3753_v62, 2 }
  0x50   : > { %2025 = vmatprep.subr.mxu0 %v5110_v2  ;;  %2248 = vmatprep.subr.mxu1 %v5110_v2 }
  0x51   : > { %1643 = vmatmul.mubr.f32.gmra.mxu0 %v3512_v59  ;;  %1868 = vmatmul.mubr.f32.gmra.mxu1 %v3619_v47  ;;  %v3828_v45 = vsel %vm932_vm2, %v953_v27, %v954_v28  ;;  %v323_v27 = vmul.f32 %v3478_v49, %v284_v5  ;;  %v5195_v47 = vmov 0.0  }
  0x52   : > { %2026 = vmatpush1.msra.mxu0 %v657_v55  ;;  %1647 = vmatprep.mubr.f32.mxu0 %v3634_v57  ;;  %v3747_v55 = vsel %vm787_vm1, %v803_v38, %v804_v39 }
  0x53   : > { %2993 = vmatprep.mubr.msk.f32.mxu1 %vm3591_vm3, %v3624_v50  ;;  %2027 = vmatprep.subr.mxu0 %v5110_v2 }
  0x54   : > { %2028 = vmatpush1.msra.mxu0 %v656_v0  ;;  %2249 = vmatpush1.msra.mxu1 %v690_v3  ;;  %v388_v0 = vmax.f32 %v356_v43, 0.0  ;;  %v652_v3 = vld [vmem:[%s5106_s3 + $0x248] sm:$0xff]  ;;  %v956_v43 = vrot.slane %v566_v14, 2 }
  0x55   : > { %2961 = vmatmul.mubr.msk.f32.gmra.mxu0 %vm3591_vm3, %v3567_v22  ;;  %1873 = vmatmul.mubr.f32.gmra.mxu1 %v3656_v4  ;;  %v801_v22 = vrot.slane %v564_v10, 1 }
  0x56   : > { %1652 = vmatprep.mubr.f32.mxu0 %v3663_v7  ;;  %1877 = vmatprep.mubr.f32.mxu1 %v3639_v60  ;;  %v460_v15 = vrot.slane %v388_v0, 7 }
  0x57   : > { %2029 = vmatprep.subr.mxu0 %v5110_v2  ;;  %2250 = vmatprep.subr.mxu1 %v5110_v2  ;;  %v3719_v36 = vsel %vm787_vm1, %v799_v9, %v801_v22  ;;  %v387_v9 = vmax.f32 %v355_v54, 0.0  ;;  %v282_v22 = vld [vmem:[%s3463_s26 + $0x68] sm:$0xff] }
  0x58   : > { %2030 = vmatpush1.msra.mxu0 %v655_v13  ;;  %2251 = vmatpush1.msra.mxu1 %v689_v16  ;;  %v809_v13 = vrot.slane %v3753_v62, 1  ;;  %v358_v16 = vadd.f32 %v3501_v56, %v319_v1  ;;  %v321_v41 = vmul.f32 %v3478_v49, %v282_v22  ;;  %v3844_v1 = vsel %vm932_vm2, %v954_v28, %v956_v43  ;;  %v648_v28 = vld [vmem:[%s5106_s3 + $0x228] sm:$0xff] }
  0x59   : > { %1653 = vmatmul.mubr.f32.gmra.mxu0 %v3582_v30  ;;  %1878 = vmatmul.mubr.f32.gmra.mxu1 %v3683_v17  ;;  %v946_v30 = vrot.slane %v564_v10, 2  ;;  %v318_v10 = vmul.f32 %v3478_v49, %v279_v61  ;;  %v3798_v25 = vrot.slane %v387_v9, 7  ;;  %v567_v61 = vsel %vm444_vm0, %v460_v15, 0.0 }
  0x5a   : > { %1657 = vmatprep.mubr.f32.mxu0 %v3690_v21  ;;  %2995 = vmatprep.mubr.msk.f32.mxu1 %vm3591_vm3, %v3685_v18  ;;  %v390_v39 = vmax.f32 %v358_v16, 0.0  ;;  %v360_v0 = vadd.f32 %v3501_v56, %v321_v41  ;;  %v283_v16 = vld [vmem:[%s3463_s26 + $0x70] sm:$0xff] }
  0x5b   : > { %2031 = vmatprep.subr.mxu0 %v5110_v2  ;;  %2252 = vmatprep.subr.mxu1 %v5110_v2  ;;  %v3739_v51 = vsel %vm932_vm2, %v944_v20, %v946_v30  ;;  %v651_v20 = vld [vmem:[%s5106_s3 + $0x240] sm:$0xff]  ;;  %v811_v30 = vrot.slane %v566_v14, 1  ;;  %v3810_v34 = vsel %vm444_vm0, %v3798_v25, %v460_v15  ;;  %v550_v38 = vsel %vm444_vm0, 0.0, %v3798_v25 }
  0x5c   : > { %2032 = vmatpush1.msra.mxu0 %v654_v29  ;;  %2253 = vmatpush1.msra.mxu1 %v688_v31  ;;  %v357_v29 = vadd.f32 %v3501_v56, %v318_v10  ;;  %v3804_v31 = vsel %vm787_vm1, %v808_v12, %v809_v13  ;;  %v813_v54 = vrot.slane %v550_v38, 1  ;;  %v814_v58 = vrot.slane %v3810_v34, 1 }
  0x5d   : > { %2963 = vmatmul.mubr.msk.f32.gmra.mxu0 %vm3591_vm3, %v3624_v50  ;;  %1883 = vmatmul.mubr.f32.gmra.mxu1 %v3714_v32  ;;  %v3833_v53 = vsel %vm787_vm1, %v809_v13, %v811_v30  ;;  %v463_v63 = vrot.slane %v390_v39, 7  ;;  %v958_v10 = vrot.slane %v550_v38, 2  ;;  %v959_v12 = vrot.slane %v3810_v34, 2  ;;  %v682_v30 = vld [vmem:[%s5106_s3 + $0x338] sm:$0xff] }
  0x5e   : > { %1662 = vmatprep.mubr.f32.mxu0 %v3719_v36  ;;  %1887 = vmatprep.mubr.f32.mxu1 %v3696_v24  ;;  %v389_v46 = vmax.f32 %v357_v29, 0.0  ;;  %v3861_v14 = vsel %vm787_vm1, %v813_v54, %v814_v58  ;;  %v816_v15 = vrot.slane %v567_v61, 1  ;;  %v961_v29 = vrot.slane %v567_v61, 2  ;;  %v286_v61 = vld [vmem:[%s3463_s26 + $0x88] sm:$0xff] }
  0x5f   : > { %2033 = vmatprep.subr.mxu0 %v5110_v2  ;;  %2254 = vmatprep.subr.mxu1 %v5110_v2  ;;  %v322_v39 = vmul.f32 %v3478_v49, %v283_v16 }
  0x60   : > { %2034 = vmatpush1.msra.mxu0 %v653_v44  ;;  %2255 = vmatpush1.msra.mxu1 %v687_v48  ;;  %v684_v44 = vld [vmem:[%s5106_s3 + $0x348] sm:$0xff]  ;;  %v320_v48 = vmul.f32 %v3478_v49, %v281_v33  ;;  %v3855_v9 = vrot.slane %v389_v46, 7  ;;  %v3885_v33 = vsel %vm932_vm2, %v958_v10, %v959_v12  ;;  %v3890_v41 = vsel %vm787_vm1, %v814_v58, %v816_v15  ;;  %v647_v58 = vld [vmem:[%s5106_s3 + $0x220] sm:$0xff] }
  0x61   : > { %1663 = vmatmul.mubr.f32.gmra.mxu0 %v3639_v60  ;;  %1888 = vmatmul.mubr.f32.gmra.mxu1 %v3739_v51  ;;  %v3901_v54 = vsel %vm932_vm2, %v959_v12, %v961_v29  ;;  %v680_v29 = vld [vmem:[%s5106_s3 + $0x328] sm:$0xff] }
  0x62   : > { %1667 = vmatprep.mubr.f32.mxu0 %v3747_v55  ;;  %2997 = vmatprep.mubr.msk.f32.mxu1 %vm3591_vm3, %v3741_v52  ;;  %v359_v13 = vadd.f32 %v3501_v56, %v320_v48  ;;  %v551_v22 = vsel %vm444_vm0, 0.0, %v3855_v9  ;;  %v362_v48 = vadd.f32 %v3501_v56, %v323_v27  ;;  %v646_v27 = vld [vmem:[%s5106_s3 + $0x218] sm:$0xff] }
  0x63   : > { %2035 = vmatprep.subr.mxu0 %v5110_v2  ;;  %2256 = vmatprep.subr.mxu1 %v5110_v2 }
  0x64   : > { %2036 = vmatpush1.msra.mxu0 %v652_v3  ;;  %2257 = vmatpush1.msra.mxu1 %v686_v6  ;;  %v649_v3 = vld [vmem:[%s5106_s3 + $0x230] sm:$0xff]  ;;  %v683_v6 = vld [vmem:[%s5106_s3 + $0x340] sm:$0xff]  ;;  %v391_v38 = vmax.f32 %v359_v13, 0.0 }
  0x65   : > { %2965 = vmatmul.mubr.msk.f32.gmra.mxu0 %vm3591_vm3, %v3685_v18  ;;  %1893 = vmatmul.mubr.f32.gmra.mxu1 %v3771_v8  ;;  %v285_v13 = vld [vmem:[%s3463_s26 + $0x80] sm:$0xff] }
  0x66   : > { %1672 = vmatprep.mubr.f32.mxu0 %v3776_v11  ;;  %1897 = vmatprep.mubr.f32.mxu1 %v3753_v62 }
  0x67   : > { %2037 = vmatprep.subr.mxu0 %v5110_v2  ;;  %2258 = vmatprep.subr.mxu1 %v5110_v2 }
  0x68   : > { %2038 = vmatpush1.msra.mxu0 %v651_v20  ;;  %2259 = vmatpush1.msra.mxu1 %v685_v23  ;;  %v3867_v20 = vsel %vm444_vm0, %v3855_v9, %v463_v63  ;;  %v392_v23 = vmax.f32 %v360_v0, 0.0  ;;  %v3912_v0 = vrot.slane %v391_v38, 7 }
  0x69   : > { %1673 = vmatmul.mubr.f32.gmra.mxu0 %v3696_v24  ;;  %1898 = vmatmul.mubr.f32.gmra.mxu1 %v3787_v19  ;;  %v819_v43 = vrot.slane %v3867_v20, 1  ;;  %v964_v5 = vrot.slane %v3867_v20, 2 }
  0x6a   : > { %1677 = vmatprep.mubr.f32.mxu0 %v3804_v31  ;;  %2999 = vmatprep.mubr.msk.f32.mxu1 %vm3591_vm3, %v3798_v25  ;;  %v466_v46 = vrot.slane %v392_v23, 7  ;;  %v552_v16 = vsel %vm444_vm0, 0.0, %v3912_v0  ;;  %v325_v23 = vmul.f32 %v3478_v49, %v286_v61 }
  0x6b   : > { %2039 = vmatprep.subr.mxu0 %v5110_v2  ;;  %2260 = vmatprep.subr.mxu1 %v5110_v2 }
  0x6c   : > { %2040 = vmatpush1.msra.mxu0 %v650_v42  ;;  %2261 = vmatpush1.msra.mxu1 %v684_v44  ;;  %v818_v42 = vrot.slane %v551_v22, 1  ;;  %v568_v44 = vsel %vm444_vm0, %v463_v63, 0.0  ;;  %v681_v63 = vld [vmem:[%s5106_s3 + $0x330] sm:$0xff]  ;;  %v3924_v15 = vsel %vm444_vm0, %v3912_v0, %v466_v46 }
  0x6d   : > { %2967 = vmatmul.mubr.msk.f32.gmra.mxu0 %vm3591_vm3, %v3741_v52  ;;  %1903 = vmatmul.mubr.f32.gmra.mxu1 %v3828_v45  ;;  %v821_v12 = vrot.slane %v568_v44, 1  ;;  %5190 = vst [vmem:[#allocation8_spill] sm:$0xff] %v3924_v15 }
  0x6e   : > { %1682 = vmatprep.mubr.f32.mxu0 %v3833_v53  ;;  %1907 = vmatprep.mubr.f32.mxu1 %v3810_v34  ;;  %v3918_v10 = vsel %vm787_vm1, %v818_v42, %v819_v43 }
  0x6f   : > { %2041 = vmatprep.subr.mxu0 %v5110_v2  ;;  %2262 = vmatprep.subr.mxu1 %v5110_v2  ;;  %v3947_v42 = vsel %vm787_vm1, %v819_v43, %v821_v12 }
  0x70   : > { %2042 = vmatpush1.msra.mxu0 %v649_v3  ;;  %2263 = vmatpush1.msra.mxu1 %v683_v6  ;;  %v963_v3 = vrot.slane %v551_v22, 2  ;;  %v361_v6 = vadd.f32 %v3501_v56, %v322_v39  ;;  %v394_v22 = vmax.f32 %v362_v48, 0.0  ;;  %v324_v39 = vmul.f32 %v3478_v49, %v285_v13 }
  0x71   : > { %1683 = vmatmul.mubr.f32.gmra.mxu0 %v3753_v62  ;;  %1908 = vmatmul.mubr.f32.gmra.mxu1 %v3844_v1  ;;  %v824_v48 = vrot.slane %v3924_v15, 1  ;;  %v968_v13 = vrot.slane %v552_v16, 2 }
  0x72   : > { %1687 = vmatprep.mubr.f32.mxu0 %v3861_v14  ;;  %3001 = vmatprep.mubr.msk.f32.mxu1 %vm3591_vm3, %v3855_v9  ;;  %v393_v38 = vmax.f32 %v361_v6, 0.0  ;;  %v469_v61 = vrot.slane %v394_v22, 7  ;;  %v288_v6 = vld [vmem:[%s3463_s26 + $0x98] sm:$0xff]  ;;  %v969_v22 = vrot.slane %v3924_v15, 2 }
  0x73   : > { %2043 = vmatprep.subr.mxu0 %v5110_v2  ;;  %2264 = vmatprep.subr.mxu1 %v5110_v2 }
  0x74   : > { %2044 = vmatpush1.msra.mxu0 %v648_v28  ;;  %2265 = vmatpush1.msra.mxu1 %v682_v30  ;;  %v966_v28 = vrot.slane %v568_v44, 2  ;;  %v3942_v30 = vsel %vm932_vm2, %v963_v3, %v964_v5  ;;  %v823_v44 = vrot.slane %v552_v16, 1  ;;  %v645_v3 = vld [vmem:[%s5106_s3 + $0x210] sm:$0xff]  ;;  %v3969_v12 = vrot.slane %v393_v38, 7 }
  0x75   : > { %2969 = vmatmul.mubr.msk.f32.gmra.mxu0 %vm3591_vm3, %v3798_v25  ;;  %1913 = vmatmul.mubr.f32.gmra.mxu1 %v3885_v33  ;;  %v570_v59 = vsel %vm444_vm0, %v469_v61, 0.0 }
  0x76   : > { %1692 = vmatprep.mubr.f32.mxu0 %v3890_v41  ;;  %1917 = vmatprep.mubr.f32.mxu1 %v3867_v20  ;;  %v3958_v43 = vsel %vm932_vm2, %v964_v5, %v966_v28  ;;  %5192 = vst [vmem:[#allocation10_spill] sm:$0xff] %v3969_v12  ;;  %v363_v5 = vadd.f32 %v3501_v56, %v324_v39  ;;  %v287_v28 = vld [vmem:[%s3463_s26 + $0x90] sm:$0xff]  ;;  %v553_v16 = vsel %vm444_vm0, 0.0, %v3969_v12 }
  0x77   : > { %2045 = vmatprep.subr.mxu0 %v5110_v2  ;;  %2266 = vmatprep.subr.mxu1 %v5110_v2  ;;  %5191 = vst [vmem:[#allocation9_spill] sm:$0xff] %v3958_v43  ;;  %v327_v39 = vmul.f32 %v3478_v49, %v288_v6  ;;  %v828_v37 = vrot.slane %v553_v16, 1 }
  0x78   : > { %2046 = vmatpush1.msra.mxu0 %v647_v58  ;;  %2267 = vmatpush1.msra.mxu1 %v681_v63  ;;  %v569_v58 = vsel %vm444_vm0, %v466_v46, 0.0  ;;  %v364_v63 = vadd.f32 %v3501_v56, %v325_v23  ;;  %v679_v46 = vld [vmem:[%s5106_s3 + $0x320] sm:$0xff]  ;;  %v3975_v23 = vsel %vm787_vm1, %v823_v44, %v824_v48  ;;  %v644_v44 = vld [vmem:[%s5106_s3 + $0x208] sm:$0xff]  ;;  %v395_v6 = vmax.f32 %v363_v5, 0.0 }
  0x79   : > { %1693 = vmatmul.mubr.f32.gmra.mxu0 %v3810_v34  ;;  %1918 = vmatmul.mubr.f32.gmra.mxu1 %v3901_v54  ;;  %v643_v5 = vld [vmem:[%s5106_s3 + $0x200] sm:$0xff] }
  0x7a   : > { %1697 = vmatprep.mubr.f32.mxu0 %v3918_v10  ;;  %3003 = vmatprep.mubr.msk.f32.mxu1 %vm3591_vm3, %v3912_v0  ;;  %v396_v38 = vmax.f32 %v364_v63, 0.0  ;;  %v3999_v63 = vsel %vm932_vm2, %v968_v13, %v969_v22  ;;  %v366_v13 = vadd.f32 %v3501_v56, %v327_v39 }
  0x7b   : > { %2047 = vmatprep.subr.mxu0 %v5110_v2  ;;  %2268 = vmatprep.subr.mxu1 %v5110_v2  ;;  %5194 = vst [vmem:[#allocation12_spill] sm:$0xff] %v3999_v63 }
  0x7c   : > { %2048 = vmatpush1.msra.mxu0 %v646_v27  ;;  %2269 = vmatpush1.msra.mxu1 %v680_v29  ;;  %v826_v27 = vrot.slane %v569_v58, 1  ;;  %v3981_v29 = vsel %vm444_vm0, %v3969_v12, %v469_v61  ;;  %v472_v26 = vrot.slane %v396_v38, 7  ;;  %v677_v61 = vld [vmem:[%s5106_s3 + $0x310] sm:$0xff] }
  0x7d   : > { %2971 = vmatmul.mubr.msk.f32.gmra.mxu0 %vm3591_vm3, %v3855_v9  ;;  %1923 = vmatmul.mubr.f32.gmra.mxu1 %v3942_v30  ;;  %5193 = vst [vmem:[#allocation11_spill] sm:$0xff] %v3981_v29  ;;  %v829_v40 = vrot.slane %v3981_v29, 1  ;;  %v974_v38 = vrot.slane %v3981_v29, 2 }
  0x7e   : > { %1702 = vmatprep.mubr.f32.mxu0 %v3947_v42  ;;  %1927 = vmatprep.mubr.f32.mxu1 %v3924_v15 }
  0x7f   : > { %2049 = vmatprep.subr.mxu0 %v5110_v2  ;;  %2270 = vmatprep.subr.mxu1 %v5110_v2  ;;  %v678_v2 = vld [vmem:[%s5106_s3 + $0x318] sm:$0xff]  ;;  %v4032_v39 = vsel %vm787_vm1, %v828_v37, %v829_v40 }
  0x80   : > { %2050 = vmatpush1.msra.mxu0 %v645_v3  ;;  %2271 = vmatpush1.msra.mxu1 %v679_v46  ;;  %v971_v3 = vrot.slane %v569_v58, 2  ;;  %v326_v46 = vmul.f32 %v3478_v49, %v287_v28  ;;  %v4004_v58 = vsel %vm787_vm1, %v824_v48, %v826_v27  ;;  %v290_v27 = vld [vmem:[%s3463_s26 + $0xa8] sm:$0xff]  ;;  %v973_v28 = vrot.slane %v553_v16, 2  ;;  %5199 = vst [vmem:[#allocation16_spill] sm:$0xff] %v4032_v39  ;;  %v674_v37 = vld [vmem:[%s5106_s3 + $0x2f8] sm:$0xff] }
  0x81   : > { %1703 = vmatmul.mubr.f32.gmra.mxu0 %v3867_v20  ;;  %1928 = vmatmul.mubr.f32.gmra.mxu1 %v3958_v43  ;;  %5196 = vst [vmem:[#allocation13_spill] sm:$0xff] %v4004_v58 }
  0x82   : > { %1707 = vmatprep.mubr.f32.mxu0 %v3975_v23  ;;  %3005 = vmatprep.mubr.msk.f32.mxu1 %vm3591_vm3, %v3969_v12  ;;  %v4015_v48 = vsel %vm932_vm2, %v969_v22, %v971_v3  ;;  %v365_v22 = vadd.f32 %v3501_v56, %v326_v46  ;;  %v289_v3 = vld [vmem:[%s3463_s26 + $0xa0] sm:$0xff]  ;;  %v329_v46 = vmul.f32 %v3478_v49, %v290_v27 }
  0x83   : > { %2051 = vmatprep.subr.mxu0 %v5195_v47  ;;  %2272 = vmatprep.subr.mxu1 %v5195_v47  ;;  %5197 = vst [vmem:[#allocation14_spill] sm:$0xff] %v4015_v48 }
  0x84   : > { %2052 = vmatpush1.msra.mxu0 %v644_v44  ;;  %2273 = vmatpush1.msra.mxu1 %v678_v2  ;;  %v4026_v2 = vrot.slane %v395_v6, 7  ;;  %v831_v44 = vrot.slane %v570_v59, 1  ;;  %v398_v6 = vmax.f32 %v366_v13, 0.0  ;;  %v4056_v13 = vsel %vm932_vm2, %v973_v28, %v974_v38 }
  0x85   : > { %2973 = vmatmul.mubr.msk.f32.gmra.mxu0 %vm3591_vm3, %v3912_v0  ;;  %1933 = vmatmul.mubr.f32.gmra.mxu1 %v3999_v63  ;;  %5201 = vst [vmem:[#allocation18_spill] sm:$0xff] %v4056_v13  ;;  %v397_v27 = vmax.f32 %v365_v22, 0.0  ;;  %v368_v28 = vadd.f32 %v3501_v56, %v329_v46  ;;  %v673_v22 = vld [vmem:[%s5106_s3 + $0x2f0] sm:$0xff] }
  0x86   : > { %1712 = vmatprep.mubr.f32.mxu0 %v4004_v58  ;;  %1937 = vmatprep.mubr.f32.mxu1 %v3981_v29  ;;  %5198 = vst [vmem:[#allocation15_spill] sm:$0xff] %v4026_v2  ;;  %v4038_v63 = vsel %vm444_vm0, %v4026_v2, %v472_v26  ;;  %v554_v16 = vsel %vm444_vm0, 0.0, %v4026_v2  ;;  %v676_v58 = vld [vmem:[%s5106_s3 + $0x308] sm:$0xff]  ;;  %v475_v43 = vrot.slane %v398_v6, 7 }
  0x87   : > { %2053 = vmatprep.subr.mxu0 %v5195_v47  ;;  %2274 = vmatprep.subr.mxu1 %v5195_v47  ;;  %5200 = vst [vmem:[#allocation17_spill] sm:$0xff] %v4038_v63  ;;  %v979_v6 = vrot.slane %v4038_v63, 2 }
  0x88   : > { %2054 = vmatpush1.msra.mxu0 %v643_v5  ;;  %2275 = vmatpush1.msra.mxu1 %v677_v61  ;;  %v976_v5 = vrot.slane %v570_v59, 2  ;;  %v328_v61 = vmul.f32 %v3478_v49, %v289_v3  ;;  %v4061_v59 = vsel %vm787_vm1, %v829_v40, %v831_v44  ;;  %v292_v44 = vld [vmem:[%s3463_s26 + $0xb8] sm:$0xff]  ;;  %v978_v3 = vrot.slane %v554_v16, 2 }
  0x89   : > { %1713 = vmatmul.mubr.f32.gmra.mxu0 %v3924_v15  ;;  %1938 = vmatmul.mubr.f32.gmra.mxu1 %v4015_v48  ;;  %5202 = vst [vmem:[#allocation19_spill] sm:$0xff] %v4061_v59  ;;  %v833_v48 = vrot.slane %v554_v16, 1  ;;  %v834_v15 = vrot.slane %v4038_v63, 1 }
  0x8a   : > { %1717 = vmatprep.mubr.f32.mxu0 %v4032_v39  ;;  %3007 = vmatprep.mubr.msk.f32.mxu1 %vm3591_vm3, %v4026_v2  ;;  %v571_v39 = vsel %vm444_vm0, %v472_v26, 0.0  ;;  %v4072_v40 = vsel %vm932_vm2, %v974_v38, %v976_v5  ;;  %v675_v26 = vld [vmem:[%s5106_s3 + $0x300] sm:$0xff]  ;;  %v367_v38 = vadd.f32 %v3501_v56, %v328_v61  ;;  %v291_v5 = vld [vmem:[%s3463_s26 + $0xb0] sm:$0xff]  ;;  %v331_v61 = vmul.f32 %v3478_v49, %v292_v44 }
  0x8b   : > { %2055 = vmatprep.subr.mxu0 %v5195_v47  ;;  %2276 = vmatprep.subr.mxu1 %v5195_v47  ;;  %5203 = vst [vmem:[#allocation20_spill] sm:$0xff] %v4072_v40  ;;  %v4089_v46 = vsel %vm787_vm1, %v833_v48, %v834_v15  ;;  %v672_v48 = vld [vmem:[%s5106_s3 + $0x2e8] sm:$0xff] }
  0x8c   : > { %2056 = vmatpush2.msra.mxu0 %v674_v37  ;;  %2277 = vmatpush1.msra.mxu1 %v676_v58  ;;  %v4083_v58 = vrot.slane %v397_v27, 7  ;;  %5205 = vst [vmem:[#allocation22_spill] sm:$0xff] %v4089_v46  ;;  %v836_v37 = vrot.slane %v571_v39, 1  ;;  %v400_v27 = vmax.f32 %v368_v28, 0.0  ;;  %v4113_v28 = vsel %vm932_vm2, %v978_v3, %v979_v6 }
  0x8d   : > { %2975 = vmatmul.mubr.msk.f32.gmra.mxu0 %vm3591_vm3, %v3969_v12  ;;  %1943 = vmatmul.mubr.f32.gmra.mxu1 %v4056_v13  ;;  %5207 = vst [vmem:[#allocation24_spill] sm:$0xff] %v4113_v28  ;;  %v399_v44 = vmax.f32 %v367_v38, 0.0  ;;  %v370_v3 = vadd.f32 %v3501_v56, %v331_v61  ;;  %v294_v38 = vld [vmem:[%s3463_s26 + $0xc8] sm:$0xff] }
  0x8e   : > { %1722 = vmatprep.mubr.f32.mxu0 %v4061_v59  ;;  %1947 = vmatprep.mubr.f32.mxu1 %v4038_v63  ;;  %5204 = vst [vmem:[#allocation21_spill] sm:$0xff] %v4083_v58  ;;  %v4095_v13 = vsel %vm444_vm0, %v4083_v58, %v475_v43  ;;  %v555_v16 = vsel %vm444_vm0, 0.0, %v4083_v58  ;;  %v706_v59 = vld [vmem:[%s5106_s3 + $0x3f8] sm:$0xff]  ;;  %v478_v12 = vrot.slane %v400_v27, 7 }
  0x8f   : > { %2057 = vmatprep.subr.mxu0 %v5195_v47  ;;  %2278 = vmatprep.subr.mxu1 %v5195_v47  ;;  %5206 = vst [vmem:[#allocation23_spill] sm:$0xff] %v4095_v13 }
  0x90   : > { %2058 = vmatpush2.msra.mxu0 %v673_v22  ;;  %2279 = vmatpush1.msra.mxu1 %v675_v26  ;;  %v981_v22 = vrot.slane %v571_v39, 2  ;;  %v330_v26 = vmul.f32 %v3478_v49, %v291_v5  ;;  %v4118_v39 = vsel %vm787_vm1, %v834_v15, %v836_v37  ;;  %v671_v15 = vld [vmem:[%s5106_s3 + $0x2e0] sm:$0xff]  ;;  %v983_v37 = vrot.slane %v555_v16, 2 }
  0x91   : > { %1723 = vmatmul.mubr.f32.gmra.mxu0 %v3981_v29  ;;  %1948 = vmatmul.mubr.f32.gmra.mxu1 %v4072_v40  ;;  %5208 = vst [vmem:[#allocation25_spill] sm:$0xff] %v4118_v39  ;;  %v838_v40 = vrot.slane %v555_v16, 1  ;;  %v839_v29 = vrot.slane %v4095_v13, 1  ;;  %v984_v5 = vrot.slane %v4095_v13, 2 }
  0x92   : > { %1727 = vmatprep.mubr.f32.mxu0 %v4089_v46  ;;  %3009 = vmatprep.mubr.msk.f32.mxu1 %vm3591_vm3, %v4083_v58  ;;  %v572_v46 = vsel %vm444_vm0, %v475_v43, 0.0  ;;  %v4129_v49 = vsel %vm932_vm2, %v979_v6, %v981_v22  ;;  %v705_v43 = vld [vmem:[%s5106_s3 + $0x3f0] sm:$0xff]  ;;  %v369_v6 = vadd.f32 %v3501_v56, %v330_v26  ;;  %v4159_v56 = vld [vmem:[%s5104_s1] ss:$0 sm:$0xff]  ;;  %v670_v26 = vld [vmem:[%s5106_s3 + $0x2d8] sm:$0xff] }
  0x93   : > { %2059 = vmatprep.subr.mxu0 %v5195_v47  ;;  %2280 = vmatprep.subr.mxu1 %v5195_v47  ;;  %5209 = vst [vmem:[#allocation26_spill] sm:$0xff] %v4129_v49  ;;  %v4146_v27 = vsel %vm787_vm1, %v838_v40, %v839_v29  ;;  %v841_v61 = vrot.slane %v572_v46, 1  ;;  %v333_v40 = vmul.f32 %v4159_v56, %v294_v38 }
  0x94   : > { %2060 = vmatpush2.msra.mxu0 %v672_v48  ;;  %2281 = vmatpush2.msra.mxu1 %v706_v59  ;;  %v4140_v59 = vrot.slane %v399_v44, 7  ;;  %5211 = vst [vmem:[#allocation28_spill] sm:$0xff] %v4146_v27  ;;  %v293_v48 = vld [vmem:[%s3463_s26 + $0xc0] sm:$0xff]  ;;  %v402_v44 = vmax.f32 %v370_v3, 0.0  ;;  %v704_v3 = vld [vmem:[%s5106_s3 + $0x3e8] sm:$0xff]  ;;  %v4175_v38 = vsel %vm932_vm2, %v983_v37, %v984_v5 }
  0x95   : > { %2977 = vmatmul.mubr.msk.f32.gmra.mxu0 %vm3591_vm3, %v4026_v2  ;;  %1953 = vmatmul.mubr.f32.gmra.mxu1 %v4113_v28  ;;  %5213 = vst [vmem:[#allocation30_spill] sm:$0xff] %v4175_v38  ;;  %v4188_v37 = vld [vmem:[%s5105_s2] ss:$0 sm:$0xff] }
  0x96   : > { %1732 = vmatprep.mubr.f32.mxu0 %v4118_v39  ;;  %1957 = vmatprep.mubr.f32.mxu1 %v4095_v13  ;;  %5210 = vst [vmem:[#allocation27_spill] sm:$0xff] %v4140_v59  ;;  %v4152_v22 = vsel %vm444_vm0, %v4140_v59, %v478_v12  ;;  %v556_v16 = vsel %vm444_vm0, 0.0, %v4140_v59  ;;  %v481_v39 = vrot.slane %v402_v44, 7 }
  0x97   : > { %2061 = vmatprep.subr.mxu0 %v5195_v47  ;;  %2282 = vmatprep.subr.mxu1 %v5195_v47  ;;  %5212 = vst [vmem:[#allocation29_spill] sm:$0xff] %v4152_v22  ;;  %v843_v28 = vrot.slane %v556_v16, 1 }
  0x98   : > { %2062 = vmatpush2.msra.mxu0 %v671_v15  ;;  %2283 = vmatpush2.msra.mxu1 %v705_v43  ;;  %v986_v15 = vrot.slane %v572_v46, 2  ;;  %v401_v43 = vmax.f32 %v369_v6, 0.0  ;;  %v4180_v46 = vsel %vm787_vm1, %v839_v29, %v841_v61  ;;  %v372_v6 = vadd.f32 %v4188_v37, %v333_v40  ;;  %v703_v61 = vld [vmem:[%s5106_s3 + $0x3e0] sm:$0xff] }
  0x99   : > { %1733 = vmatmul.mubr.f32.gmra.mxu0 %v4038_v63  ;;  %1958 = vmatmul.mubr.f32.gmra.mxu1 %v4129_v49  ;;  %v332_v49 = vmul.f32 %v4159_v56, %v293_v48  ;;  %5214 = vst [vmem:[#allocation31_spill] sm:$0xff] %v4180_v46  ;;  %v844_v63 = vrot.slane %v4152_v22, 1  ;;  %v296_v48 = vld [vmem:[%s3463_s26 + $0xd8] sm:$0xff]  ;;  %v988_v40 = vrot.slane %v556_v16, 2 }
  0x9a   : > { %1737 = vmatprep.mubr.f32.mxu0 %v4146_v27  ;;  %3011 = vmatprep.mubr.msk.f32.mxu1 %vm3591_vm3, %v4140_v59  ;;  %v573_v27 = vsel %vm444_vm0, %v478_v12, 0.0  ;;  %v4196_v29 = vsel %vm932_vm2, %v984_v5, %v986_v15  ;;  %v669_v12 = vld [vmem:[%s5106_s3 + $0x2d0] sm:$0xff]  ;;  %v4207_v44 = vrot.slane %v401_v43, 7  ;;  %v404_v43 = vmax.f32 %v372_v6, 0.0 }
  0x9b   : > { %2063 = vmatprep.subr.mxu0 %v5195_v47  ;;  %2284 = vmatprep.subr.mxu1 %v5195_v47  ;;  %5215 = vst [vmem:[#allocation32_spill] sm:$0xff] %v4196_v29  ;;  %v371_v5 = vadd.f32 %v4188_v37, %v332_v49  ;;  %v295_v15 = vld [vmem:[%s3463_s26 + $0xd0] sm:$0xff]  ;;  %v335_v49 = vmul.f32 %v4159_v56, %v296_v48 }
  0x9c   : > { %2064 = vmatpush2.msra.mxu0 %v670_v26  ;;  %2285 = vmatpush2.msra.mxu1 %v704_v3  ;;  %5216 = vst [vmem:[#allocation33_spill] sm:$0xff] %v4207_v44  ;;  %v989_v26 = vrot.slane %v4152_v22, 2  ;;  %v4214_v3 = vsel %vm787_vm1, %v843_v28, %v844_v63  ;;  %v557_v16 = vsel %vm444_vm0, 0.0, %v4207_v44  ;;  %v668_v28 = vld [vmem:[%s5106_s3 + $0x2c8] sm:$0xff]  ;;  %v484_v2 = vrot.slane %v404_v43, 7 }
  0x9d   : > { %2979 = vmatmul.mubr.msk.f32.gmra.mxu0 %vm3591_vm3, %v4083_v58  ;;  %1963 = vmatmul.mubr.f32.gmra.mxu1 %v4175_v38  ;;  %5217 = vst [vmem:[#allocation34_spill] sm:$0xff] %v4214_v3  ;;  %v846_v38 = vrot.slane %v573_v27, 1  ;;  %v702_v58 = vld [vmem:[%s5106_s3 + $0x3d8] sm:$0xff]  ;;  %v403_v48 = vmax.f32 %v371_v5, 0.0  ;;  %v993_v43 = vrot.slane %v557_v16, 2 }
  0x9e   : > { %1742 = vmatprep.mubr.f32.mxu0 %v4180_v46  ;;  %1967 = vmatprep.mubr.f32.mxu1 %v4152_v22  ;;  %v4219_v46 = vsel %vm444_vm0, %v4207_v44, %v481_v39  ;;  %v4238_v6 = vsel %vm932_vm2, %v988_v40, %v989_v26  ;;  %v374_v40 = vadd.f32 %v4188_v37, %v335_v49 }
  0x9f   : > { %2065 = vmatprep.subr.mxu0 %v5195_v47  ;;  %2286 = vmatprep.subr.mxu1 %v5195_v47  ;;  %5218 = vst [vmem:[#allocation35_spill] sm:$0xff] %v4219_v46  ;;  %5219 = vst [vmem:[#allocation36_spill] sm:$0xff] %v4238_v6  ;;  %v4265_v5 = vrot.slane %v403_v48, 7  ;;  %v994_v49 = vrot.slane %v4219_v46, 2 }
  0xa0   : > { %2066 = vmatpush2.msra.mxu0 %v669_v12  ;;  %2287 = vmatpush2.msra.mxu1 %v703_v61  ;;  %v334_v12 = vmul.f32 %v4159_v56, %v295_v15  ;;  %v991_v61 = vrot.slane %v573_v27, 2  ;;  %v4242_v15 = vsel %vm787_vm1, %v844_v63, %v846_v38  ;;  %v667_v63 = vld [vmem:[%s5106_s3 + $0x2c0] sm:$0xff] }
  0xa1   : > { %1743 = vmatmul.mubr.f32.gmra.mxu0 %v4095_v13  ;;  %1968 = vmatmul.mubr.f32.gmra.mxu1 %v4196_v29  ;;  %5220 = vst [vmem:[#allocation37_spill] sm:$0xff] %v4242_v15  ;;  %v848_v29 = vrot.slane %v557_v16, 1  ;;  %v849_v13 = vrot.slane %v4219_v46, 1  ;;  %v406_v16 = vmax.f32 %v374_v40, 0.0  ;;  %v4294_v40 = vsel %vm932_vm2, %v993_v43, %v994_v49 }
  0xa2   : > { %1747 = vmatprep.mubr.f32.mxu0 %v4214_v3  ;;  %3013 = vmatprep.mubr.msk.f32.mxu1 %vm3591_vm3, %v4207_v44  ;;  %v574_v3 = vsel %vm444_vm0, %v481_v39, 0.0  ;;  %v373_v27 = vadd.f32 %v4188_v37, %v334_v12  ;;  %v701_v39 = vld [vmem:[%s5106_s3 + $0x3d0] sm:$0xff]  ;;  %v4263_v38 = vsel %vm932_vm2, %v989_v26, %v991_v61  ;;  %v558_v26 = vsel %vm444_vm0, 0.0, %v4265_v5  ;;  %5223 = vst [vmem:[#allocation40_spill] sm:$0xff] %v4294_v40 }
  0xa3   : > { %2067 = vmatprep.subr.mxu0 %v5195_v47  ;;  %2288 = vmatprep.subr.mxu1 %v5195_v47  ;;  %5221 = vst [vmem:[#allocation38_spill] sm:$0xff] %v4263_v38  ;;  %v851_v12 = vrot.slane %v574_v3, 1 }
  0xa4   : > { %2068 = vmatpush2.msra.mxu0 %v668_v28  ;;  %2289 = vmatpush2.msra.mxu1 %v702_v58  ;;  %v298_v58 = vld [vmem:[%s3463_s26 + $0xe8] sm:$0xff]  ;;  %v4270_v28 = vsel %vm787_vm1, %v848_v29, %v849_v13  ;;  %v666_v29 = vld [vmem:[%s5106_s3 + $0x2b8] sm:$0xff]  ;;  %v405_v48 = vmax.f32 %v373_v27, 0.0 }
  0xa5   : > { %2981 = vmatmul.mubr.msk.f32.gmra.mxu0 %vm3591_vm3, %v4140_v59  ;;  %1973 = vmatmul.mubr.f32.gmra.mxu1 %v4238_v6  ;;  %5222 = vst [vmem:[#allocation39_spill] sm:$0xff] %v4270_v28  ;;  %v297_v6 = vld [vmem:[%s3463_s26 + $0xe0] sm:$0xff]  ;;  %v337_v61 = vmul.f32 %v4159_v56, %v298_v58  ;;  %v4299_v27 = vsel %vm787_vm1, %v849_v13, %v851_v12  ;;  %v487_v59 = vrot.slane %v406_v16, 7  ;;  %v665_v13 = vld [vmem:[%s5106_s3 + $0x2b0] sm:$0xff]  ;;  %v998_v12 = vrot.slane %v558_v26, 2 }
  0xa6   : > { %1752 = vmatprep.mubr.f32.mxu0 %v4242_v15  ;;  %1977 = vmatprep.mubr.f32.mxu1 %v4219_v46  ;;  %v4276_v15 = vsel %vm444_vm0, %v4265_v5, %v484_v2  ;;  %v336_v58 = vmul.f32 %v4159_v56, %v297_v6  ;;  %5224 = vst [vmem:[#allocation41_spill] sm:$0xff] %v4299_v27 }
  0xa7   : > { %2069 = vmatprep.subr.mxu0 %v5195_v47  ;;  %2290 = vmatprep.subr.mxu1 %v5195_v47  ;;  %v376_v43 = vadd.f32 %v4188_v37, %v337_v61  ;;  %v999_v16 = vrot.slane %v4276_v15, 2 }
  0xa8   : > { %2070 = vmatpush2.msra.mxu0 %v667_v63  ;;  %2291 = vmatpush2.msra.mxu1 %v701_v39  ;;  %v700_v63 = vld [vmem:[%s5106_s3 + $0x3c8] sm:$0xff]  ;;  %v996_v39 = vrot.slane %v574_v3, 2  ;;  %v4312_v3 = vrot.slane %v405_v48, 7  ;;  %v375_v61 = vadd.f32 %v4188_v37, %v336_v58  ;;  %v698_v58 = vld [vmem:[%s5106_s3 + $0x3b8] sm:$0xff] }
  0xa9   : > { %1753 = vmatmul.mubr.f32.gmra.mxu0 %v4152_v22  ;;  %1978 = vmatmul.mubr.f32.gmra.mxu1 %v4263_v38  ;;  %v853_v38 = vrot.slane %v558_v26, 1  ;;  %v854_v22 = vrot.slane %v4276_v15, 1 }
  0xaa   : > { %1757 = vmatprep.mubr.f32.mxu0 %v4270_v28  ;;  %3015 = vmatprep.mubr.msk.f32.mxu1 %vm3591_vm3, %v4265_v5  ;;  %v575_v28 = vsel %vm444_vm0, %v484_v2, 0.0  ;;  %v699_v2 = vld [vmem:[%s5106_s3 + $0x3c0] sm:$0xff]  ;;  %v4320_v6 = vsel %vm932_vm2, %v994_v49, %v996_v39  ;;  %v4332_v49 = vsel %vm444_vm0, %v4312_v3, %v487_v59  ;;  %v559_v26 = vsel %vm444_vm0, 0.0, %v4312_v3 }
  0xab   : > { %2071 = vmatprep.subr.mxu0 %v5195_v47  ;;  %2292 = vmatprep.subr.mxu1 %v5195_v47  ;;  %5225 = vst [vmem:[#allocation42_spill] sm:$0xff] %v4320_v6  ;;  %v856_v48 = vrot.slane %v575_v28, 1  ;;  %v408_v39 = vmax.f32 %v376_v43, 0.0  ;;  %v4350_v43 = vsel %vm932_vm2, %v998_v12, %v999_v16 }
  0xac   : > { %2072 = vmatpush2.msra.mxu0 %v666_v29  ;;  %2293 = vmatpush2.msra.mxu1 %v700_v63  ;;  %v4326_v29 = vsel %vm787_vm1, %v853_v38, %v854_v22  ;;  %v299_v63 = vld [vmem:[%s3463_s26 + $0xf0] sm:$0xff]  ;;  %v664_v38 = vld [vmem:[%s5106_s3 + $0x2a8] sm:$0xff] }
  0xad   : > { %2983 = vmatmul.mubr.msk.f32.gmra.mxu0 %vm3591_vm3, %v4207_v44  ;;  %1983 = vmatmul.mubr.f32.gmra.mxu1 %v4294_v40  ;;  %5226 = vst [vmem:[#allocation43_spill] sm:$0xff] %v4326_v29  ;;  %v338_v40 = vmul.f32 %v4159_v56, %v299_v63  ;;  %v859_v44 = vrot.slane %v4332_v49, 1  ;;  %v490_v12 = vrot.slane %v408_v39, 7  ;;  %v1004_v63 = vrot.slane %v4332_v49, 2 }
  0xae   : > { %1762 = vmatprep.mubr.f32.mxu0 %v4299_v27  ;;  %1987 = vmatprep.mubr.f32.mxu1 %v4276_v15  ;;  %v858_v27 = vrot.slane %v559_v26, 1 }
  0xaf   : > { %2073 = vmatprep.subr.mxu0 %v5195_v47  ;;  %2294 = vmatprep.subr.mxu1 %v5195_v47  ;;  %v377_v39 = vadd.f32 %v4188_v37, %v338_v40  ;;  %v662_v40 = vld [vmem:[%s5106_s3 + $0x298] sm:$0xff] }
  0xb0   : > { %2074 = vmatpush2.msra.mxu0 %v665_v13  ;;  %2295 = vmatpush2.msra.mxu1 %v699_v2  ;;  %v300_v13 = vld [vmem:[%s3463_s26 + $0xf8] sm:$0xff]  ;;  %v1001_v2 = vrot.slane %v575_v28, 2  ;;  %s268_s26 = scalar_lea.vmem %s5109_s6, %s5287_s22 }
  0xb1   : > { %1763 = vmatmul.mubr.f32.gmra.mxu0 %v4219_v46  ;;  %1988 = vmatmul.mubr.f32.gmra.mxu1 %v4320_v6  ;;  %v407_v6 = vmax.f32 %v375_v61, 0.0  ;;  %v4355_v46 = vsel %vm787_vm1, %v854_v22, %v856_v48  ;;  %v339_v28 = vmul.f32 %v4159_v56, %v300_v13  ;;  %v663_v22 = vld [vmem:[%s5106_s3 + $0x2a0] sm:$0xff]  ;;  %v1003_v61 = vrot.slane %v559_v26, 2  ;;  %v697_v48 = vld [vmem:[%s5106_s3 + $0x3b0] sm:$0xff] }
  0xb2   : > { %1767 = vmatprep.mubr.f32.mxu0 %v4326_v29  ;;  %3017 = vmatprep.mubr.msk.f32.mxu1 %vm3591_vm3, %v4312_v3  ;;  %v576_v29 = vsel %vm444_vm0, %v487_v59, 0.0  ;;  %v4374_v59 = vsel %vm932_vm2, %v999_v16, %v1001_v2  ;;  %v4382_v26 = vsel %vm787_vm1, %v858_v27, %v859_v44  ;;  %v696_v27 = vld [vmem:[%s5106_s3 + $0x3a8] sm:$0xff]  ;;  %v409_v2 = vmax.f32 %v377_v39, 0.0 }
  0xb3   : > { %2075 = vmatprep.subr.mxu0 %v5195_v47  ;;  %2296 = vmatprep.subr.mxu1 %v5195_v47  ;;  %5227 = vst [vmem:[#allocation44_spill] sm:$0xff] %v4374_v59  ;;  %v4376_v56 = vrot.slane %v407_v6, 7  ;;  %5228 = vst [vmem:[#allocation45_spill] sm:$0xff] %v4382_v26  ;;  %v378_v16 = vadd.f32 %v4188_v37, %v339_v28  ;;  %v4405_v37 = vsel %vm932_vm2, %v1003_v61, %v1004_v63 }
  0xb4   : > { %2076 = vmatpush2.msra.mxu0 %v664_v38  ;;  %2297 = vmatpush2.msra.mxu1 %v698_v58  ;;  %v861_v38 = vrot.slane %v576_v29, 1  ;;  %v1006_v13 = vrot.slane %v576_v29, 2  ;;  %v695_v29 = vld [vmem:[%s5106_s3 + $0x3a0] sm:$0xff]  ;;  %v4429_v61 = vrot.slane %v409_v2, 7 }
  0xb5   : > { %2985 = vmatmul.mubr.msk.f32.gmra.mxu0 %vm3591_vm3, %v4265_v5  ;;  %1993 = vmatmul.mubr.f32.gmra.mxu1 %v4350_v43  ;;  %v4387_v58 = vsel %vm444_vm0, %v4376_v56, %v490_v12  ;;  %v560_v6 = vsel %vm444_vm0, 0.0, %v4376_v56 }
  0xb6   : > { %1772 = vmatprep.mubr.f32.mxu0 %v4355_v46  ;;  %1997 = vmatprep.mubr.f32.mxu1 %v4332_v49  ;;  %v4409_v28 = vsel %vm787_vm1, %v859_v44, %v861_v38  ;;  %v661_v44 = vld [vmem:[%s5106_s3 + $0x290] sm:$0xff]  ;;  %v1008_v39 = vrot.slane %v560_v6, 2  ;;  %v1009_v38 = vrot.slane %v4387_v58, 2 }
  0xb7   : > { %2077 = vmatprep.subr.mxu0 %v5195_v47  ;;  %2298 = vmatprep.subr.mxu1 %v5195_v47 }
  0xb8   : > { %2078 = vmatpush2.msra.mxu0 %v663_v22  ;;  %2299 = vmatpush2.msra.mxu1 %v697_v48  ;;  %v863_v22 = vrot.slane %v560_v6, 1  ;;  %v864_v48 = vrot.slane %v4387_v58, 1  ;;  %v694_v6 = vld [vmem:[%s5106_s3 + $0x398] sm:$0xff] }
  0xb9   : > { %1773 = vmatmul.mubr.f32.gmra.mxu0 %v4276_v15  ;;  %1998 = vmatmul.mubr.f32.gmra.mxu1 %v4374_v59  ;;  %v577_v59 = vsel %vm444_vm0, %v490_v12, 0.0  ;;  %v4427_v12 = vsel %vm932_vm2, %v1004_v63, %v1006_v13  ;;  %v660_v63 = vld [vmem:[%s5106_s3 + $0x288] sm:$0xff] }
  0xba   : > { %1777 = vmatprep.mubr.f32.mxu0 %v4382_v26  ;;  %3019 = vmatprep.mubr.msk.f32.mxu1 %vm3591_vm3, %v4376_v56  ;;  %v410_v26 = vmax.f32 %v378_v16, 0.0  ;;  %v4435_v16 = vsel %vm787_vm1, %v863_v22, %v864_v48  ;;  %v1011_v13 = vrot.slane %v577_v59, 2 }
  0xbb   : > { %2079 = vmatprep.subr.mxu0 %v5195_v47  ;;  %2300 = vmatprep.subr.mxu1 %v5195_v47 }
  0xbc   : > { %2080 = vmatpush2.msra.mxu0 %v662_v40  ;;  %2301 = vmatpush2.msra.mxu1 %v696_v27  ;;  %v866_v40 = vrot.slane %v577_v59, 1  ;;  %v4437_v27 = vrot.slane %v410_v26, 7  ;;  %v4452_v26 = vsel %vm932_vm2, %v1008_v39, %v1009_v38  ;;  %v4474_v59 = vsel %vm932_vm2, %v1009_v38, %v1011_v13  ;;  %v691_v39 = vld [vmem:[%s5106_s3 + $0x380] sm:$0xff]  ;;  %v722_v38 = vld [vmem:[%s5106_s3 + $0x478] sm:$0xff]  ;;  %v5244_v13 = vld [vmem:[#allocation24_spill] sm:$0xff] }
  0xbd   : > { %2987 = vmatmul.mubr.msk.f32.gmra.mxu0 %vm3591_vm3, %v4312_v3  ;;  %2003 = vmatmul.mubr.f32.gmra.mxu1 %v4405_v37 }
  0xbe   : > { %1782 = vmatprep.mubr.f32.mxu0 %v4409_v28  ;;  %2007 = vmatprep.mubr.f32.mxu1 %v4387_v58  ;;  %v4457_v2 = vsel %vm787_vm1, %v864_v48, %v866_v40  ;;  %v4462_v22 = vsel %vm444_vm0, %v4429_v61, %v4437_v27  ;;  %v659_v48 = vld [vmem:[%s5106_s3 + $0x280] sm:$0xff]  ;;  %v721_v40 = vld [vmem:[%s5106_s3 + $0x470] sm:$0xff] }
  0xbf   : > { %2081 = vmatprep.subr.mxu0 %v5195_v47  ;;  %2302 = vmatprep.subr.mxu1 %v5195_v47 }
  0xc0   : > { %2082 = vmatpush2.msra.mxu0 %v661_v44  ;;  %2303 = vmatpush2.msra.mxu1 %v695_v29  ;;  %v693_v44 = vld [vmem:[%s5106_s3 + $0x390] sm:$0xff]  ;;  %v692_v29 = vld [vmem:[%s5106_s3 + $0x388] sm:$0xff] }
  0xc1   : > { %1783 = vmatmul.mubr.f32.gmra.mxu0 %v4332_v49  ;;  %2008 = vmatmul.mubr.f32.gmra.mxu1 %v4427_v12 }
  0xc2   : > { %1787 = vmatprep.mubr.f32.mxu0 %v4435_v16  ;;  %3021 = vmatprep.mubr.msk.f32.mxu1 %vm3591_vm3, %v4429_v61 }
  0xc3   : > { %2083 = vmatprep.subr.mxu0 %v5195_v47  ;;  %2304 = vmatprep.subr.mxu1 %v5195_v47 }
  0xc4   : > { %2084 = vmatpush2.msra.mxu0 %v660_v63  ;;  %2305 = vmatpush2.msra.mxu1 %v694_v6  ;;  %v5242_v63 = vld [vmem:[#allocation25_spill] sm:$0xff] }
  0xc5   : > { %2989 = vmatmul.mubr.msk.f32.gmra.mxu0 %vm3591_vm3, %v4376_v56  ;;  %2013 = vmatmul.mubr.f32.gmra.mxu1 %v4452_v26  ;;  %v5243_v6 = vld [vmem:[#allocation17_spill] sm:$0xff] }
  0xc6   : > { %2306 = vmatprep.subr.mxu1 %v5195_v47  ;;  %1792 = vmatprep.mubr.f32.mxu0 %v4457_v2 }
  0xc7   : > { %2017 = vmatprep.mubr.f32.mxu1 %v4462_v22  ;;  %2307 = vmatpush2.msra.mxu1 %v693_v44  ;;  %v5245_v44 = vld [vmem:[#allocation28_spill] sm:$0xff] }
  0xc8   : > { %2085 = vmatprep.subr.mxu0 %v5195_v47  ;;  %2308 = vmatprep.subr.mxu1 %v5195_v47 }
  0xc9   : > { %1793 = vmatmul.mubr.f32.gmra.mxu0 %v4387_v58  ;;  %2018 = vmatmul.mubr.f32.gmra.mxu1 %v4474_v59 }
  0xca   : > { %2086 = vmatpush2.msra.mxu0 %v659_v48  ;;  %2309 = vmatpush2.msra.mxu1 %v692_v29 }
  0xcb   : > { %2310 = vmatprep.subr.mxu1 %v5195_v47  ;;  %2087 = vmatprep.mubr.f32.mxu0 %v3656_v4  ;;  %v720_v47 = vld [vmem:[%s5106_s3 + $0x468] sm:$0xff] }
  0xcc   : > { %2311 = vmatpush2.msra.mxu1 %v691_v39  ;;  %2312 = vmatprep.mubr.f32.mxu1 %v3690_v21  ;;  %v716_v4 = vld [vmem:[%s5106_s3 + $0x448] sm:$0xff]  ;;  %v5246_v39 = vld [vmem:[#allocation21_spill] sm:$0xff] }
  0xcd   : > { %2088 = vmatmul.mubr.f32.vlgmr.msra.gmra.mxu0 %v3634_v57  ;;  %3023 = vmatmul.mubr.msk.f32.vlgmr.msra.gmra.mxu1 %vm3591_vm3, %v3624_v50  ;;  %v719_v50 = vld [vmem:[%s5106_s3 + $0x460] sm:$0xff]  ;;  %v718_v57 = vld [vmem:[%s5106_s3 + $0x458] sm:$0xff] }
  0xce   : > { %3102 = vmatprep.subr.mxu0 %v722_v38  ;;  %2092 = vmatprep.mubr.f32.mxu0 %v3683_v17  ;;  %v714_v17 = vld [vmem:[%s5106_s3 + $0x438] sm:$0xff] }
  0xcf   : > { %3103 = vmatpush3.msra.mxu0 %v722_v38  ;;  %2317 = vmatprep.mubr.f32.mxu1 %v3719_v36 }
  0xd0   : > { %3104 = vmatprep.subr.mxu0 %v721_v40  ;;  %3182 = vmatprep.subr.mxu1 %v722_v38 }
  0xd1   : > { %2093 = vmatmul.mubr.f32.gmra.mxu0 %v3663_v7  ;;  %2318 = vmatmul.mubr.f32.gmra.mxu1 %v3639_v60  ;;  %v717_v60 = vld [vmem:[%s5106_s3 + $0x450] sm:$0xff]  ;;  %v715_v7 = vld [vmem:[%s5106_s3 + $0x440] sm:$0xff] }
  0xd2   : > { %2097 = vmatprep.mubr.f32.mxu0 %v3714_v32  ;;  %2322 = vmatprep.mubr.f32.mxu1 %v3747_v55 }
  0xd3   : > { %3105 = vmatpush3.msra.mxu0 %v721_v40  ;;  %3198 = vmatpush3.msra.mxu1 %v722_v38 }
  0xd4   : > { %3106 = vmatprep.subr.mxu0 %v720_v47  ;;  %3183 = vmatprep.subr.mxu1 %v721_v40 }
  0xd5   : > { %2098 = vmatmul.mubr.f32.gmra.mxu0 %v3690_v21  ;;  %3025 = vmatmul.mubr.msk.f32.gmra.mxu1 %vm3591_vm3, %v3685_v18  ;;  %v713_v18 = vld [vmem:[%s5106_s3 + $0x430] sm:$0xff]  ;;  %v712_v21 = vld [vmem:[%s5106_s3 + $0x428] sm:$0xff] }
  0xd6   : > { %2102 = vmatprep.mubr.f32.mxu0 %v3739_v51  ;;  %2327 = vmatprep.mubr.f32.mxu1 %v3776_v11 }
  0xd7   : > { %3107 = vmatpush3.msra.mxu0 %v720_v47  ;;  %3199 = vmatpush3.msra.mxu1 %v721_v40  ;;  %v5247_v40 = vld [vmem:[#allocation26_spill] sm:$0xff] }
  0xd8   : > { %3108 = vmatprep.subr.mxu0 %v719_v50  ;;  %3184 = vmatprep.subr.mxu1 %v720_v47 }
  0xd9   : > { %2103 = vmatmul.mubr.f32.gmra.mxu0 %v3719_v36  ;;  %2328 = vmatmul.mubr.f32.gmra.mxu1 %v3696_v24  ;;  %v711_v24 = vld [vmem:[%s5106_s3 + $0x420] sm:$0xff]  ;;  %v5229_v36 = vld [vmem:[#allocation9_spill] sm:$0xff] }
  0xda   : > { %2107 = vmatprep.mubr.f32.mxu0 %v3771_v8  ;;  %2332 = vmatprep.mubr.f32.mxu1 %v3804_v31 }
  0xdb   : > { %3109 = vmatpush3.msra.mxu0 %v719_v50  ;;  %3200 = vmatpush3.msra.mxu1 %v720_v47  ;;  %v5248_v47 = vld [vmem:[#allocation31_spill] sm:$0xff] }
  0xdc   : > { %3110 = vmatprep.subr.mxu0 %v718_v57  ;;  %3185 = vmatprep.subr.mxu1 %v719_v50 }
  0xdd   : > { %2108 = vmatmul.mubr.f32.gmra.mxu0 %v3747_v55  ;;  %3027 = vmatmul.mubr.msk.f32.gmra.mxu1 %vm3591_vm3, %v3741_v52  ;;  %v5230_v52 = vld [vmem:[#allocation13_spill] sm:$0xff]  ;;  %v5231_v55 = vld [vmem:[#allocation8_spill] sm:$0xff] }
  0xde   : > { %2112 = vmatprep.mubr.f32.mxu0 %v3787_v19  ;;  %2337 = vmatprep.mubr.f32.mxu1 %v3833_v53 }
  0xdf   : > { %3111 = vmatpush3.msra.mxu0 %v718_v57  ;;  %3201 = vmatpush3.msra.mxu1 %v719_v50 }
  0xe0   : > { %3112 = vmatprep.subr.mxu0 %v717_v60  ;;  %3186 = vmatprep.subr.mxu1 %v718_v57 }
  0xe1   : > { %2113 = vmatmul.mubr.f32.gmra.mxu0 %v3776_v11  ;;  %2338 = vmatmul.mubr.f32.gmra.mxu1 %v3753_v62  ;;  %v710_v62 = vld [vmem:[%s5106_s3 + $0x418] sm:$0xff]  ;;  %v5232_v11 = vld [vmem:[#allocation12_spill] sm:$0xff] }
  0xe2   : > { %2117 = vmatprep.mubr.f32.mxu0 %v3828_v45  ;;  %2342 = vmatprep.mubr.f32.mxu1 %v3861_v14 }
  0xe3   : > { %3113 = vmatpush3.msra.mxu0 %v717_v60  ;;  %3202 = vmatpush3.msra.mxu1 %v718_v57 }
  0xe4   : > { %3114 = vmatprep.subr.mxu0 %v716_v4  ;;  %3187 = vmatprep.subr.mxu1 %v717_v60 }
  0xe5   : > { %2118 = vmatmul.mubr.f32.gmra.mxu0 %v3804_v31  ;;  %3029 = vmatmul.mubr.msk.f32.gmra.mxu1 %vm3591_vm3, %v3798_v25  ;;  %v5233_v25 = vld [vmem:[#allocation16_spill] sm:$0xff]  ;;  %v5234_v31 = vld [vmem:[#allocation10_spill] sm:$0xff] }
  0xe6   : > { %2122 = vmatprep.mubr.f32.mxu0 %v3844_v1  ;;  %2347 = vmatprep.mubr.f32.mxu1 %v3890_v41 }
  0xe7   : > { %3115 = vmatpush3.msra.mxu0 %v716_v4  ;;  %3203 = vmatpush3.msra.mxu1 %v717_v60 }
  0xe8   : > { %3116 = vmatprep.subr.mxu0 %v715_v7  ;;  %3188 = vmatprep.subr.mxu1 %v716_v4 }
  0xe9   : > { %2123 = vmatmul.mubr.f32.gmra.mxu0 %v3833_v53  ;;  %2348 = vmatmul.mubr.f32.gmra.mxu1 %v3810_v34  ;;  %v709_v34 = vld [vmem:[%s5106_s3 + $0x410] sm:$0xff]  ;;  %v5235_v53 = vld [vmem:[#allocation14_spill] sm:$0xff] }
  0xea   : > { %2127 = vmatprep.mubr.f32.mxu0 %v3885_v33  ;;  %2352 = vmatprep.mubr.f32.mxu1 %v3918_v10 }
  0xeb   : > { %3117 = vmatpush3.msra.mxu0 %v715_v7  ;;  %3204 = vmatpush3.msra.mxu1 %v716_v4 }
  0xec   : > { %3118 = vmatprep.subr.mxu0 %v714_v17  ;;  %3189 = vmatprep.subr.mxu1 %v715_v7 }
  0xed   : > { %2128 = vmatmul.mubr.f32.gmra.mxu0 %v3861_v14  ;;  %3031 = vmatmul.mubr.msk.f32.gmra.mxu1 %vm3591_vm3, %v3855_v9  ;;  %v5236_v9 = vld [vmem:[#allocation19_spill] sm:$0xff] }
  0xee   : > { %2132 = vmatprep.mubr.f32.mxu0 %v3901_v54  ;;  %2357 = vmatprep.mubr.f32.mxu1 %v3947_v42  ;;  %v5237_v14 = vld [vmem:[#allocation11_spill] sm:$0xff] }
  0xef   : > { %3119 = vmatpush3.msra.mxu0 %v714_v17  ;;  %3205 = vmatpush3.msra.mxu1 %v715_v7  ;;  %v5249_v7 = vld [vmem:[#allocation23_spill] sm:$0xff] }
  0xf0   : > { %3120 = vmatprep.subr.mxu0 %v713_v18  ;;  %3190 = vmatprep.subr.mxu1 %v714_v17 }
  0xf1   : > { %2133 = vmatmul.mubr.f32.gmra.mxu0 %v3890_v41  ;;  %2358 = vmatmul.mubr.f32.gmra.mxu1 %v3867_v20  ;;  %v708_v20 = vld [vmem:[%s5106_s3 + $0x408] sm:$0xff]  ;;  %v5238_v41 = vld [vmem:[#allocation18_spill] sm:$0xff] }
  0xf2   : > { %2137 = vmatprep.mubr.f32.mxu0 %v3942_v30  ;;  %2362 = vmatprep.mubr.f32.mxu1 %v3975_v23 }
  0xf3   : > { %3121 = vmatpush3.msra.mxu0 %v713_v18  ;;  %3206 = vmatpush3.msra.mxu1 %v714_v17 }
  0xf4   : > { %3122 = vmatprep.subr.mxu0 %v712_v21  ;;  %3191 = vmatprep.subr.mxu1 %v713_v18 }
  0xf5   : > { %2138 = vmatmul.mubr.f32.gmra.mxu0 %v3918_v10  ;;  %3033 = vmatmul.mubr.msk.f32.gmra.mxu1 %vm3591_vm3, %v3912_v0  ;;  %v5239_v0 = vld [vmem:[#allocation22_spill] sm:$0xff]  ;;  %v5240_v10 = vld [vmem:[#allocation15_spill] sm:$0xff] }
  0xf6   : > { %2142 = vmatprep.mubr.f32.mxu0 %v5229_v36  ;;  %2367 = vmatprep.mubr.f32.mxu1 %v5230_v52 }
  0xf7   : > { %3123 = vmatpush3.msra.mxu0 %v712_v21  ;;  %3207 = vmatpush3.msra.mxu1 %v713_v18  ;;  %v5250_v18 = vld [vmem:[#allocation30_spill] sm:$0xff] }
  0xf8   : > { %3124 = vmatprep.subr.mxu0 %v711_v24  ;;  %3192 = vmatprep.subr.mxu1 %v712_v21 }
  0xf9   : > { %2143 = vmatmul.mubr.f32.gmra.mxu0 %v3947_v42  ;;  %2368 = vmatmul.mubr.f32.gmra.mxu1 %v5231_v55  ;;  %v707_v42 = vld [vmem:[%s5106_s3 + $0x400] sm:$0xff] }
  0xfa   : > { %2147 = vmatprep.mubr.f32.mxu0 %v5232_v11  ;;  %2372 = vmatprep.mubr.f32.mxu1 %v5233_v25 }
  0xfb   : > { %3125 = vmatpush3.msra.mxu0 %v711_v24  ;;  %3208 = vmatpush3.msra.mxu1 %v712_v21  ;;  %v5251_v21 = vld [vmem:[#allocation34_spill] sm:$0xff] }
  0xfc   : > { %3126 = vmatprep.subr.mxu0 %v710_v62  ;;  %3193 = vmatprep.subr.mxu1 %v711_v24 }
  0xfd   : > { %2148 = vmatmul.mubr.f32.gmra.mxu0 %v3975_v23  ;;  %3035 = vmatmul.mubr.msk.f32.gmra.mxu1 %vm3591_vm3, %v5234_v31  ;;  %v5241_v23 = vld [vmem:[#allocation20_spill] sm:$0xff] }
  0xfe   : > { %2152 = vmatprep.mubr.f32.mxu0 %v5235_v53  ;;  %2377 = vmatprep.mubr.f32.mxu1 %v5236_v9 }
  0xff   : > { %3127 = vmatpush3.msra.mxu0 %v710_v62  ;;  %3209 = vmatpush3.msra.mxu1 %v711_v24 }
 0x100   : > { %3128 = vmatprep.subr.mxu0 %v709_v34  ;;  %3194 = vmatprep.subr.mxu1 %v710_v62 }
 0x101   : > { %2153 = vmatmul.mubr.f32.gmra.mxu0 %v5230_v52  ;;  %2378 = vmatmul.mubr.f32.gmra.mxu1 %v5237_v14 }
 0x102   : > { %2157 = vmatprep.mubr.f32.mxu0 %v5238_v41  ;;  %2382 = vmatprep.mubr.f32.mxu1 %v5239_v0 }
 0x103   : > { %3129 = vmatpush3.msra.mxu0 %v709_v34  ;;  %3210 = vmatpush3.msra.mxu1 %v710_v62 }
 0x104   : > { %3130 = vmatprep.subr.mxu0 %v708_v20  ;;  %3195 = vmatprep.subr.mxu1 %v709_v34 }
 0x105   : > { %2158 = vmatmul.mubr.f32.gmra.mxu0 %v5233_v25  ;;  %3037 = vmatmul.mubr.msk.f32.gmra.mxu1 %vm3591_vm3, %v5240_v10  ;;  %v5252_v25 = vld [vmem:[#allocation27_spill] sm:$0xff] }
 0x106   : > { %2162 = vmatprep.mubr.f32.mxu0 %v5241_v23  ;;  %2387 = vmatprep.mubr.f32.mxu1 %v5242_v63 }
 0x107   : > { %3131 = vmatpush3.msra.mxu0 %v708_v20  ;;  %3211 = vmatpush3.msra.mxu1 %v709_v34  ;;  %v5253_v34 = vld [vmem:[#allocation32_spill] sm:$0xff] }
 0x108   : > { %3132 = vmatprep.subr.mxu0 %v707_v42  ;;  %3196 = vmatprep.subr.mxu1 %v708_v20 }
 0x109   : > { %2163 = vmatmul.mubr.f32.gmra.mxu0 %v5236_v9  ;;  %2388 = vmatmul.mubr.f32.gmra.mxu1 %v5243_v6  ;;  %v5254_v9 = vld [vmem:[#allocation37_spill] sm:$0xff]  ;;  %v5256_v6 = vld [vmem:[#allocation36_spill] sm:$0xff] }
 0x10a   : > { %2167 = vmatprep.mubr.f32.mxu0 %v5244_v13  ;;  %2392 = vmatprep.mubr.f32.mxu1 %v5245_v44 }
 0x10b   : > { %3133 = vmatpush3.msra.mxu0 %v707_v42  ;;  %3212 = vmatpush3.msra.mxu1 %v708_v20 }
 0x10c   : > { %3197 = vmatprep.subr.mxu1 %v707_v42 }
 0x10d   : > { %v1639_v48 = vpop.f32.mrf.mxu0  ;;  %v1864_v29 = vpop.f32.mrf.mxu1  ;;  %2168 = vmatmul.mubr.f32.gmra.mxu0 %v5239_v0  ;;  %3039 = vmatmul.mubr.msk.f32.gmra.mxu1 %vm3591_vm3, %v5246_v39 }
 0x10e   : > { %v4625_v38 = vadd.f32 %v1864_v29, %v1639_v48  ;;  %2172 = vmatprep.mubr.f32.mxu0 %v5247_v40  ;;  %2397 = vmatprep.mubr.f32.mxu1 %v5248_v47 }
 0x10f   : > { %v1641_v50 = vpop.f32.mrf.mxu0  ;;  %v1866_v57 = vpop.f32.mrf.mxu1  ;;  %3213 = vmatpush3.msra.mxu1 %v707_v42  ;;  %v5255_v42 = vld [vmem:[#allocation29_spill] sm:$0xff] }
 0x110   : > { %v5258_v57 = vld [vmem:[#allocation33_spill] sm:$0xff] }
 0x111   : > { %v1644_v60 = vpop.f32.mrf.mxu0  ;;  %v1869_v4 = vpop.f32.mrf.mxu1  ;;  %2173 = vmatmul.mubr.f32.gmra.mxu0 %v5242_v63  ;;  %2398 = vmatmul.mubr.f32.gmra.mxu1 %v5249_v7 }
 0x112   : > { %v4631_v17 = vadd.f32 %v1869_v4, %v1644_v60  ;;  %2177 = vmatprep.mubr.f32.mxu0 %v5250_v18  ;;  %2402 = vmatprep.mubr.f32.mxu1 %v5251_v21  ;;  %v5260_v4 = vld [vmem:[#allocation41_spill] sm:$0xff] }
 0x113   : > { %v1646_v24 = vpop.f32.mrf.mxu0  ;;  %v1871_v52 = vpop.f32.mrf.mxu1 }
 0x115   : > { %v1649_v55 = vpop.f32.mrf.mxu0  ;;  %v1874_v62 = vpop.f32.mrf.mxu1  ;;  %2178 = vmatmul.mubr.f32.gmra.mxu0 %v5245_v44  ;;  %3041 = vmatmul.mubr.msk.f32.gmra.mxu1 %vm3591_vm3, %v5252_v25  ;;  %v5257_v44 = vld [vmem:[#allocation39_spill] sm:$0xff] }
 0x116   : > { %v4639_v31 = vadd.f32 %v1874_v62, %v1649_v55  ;;  %2182 = vmatprep.mubr.f32.mxu0 %v5253_v34  ;;  %2407 = vmatprep.mubr.f32.mxu1 %v5254_v9  ;;  %v5261_v62 = vld [vmem:[#allocation35_spill] sm:$0xff] }
 0x117   : > { %v1651_v14 = vpop.f32.mrf.mxu0  ;;  %v1876_v20 = vpop.f32.mrf.mxu1 }
 0x118   : > { %v5263_v14 = vld [vmem:[#allocation43_spill] sm:$0xff] }
 0x119   : > { %v1654_v0 = vpop.f32.mrf.mxu0  ;;  %v1879_v10 = vpop.f32.mrf.mxu1  ;;  %2183 = vmatmul.mubr.f32.gmra.mxu0 %v5248_v47  ;;  %2408 = vmatmul.mubr.f32.gmra.mxu1 %v5255_v42  ;;  %v5259_v47 = vld [vmem:[#allocation38_spill] sm:$0xff] }
 0x11a   : > { %v4645_v63 = vadd.f32 %v1879_v10, %v1654_v0  ;;  %2187 = vmatprep.mubr.f32.mxu0 %v5256_v6  ;;  %2412 = vmatprep.mubr.f32.mxu1 %v5257_v44 }
 0x11b   : > { %v1656_v48 = vpop.f32.mrf.mxu0  ;;  %v1881_v29 = vpop.f32.mrf.mxu1 }
 0x11d   : > { %v1659_v39 = vpop.f32.mrf.mxu0  ;;  %v1884_v50 = vpop.f32.mrf.mxu1  ;;  %2188 = vmatmul.mubr.f32.gmra.mxu0 %v5251_v21  ;;  %3043 = vmatmul.mubr.msk.f32.gmra.mxu1 %vm3591_vm3, %v5258_v57  ;;  %v5262_v21 = vld [vmem:[#allocation40_spill] sm:$0xff] }
 0x11e   : > { %v4653_v60 = vadd.f32 %v1884_v50, %v1659_v39  ;;  %2192 = vmatprep.mubr.f32.mxu0 %v5259_v47  ;;  %2417 = vmatprep.mubr.f32.mxu1 %v5260_v4 }
 0x11f   : > { %v1661_v7 = vpop.f32.mrf.mxu0  ;;  %v1886_v24 = vpop.f32.mrf.mxu1 }
 0x121   : > { %v1664_v52 = vpop.f32.mrf.mxu0  ;;  %v1889_v55 = vpop.f32.mrf.mxu1  ;;  %2193 = vmatmul.mubr.f32.gmra.mxu0 %v5254_v9  ;;  %2418 = vmatmul.mubr.f32.gmra.mxu1 %v5261_v62  ;;  %v5264_v9 = vld [vmem:[#allocation42_spill] sm:$0xff] }
 0x122   : > { %v4659_v25 = vadd.f32 %v1889_v55, %v1664_v52  ;;  %2197 = vmatprep.mubr.f32.mxu0 %v5262_v21  ;;  %2422 = vmatprep.mubr.f32.mxu1 %v5263_v14 }
 0x123   : > { %v1666_v20 = vpop.f32.mrf.mxu0  ;;  %v1891_v0 = vpop.f32.mrf.mxu1 }
 0x124   : > { %v561_v0 = vsel %vm444_vm0, 0.0, %v4429_v61 }
 0x125   : > { %v1669_v10 = vpop.f32.mrf.mxu0  ;;  %v1894_v42 = vpop.f32.mrf.mxu1  ;;  %2198 = vmatmul.mubr.f32.gmra.mxu0 %v5257_v44  ;;  %3045 = vmatmul.mubr.msk.f32.gmra.mxu1 %vm3591_vm3, %v4265_v5  ;;  %v5265_v44 = vld [vmem:[#allocation45_spill] sm:$0xff] }
 0x126   : > { %v4667_v48 = vadd.f32 %v1894_v42, %v1669_v10  ;;  %2202 = vmatprep.mubr.f32.mxu0 %v5264_v9  ;;  %2427 = vmatprep.mubr.f32.mxu1 %v4355_v46 }
 0x127   : > { %v1671_v29 = vpop.f32.mrf.mxu0  ;;  %v1896_v39 = vpop.f32.mrf.mxu1 }
 0x128   : > { %v1111_v39 = vrot.slane %v561_v0, 1 }
 0x129   : > { %v1674_v50 = vpop.f32.mrf.mxu0  ;;  %v1899_v57 = vpop.f32.mrf.mxu1  ;;  %2203 = vmatmul.mubr.f32.gmra.mxu0 %v5260_v4  ;;  %2428 = vmatmul.mubr.f32.gmra.mxu1 %v4276_v15  ;;  %v5266_v4 = vld [vmem:[#allocation44_spill] sm:$0xff] }
 0x12a   : > { %v4673_v7 = vadd.f32 %v1899_v57, %v1674_v50  ;;  %2207 = vmatprep.mubr.f32.mxu0 %v4350_v43  ;;  %2432 = vmatprep.mubr.f32.mxu1 %v5265_v44  ;;  %v1112_v50 = vrot.slane %v4462_v22, 1  ;;  %v578_v57 = vsel %vm444_vm0, %v4437_v27, 0.0 }
 0x12b   : > { %v1676_v5 = vpop.f32.mrf.mxu0  ;;  %v1901_v24 = vpop.f32.mrf.mxu1 }
 0x12d   : > { %v1679_v52 = vpop.f32.mrf.mxu0  ;;  %v1904_v55 = vpop.f32.mrf.mxu1  ;;  %2208 = vmatmul.mubr.f32.gmra.mxu0 %v5263_v14  ;;  %3047 = vmatmul.mubr.msk.f32.gmra.mxu1 %vm3591_vm3, %v4312_v3 }
 0x12e   : > { %v4681_v62 = vadd.f32 %v1904_v55, %v1679_v52  ;;  %2212 = vmatprep.mubr.f32.mxu0 %v5266_v4  ;;  %2437 = vmatprep.mubr.f32.mxu1 %v4409_v28  ;;  %v1113_v55 = vsel %vm787_vm1, %v1111_v39, %v1112_v50 }
 0x12f   : > { %v1681_v15 = vpop.f32.mrf.mxu0  ;;  %v1906_v20 = vpop.f32.mrf.mxu1 }
 0x130   : > { %v1114_v15 = vrot.slane %v578_v57, 1 }
 0x131   : > { %v1684_v10 = vpop.f32.mrf.mxu0  ;;  %v1909_v42 = vpop.f32.mrf.mxu1  ;;  %2213 = vmatmul.mubr.f32.gmra.mxu0 %v4355_v46  ;;  %2438 = vmatmul.mubr.f32.gmra.mxu1 %v4332_v49 }
 0x132   : > { %v4689_v14 = vadd.f32 %v1909_v42, %v1684_v10  ;;  %2217 = vmatprep.mubr.f32.mxu0 %v4405_v37  ;;  %2442 = vmatprep.mubr.f32.mxu1 %v4435_v16  ;;  %v1115_v42 = vsel %vm787_vm1, %v1112_v50, %v1114_v15 }
 0x133   : > { %v1686_v3 = vpop.f32.mrf.mxu0  ;;  %v1911_v29 = vpop.f32.mrf.mxu1 }
 0x134   : > { %v1150_v3 = vrot.slane %v561_v0, 2  ;;  %v1151_v29 = vrot.slane %v4462_v22, 2  ;;  %v1153_v0 = vrot.slane %v578_v57, 2  ;;  %v5268_v57 = vld [vmem:[#allocation3_spill] sm:$0xff] }
 0x135   : > { %v1689_v5 = vpop.f32.mrf.mxu0  ;;  %v1914_v24 = vpop.f32.mrf.mxu1  ;;  %2218 = vmatmul.mubr.f32.gmra.mxu0 %v5265_v44  ;;  %3049 = vmatmul.mubr.msk.f32.gmra.mxu1 %vm3591_vm3, %v4376_v56 }
 0x136   : > { %v4700_v46 = vadd.f32 %v1914_v24, %v1689_v5  ;;  %2222 = vmatprep.mubr.f32.mxu0 %v4427_v12  ;;  %2447 = vmatprep.mubr.f32.mxu1 %v4457_v2  ;;  %v4720_v50 = vsel %vm932_vm2, %v1150_v3, %v1151_v29 }
 0x137   : > { %v1691_v49 = vpop.f32.mrf.mxu0  ;;  %v1916_v52 = vpop.f32.mrf.mxu1 }
 0x139   : > { %v1694_v27 = vpop.f32.mrf.mxu0  ;;  %v1919_v20 = vpop.f32.mrf.mxu1  ;;  %2223 = vmatmul.mubr.f32.gmra.mxu0 %v4409_v28  ;;  %2448 = vmatmul.mubr.f32.gmra.mxu1 %v4387_v58 }
 0x13a   : > { %v4707_v44 = vadd.f32 %v1919_v20, %v1694_v27  ;;  %2227 = vmatprep.mubr.f32.mxu0 %v4452_v26  ;;  %2452 = vmatprep.mubr.f32.mxu1 %v1113_v55  ;;  %v4729_v20 = vsel %vm932_vm2, %v1151_v29, %v1153_v0 }
 0x13b   : > { %v1696_v56 = vpop.f32.mrf.mxu0  ;;  %v1921_v10 = vpop.f32.mrf.mxu1 }
 0x13d   : > { %v1699_v39 = vpop.f32.mrf.mxu0  ;;  %v1924_v5 = vpop.f32.mrf.mxu1  ;;  %2228 = vmatmul.mubr.f32.gmra.mxu0 %v4435_v16  ;;  %3051 = vmatmul.mubr.msk.f32.gmra.mxu1 %vm3591_vm3, %v4429_v61  ;;  %v5267_v61 = vld [vmem:[#allocation4_spill] sm:$0xff] }
 0x13e   : > { %v4716_v58 = vadd.f32 %v1924_v5, %v1699_v39  ;;  %2232 = vmatprep.mubr.f32.mxu0 %v4474_v59  ;;  %2457 = vmatprep.mubr.f32.mxu1 %v1115_v42 }
 0x13f   : > { %v1701_v28 = vpop.f32.mrf.mxu0  ;;  %v1926_v24 = vpop.f32.mrf.mxu1 }
 0x141   : > { %v1704_v49 = vpop.f32.mrf.mxu0  ;;  %v1929_v52 = vpop.f32.mrf.mxu1  ;;  %2233 = vmatmul.mubr.f32.gmra.mxu0 %v4457_v2  ;;  %2458 = vmatmul.mubr.f32.gmra.mxu1 %v4462_v22  ;;  %v5269_v22 = vld [vmem:[#allocation6_spill] sm:$0xff] }
 0x142   : > { %v4724_v16 = vadd.f32 %v1929_v52, %v1704_v49  ;;  %2237 = vmatprep.mubr.f32.mxu0 %v4720_v50  ;;  %2462 = vmatprep.mubr.f32.mxu1 %v5267_v61 }
 0x143   : > { %v1706_v15 = vpop.f32.mrf.mxu0  ;;  %v1931_v27 = vpop.f32.mrf.mxu1 }
 0x145   : > { %v1709_v56 = vpop.f32.mrf.mxu0  ;;  %v1934_v10 = vpop.f32.mrf.mxu1  ;;  %2238 = vmatmul.mubr.f32.gmra.mxu0 %v1113_v55  ;;  %3053 = vmatmul.mubr.msk.f32.gmra.mxu1 %vm3591_vm3, %v5268_v57 }
 0x146   : > { %v4734_v2 = vadd.f32 %v1934_v10, %v1709_v56  ;;  %2242 = vmatprep.mubr.f32.mxu0 %v4729_v20  ;;  %2467 = vmatprep.mubr.f32.mxu1 %v5269_v22 }
 0x147   : > { %v1711_v3 = vpop.f32.mrf.mxu0  ;;  %v1936_v39 = vpop.f32.mrf.mxu1 }
 0x149   : > { %v1714_v5 = vpop.f32.mrf.mxu0  ;;  %v1939_v28 = vpop.f32.mrf.mxu1  ;;  %2243 = vmatmul.mubr.f32.gmra.mxu0 %v1115_v42  ;;  %2468 = vmatmul.mubr.f32.gmra.mxu1 %v5268_v57 }
 0x14a   : > { %v4739_v29 = vadd.f32 %v1939_v28, %v1714_v5  ;;  %3134 = vmatprep.mubr.f32.mxu0 %v3714_v32  ;;  %3158 = vmatprep.mubr.f32.mxu1 %v5250_v18 }
 0x14b   : > { %v1716_v35 = vpop.f32.mrf.mxu0  ;;  %v1941_v55 = vpop.f32.mrf.mxu1 }
 0x14d   : > { %v1719_v24 = vpop.f32.mrf.mxu0  ;;  %v1944_v0 = vpop.f32.mrf.mxu1  ;;  %3135 = vmatmul.mubr.f32.vlgmr.msra.gmra.mxu0 %v3739_v51  ;;  %3159 = vmatmul.mubr.f32.vlgmr.msra.gmra.mxu1 %v5253_v34 }
 0x14e   : > { %v4745_v49 = vadd.f32 %v1944_v0, %v1719_v24  ;;  %3137 = vmatprep.mubr.f32.mxu0 %v3771_v8  ;;  %3161 = vmatprep.mubr.f32.mxu1 %v5256_v6 }
 0x14f   : > { %v1721_v42 = vpop.f32.mrf.mxu0  ;;  %v1946_v52 = vpop.f32.mrf.mxu1 }
 0x151   : > { %v1724_v61 = vpop.f32.mrf.mxu0  ;;  %v1949_v32 = vpop.f32.mrf.mxu1  ;;  %3138 = vmatmul.mubr.f32.gmra.mxu0 %v3787_v19  ;;  %3162 = vmatmul.mubr.f32.gmra.mxu1 %v5259_v47 }
 0x152   : > { %v4751_v18 = vadd.f32 %v1949_v32, %v1724_v61  ;;  %3140 = vmatprep.mubr.f32.mxu0 %v3828_v45  ;;  %3164 = vmatprep.mubr.f32.mxu1 %v5262_v21 }
 0x153   : > { %v1726_v51 = vpop.f32.mrf.mxu0  ;;  %v1951_v34 = vpop.f32.mrf.mxu1 }
 0x155   : > { %v1729_v15 = vpop.f32.mrf.mxu0  ;;  %v1954_v8 = vpop.f32.mrf.mxu1  ;;  %3141 = vmatmul.mubr.f32.gmra.mxu0 %v3844_v1  ;;  %3165 = vmatmul.mubr.f32.gmra.mxu1 %v5264_v9 }
 0x156   : > { %v4757_v6 = vadd.f32 %v1954_v8, %v1729_v15  ;;  %3143 = vmatprep.mubr.f32.mxu0 %v3885_v33  ;;  %3167 = vmatprep.mubr.f32.mxu1 %v4350_v43 }
 0x157   : > { %v1731_v19 = vpop.f32.mrf.mxu0  ;;  %v1956_v47 = vpop.f32.mrf.mxu1 }
 0x159   : > { %v1734_v27 = vpop.f32.mrf.mxu0  ;;  %v1959_v45 = vpop.f32.mrf.mxu1  ;;  %3144 = vmatmul.mubr.f32.gmra.mxu0 %v3901_v54  ;;  %3168 = vmatmul.mubr.f32.gmra.mxu1 %v5266_v4 }
 0x15a   : > { %v4763_v21 = vadd.f32 %v1959_v45, %v1734_v27  ;;  %3146 = vmatprep.mubr.f32.mxu0 %v3942_v30  ;;  %3170 = vmatprep.mubr.f32.mxu1 %v4405_v37 }
 0x15b   : > { %v1736_v1 = vpop.f32.mrf.mxu0  ;;  %v1961_v9 = vpop.f32.mrf.mxu1 }
 0x15d   : > { %v1739_v56 = vpop.f32.mrf.mxu0  ;;  %v1964_v33 = vpop.f32.mrf.mxu1  ;;  %3147 = vmatmul.mubr.f32.gmra.mxu0 %v5229_v36  ;;  %3171 = vmatmul.mubr.f32.gmra.mxu1 %v4427_v12 }
 0x15e   : > { %v4769_v43 = vadd.f32 %v1964_v33, %v1739_v56  ;;  %3149 = vmatprep.mubr.f32.mxu0 %v5232_v11  ;;  %3173 = vmatprep.mubr.f32.mxu1 %v4452_v26 }
 0x15f   : > { %v1741_v54 = vpop.f32.mrf.mxu0  ;;  %v1966_v4 = vpop.f32.mrf.mxu1 }
 0x161   : > { %v1744_v10 = vpop.f32.mrf.mxu0  ;;  %v1969_v30 = vpop.f32.mrf.mxu1  ;;  %3150 = vmatmul.mubr.f32.gmra.mxu0 %v5235_v53  ;;  %3174 = vmatmul.mubr.f32.gmra.mxu1 %v4474_v59  ;;  %v5270_v53 = vld [vmem:[#allocation5_spill] sm:$0xff] }
 0x162   : > { %v4775_v37 = vadd.f32 %v1969_v30, %v1744_v10  ;;  %3152 = vmatprep.mubr.f32.mxu0 %v5238_v41  ;;  %3176 = vmatprep.mubr.f32.mxu1 %v4720_v50  ;;  %v5271_v50 = vld [vmem:[#allocation7_spill] sm:$0xff] }
 0x163   : > { %v1746_v12 = vpop.f32.mrf.mxu0  ;;  %v1971_v36 = vpop.f32.mrf.mxu1 }
 0x165   : > { %v1749_v57 = vpop.f32.mrf.mxu0  ;;  %v1974_v11 = vpop.f32.mrf.mxu1  ;;  %3153 = vmatmul.mubr.f32.gmra.mxu0 %v5241_v23  ;;  %3177 = vmatmul.mubr.f32.gmra.mxu1 %v4729_v20 }
 0x166   : > { %v4781_v26 = vadd.f32 %v1974_v11, %v1749_v57  ;;  %3155 = vmatprep.mubr.f32.mxu0 %v5244_v13  ;;  %3179 = vmatprep.mubr.f32.mxu1 %v5270_v53 }
 0x167   : > { %v1751_v59 = vpop.f32.mrf.mxu0  ;;  %v1976_v22 = vpop.f32.mrf.mxu1 }
 0x169   : > { %v1754_v3 = vpop.f32.mrf.mxu0  ;;  %v1979_v41 = vpop.f32.mrf.mxu1  ;;  %3156 = vmatmul.mubr.f32.gmra.mxu0 %v5247_v40  ;;  %3180 = vmatmul.mubr.f32.gmra.mxu1 %v5271_v50 }
 0x16a   : > { %v4787_v39 = vadd.f32 %v1979_v41, %v1754_v3 }
 0x16b   : > { %v1756_v5 = vpop.f32.mrf.mxu0  ;;  %v1981_v23 = vpop.f32.mrf.mxu1 }
 0x16d   : > { %v1759_v28 = vpop.f32.mrf.mxu0  ;;  %v1984_v20 = vpop.f32.mrf.mxu1 }
 0x16e   : > { %v4789_v35 = vadd.f32 %v1984_v20, %v1759_v28 }
 0x16f   : > { %v1761_v55 = vpop.f32.mrf.mxu0  ;;  %v1986_v13 = vpop.f32.mrf.mxu1 }
 0x171   : > { %v1764_v24 = vpop.f32.mrf.mxu0  ;;  %v1989_v0 = vpop.f32.mrf.mxu1 }
 0x172   : > { %v4791_v42 = vadd.f32 %v1989_v0, %v1764_v24 }
 0x173   : > { %v1766_v52 = vpop.f32.mrf.mxu0  ;;  %v1991_v61 = vpop.f32.mrf.mxu1 }
 0x175   : > { %v1769_v32 = vpop.f32.mrf.mxu0  ;;  %v1994_v40 = vpop.f32.mrf.mxu1 }
 0x176   : > { %v4793_v51 = vadd.f32 %v1994_v40, %v1769_v32 }
 0x177   : > { %v1771_v34 = vpop.f32.mrf.mxu0  ;;  %v1996_v15 = vpop.f32.mrf.mxu1 }
 0x179   : > { %v1774_v8 = vpop.f32.mrf.mxu0  ;;  %v1999_v19 = vpop.f32.mrf.mxu1 }
 0x17a   : > { %v4795_v47 = vadd.f32 %v1999_v19, %v1774_v8 }
 0x17b   : > { %v1776_v27 = vpop.f32.mrf.mxu0  ;;  %v2001_v45 = vpop.f32.mrf.mxu1 }
 0x17d   : > { %v1779_v1 = vpop.f32.mrf.mxu0  ;;  %v2004_v9 = vpop.f32.mrf.mxu1 }
 0x17e   : > { %v4797_v56 = vadd.f32 %v2004_v9, %v1779_v1 }
 0x17f   : > { %v1781_v33 = vpop.f32.mrf.mxu0  ;;  %v2006_v54 = vpop.f32.mrf.mxu1 }
 0x181   : > { %v1784_v4 = vpop.f32.mrf.mxu0  ;;  %v2009_v10 = vpop.f32.mrf.mxu1 }
 0x182   : > { %v4799_v30 = vadd.f32 %v2009_v10, %v1784_v4 }
 0x183   : > { %v1786_v12 = vpop.f32.mrf.mxu0  ;;  %v2011_v36 = vpop.f32.mrf.mxu1 }
 0x185   : > { %v1789_v57 = vpop.f32.mrf.mxu0  ;;  %v2014_v11 = vpop.f32.mrf.mxu1 }
 0x186   : > { %v4801_v53 = vadd.f32 %v2014_v11, %v1789_v57 }
 0x187   : > { %v1791_v59 = vpop.f32.mrf.mxu0  ;;  %v2016_v22 = vpop.f32.mrf.mxu1 }
 0x188   : > { %5272 = vst [vmem:[#allocation9_spill] sm:$0xff] %v4801_v53 }
 0x189   : > { %v1794_v3 = vpop.f32.mrf.mxu0  ;;  %v2019_v41 = vpop.f32.mrf.mxu1 }
 0x18a   : > { %v4803_v50 = vadd.f32 %v2019_v41, %v1794_v3 }
 0x18b   : > { %v1796_v5 = vpop.f32.mrf.mxu0  ;;  %v2021_v23 = vpop.f32.mrf.mxu1 }
 0x18c   : > { %5273 = vst [vmem:[#allocation13_spill] sm:$0xff] %v4803_v50 }
 0x18d   : > { %v2089_v28 = vpop.f32.mrf.mxu0  ;;  %v2314_v20 = vpop.f32.mrf.mxu1 }
 0x18e   : > { %v2090_v55 = vadd.f32 %v2089_v28, %v4625_v38 }
 0x18f   : > { %v2091_v13 = vpop.f32.mrf.mxu0  ;;  %v2316_v24 = vpop.f32.mrf.mxu1 }
 0x190   : > { %v4806_v0 = vadd.f32 %v2314_v20, %v2090_v55 }
 0x191   : > { %v2094_v52 = vpop.f32.mrf.mxu0  ;;  %v2319_v61 = vpop.f32.mrf.mxu1 }
 0x192   : > { %v2095_v32 = vadd.f32 %v2094_v52, %v4631_v17 }
 0x193   : > { %v2096_v40 = vpop.f32.mrf.mxu0  ;;  %v2321_v34 = vpop.f32.mrf.mxu1 }
 0x194   : > { %v4809_v15 = vadd.f32 %v2319_v61, %v2095_v32 }
 0x195   : > { %v2099_v8 = vpop.f32.mrf.mxu0  ;;  %v2324_v19 = vpop.f32.mrf.mxu1 }
 0x196   : > { %v2100_v27 = vadd.f32 %v2099_v8, %v4639_v31 }
 0x197   : > { %v2101_v45 = vpop.f32.mrf.mxu0  ;;  %v2326_v1 = vpop.f32.mrf.mxu1 }
 0x198   : > { %v4812_v9 = vadd.f32 %v2324_v19, %v2100_v27 }
 0x199   : > { %v2104_v38 = vpop.f32.mrf.mxu0  ;;  %v2329_v33 = vpop.f32.mrf.mxu1 }
 0x19a   : > { %v2105_v54 = vadd.f32 %v2104_v38, %v4645_v63 }
 0x19b   : > { %v2106_v4 = vpop.f32.mrf.mxu0  ;;  %v2331_v10 = vpop.f32.mrf.mxu1 }
 0x19c   : > { %v4815_v12 = vadd.f32 %v2329_v33, %v2105_v54 }
 0x19d   : > { %v2109_v17 = vpop.f32.mrf.mxu0  ;;  %v2334_v36 = vpop.f32.mrf.mxu1 }
 0x19e   : > { %v2110_v57 = vadd.f32 %v2109_v17, %v4653_v60 }
 0x19f   : > { %v2111_v11 = vpop.f32.mrf.mxu0  ;;  %v2336_v59 = vpop.f32.mrf.mxu1 }
 0x1a0   : > { %v4818_v22 = vadd.f32 %v2334_v36, %v2110_v57 }
 0x1a1   : > { %v2114_v31 = vpop.f32.mrf.mxu0  ;;  %v2339_v3 = vpop.f32.mrf.mxu1 }
 0x1a2   : > { %v2115_v41 = vadd.f32 %v2114_v31, %v4659_v25 }
 0x1a3   : > { %v2116_v5 = vpop.f32.mrf.mxu0  ;;  %v2341_v23 = vpop.f32.mrf.mxu1 }
 0x1a4   : > { %v4821_v28 = vadd.f32 %v2339_v3, %v2115_v41 }
 0x1a5   : > { %v2119_v63 = vpop.f32.mrf.mxu0  ;;  %v2344_v20 = vpop.f32.mrf.mxu1 }
 0x1a6   : > { %v2120_v55 = vadd.f32 %v2119_v63, %v4667_v48 }
 0x1a7   : > { %v2121_v13 = vpop.f32.mrf.mxu0  ;;  %v2346_v24 = vpop.f32.mrf.mxu1 }
 0x1a8   : > { %v4824_v52 = vadd.f32 %v2344_v20, %v2120_v55 }
 0x1a9   : > { %v2124_v60 = vpop.f32.mrf.mxu0  ;;  %v2349_v61 = vpop.f32.mrf.mxu1 }
 0x1aa   : > { %v2125_v32 = vadd.f32 %v2124_v60, %v4673_v7 }
 0x1ab   : > { %v2126_v40 = vpop.f32.mrf.mxu0  ;;  %v2351_v34 = vpop.f32.mrf.mxu1 }
 0x1ac   : > { %v4827_v8 = vadd.f32 %v2349_v61, %v2125_v32 }
 0x1ad   : > { %v2129_v25 = vpop.f32.mrf.mxu0  ;;  %v2354_v19 = vpop.f32.mrf.mxu1 }
 0x1ae   : > { %v2130_v27 = vadd.f32 %v2129_v25, %v4681_v62 }
 0x1af   : > { %v2131_v45 = vpop.f32.mrf.mxu0  ;;  %v2356_v1 = vpop.f32.mrf.mxu1 }
 0x1b0   : > { %v4830_v38 = vadd.f32 %v2354_v19, %v2130_v27 }
 0x1b1   : > { %v2134_v48 = vpop.f32.mrf.mxu0  ;;  %v2359_v33 = vpop.f32.mrf.mxu1 }
 0x1b2   : > { %v2135_v54 = vadd.f32 %v2134_v48, %v4689_v14 }
 0x1b3   : > { %v2136_v4 = vpop.f32.mrf.mxu0  ;;  %v2361_v10 = vpop.f32.mrf.mxu1 }
 0x1b4   : > { %v4833_v17 = vadd.f32 %v2359_v33, %v2135_v54 }
 0x1b5   : > { %v2139_v7 = vpop.f32.mrf.mxu0  ;;  %v2364_v36 = vpop.f32.mrf.mxu1 }
 0x1b6   : > { %v2140_v57 = vadd.f32 %v2139_v7, %v4700_v46 }
 0x1b7   : > { %v2141_v11 = vpop.f32.mrf.mxu0  ;;  %v2366_v59 = vpop.f32.mrf.mxu1 }
 0x1b8   : > { %v4836_v31 = vadd.f32 %v2364_v36, %v2140_v57 }
 0x1b9   : > { %v2144_v62 = vpop.f32.mrf.mxu0  ;;  %v2369_v3 = vpop.f32.mrf.mxu1 }
 0x1ba   : > { %v2145_v41 = vadd.f32 %v2144_v62, %v4707_v44 }
 0x1bb   : > { %v2146_v5 = vpop.f32.mrf.mxu0  ;;  %v2371_v23 = vpop.f32.mrf.mxu1 }
 0x1bc   : > { %v4839_v63 = vadd.f32 %v2369_v3, %v2145_v41 }
 0x1bd   : > { %v2149_v14 = vpop.f32.mrf.mxu0  ;;  %v2374_v20 = vpop.f32.mrf.mxu1 }
 0x1be   : > { %v2150_v55 = vadd.f32 %v2149_v14, %v4716_v58 }
 0x1bf   : > { %v2151_v13 = vpop.f32.mrf.mxu0  ;;  %v2376_v24 = vpop.f32.mrf.mxu1 }
 0x1c0   : > { %v4842_v60 = vadd.f32 %v2374_v20, %v2150_v55 }
 0x1c1   : > { %v2154_v46 = vpop.f32.mrf.mxu0  ;;  %v2379_v61 = vpop.f32.mrf.mxu1 }
 0x1c2   : > { %5274 = vst [vmem:[#allocation8_spill] sm:$0xff] %v4842_v60  ;;  %v2155_v32 = vadd.f32 %v2154_v46, %v4724_v16 }
 0x1c3   : > { %v2156_v40 = vpop.f32.mrf.mxu0  ;;  %v2381_v34 = vpop.f32.mrf.mxu1 }
 0x1c4   : > { %v4845_v25 = vadd.f32 %v2379_v61, %v2155_v32 }
 0x1c5   : > { %v2159_v44 = vpop.f32.mrf.mxu0  ;;  %v2384_v19 = vpop.f32.mrf.mxu1 }
 0x1c6   : > { %5275 = vst [vmem:[#allocation12_spill] sm:$0xff] %v4845_v25  ;;  %v2160_v27 = vadd.f32 %v2159_v44, %v4734_v2 }
 0x1c7   : > { %v2161_v45 = vpop.f32.mrf.mxu0  ;;  %v2386_v1 = vpop.f32.mrf.mxu1 }
 0x1c8   : > { %v4848_v48 = vadd.f32 %v2384_v19, %v2160_v27 }
 0x1c9   : > { %v2164_v58 = vpop.f32.mrf.mxu0  ;;  %v2389_v33 = vpop.f32.mrf.mxu1 }
 0x1ca   : > { %5276 = vst [vmem:[#allocation16_spill] sm:$0xff] %v4848_v48  ;;  %v2165_v54 = vadd.f32 %v2164_v58, %v4739_v29 }
 0x1cb   : > { %v2166_v4 = vpop.f32.mrf.mxu0  ;;  %v2391_v10 = vpop.f32.mrf.mxu1 }
 0x1cc   : > { %v4851_v7 = vadd.f32 %v2389_v33, %v2165_v54 }
 0x1cd   : > { %v2169_v16 = vpop.f32.mrf.mxu0  ;;  %v2394_v36 = vpop.f32.mrf.mxu1 }
 0x1ce   : > { %5277 = vst [vmem:[#allocation10_spill] sm:$0xff] %v4851_v7  ;;  %v2170_v57 = vadd.f32 %v2169_v16, %v4745_v49 }
 0x1cf   : > { %v2171_v11 = vpop.f32.mrf.mxu0  ;;  %v2396_v59 = vpop.f32.mrf.mxu1 }
 0x1d0   : > { %v4854_v62 = vadd.f32 %v2394_v36, %v2170_v57 }
 0x1d1   : > { %v2174_v2 = vpop.f32.mrf.mxu0  ;;  %v2399_v3 = vpop.f32.mrf.mxu1 }
 0x1d3   : > { %v2176_v41 = vpop.f32.mrf.mxu0  ;;  %v2401_v5 = vpop.f32.mrf.mxu1 }
 0x1d5   : > { %v2179_v23 = vpop.f32.mrf.mxu0  ;;  %v4856_v14 = vpop.f32.mrf.mxu1 }
 0x1d6   : > { %v2180_v50 = vadd.f32 %v2179_v23, %v4757_v6 }
 0x1d7   : > { %v2181_v29 = vpop.f32.mrf.mxu0  ;;  %v2406_v20 = vpop.f32.mrf.mxu1 }
 0x1d9   : > { %v2184_v55 = vpop.f32.mrf.mxu0  ;;  %v4858_v13 = vpop.f32.mrf.mxu1 }
 0x1db   : > { %v2186_v24 = vpop.f32.mrf.mxu0  ;;  %v2411_v46 = vpop.f32.mrf.mxu1 }
 0x1dd   : > { %v4860_v61 = vpop.f32.mrf.mxu0  ;;  %v4862_v49 = vpop.f32.mrf.mxu1 }
 0x1df   : > { %v2191_v32 = vpop.f32.mrf.mxu0  ;;  %v2416_v40 = vpop.f32.mrf.mxu1 }
 0x1e1   : > { %v2194_v34 = vpop.f32.mrf.mxu0  ;;  %v4864_v44 = vpop.f32.mrf.mxu1 }
 0x1e3   : > { %v2196_v19 = vpop.f32.mrf.mxu0  ;;  %v2421_v27 = vpop.f32.mrf.mxu1 }
 0x1e5   : > { %v4866_v45 = vpop.f32.mrf.mxu0  ;;  %v4868_v1 = vpop.f32.mrf.mxu1 }
 0x1e7   : > { %v2201_v58 = vpop.f32.mrf.mxu0  ;;  %v2426_v33 = vpop.f32.mrf.mxu1 }
 0x1e9   : > { %v4870_v54 = vpop.f32.mrf.mxu0  ;;  %v4872_v4 = vpop.f32.mrf.mxu1 }
 0x1eb   : > { %v2206_v10 = vpop.f32.mrf.mxu0  ;;  %v2431_v16 = vpop.f32.mrf.mxu1 }
 0x1ed   : > { %v4874_v36 = vpop.f32.mrf.mxu0  ;;  %v4876_v57 = vpop.f32.mrf.mxu1 }
 0x1ef   : > { %v2211_v11 = vpop.f32.mrf.mxu0  ;;  %v2436_v59 = vpop.f32.mrf.mxu1 }
 0x1f1   : > { %v4878_v41 = vpop.f32.mrf.mxu0  ;;  %v4880_v5 = vpop.f32.mrf.mxu1 }
 0x1f3   : > { %v2216_v29 = vpop.f32.mrf.mxu0  ;;  %v2441_v20 = vpop.f32.mrf.mxu1 }
 0x1f5   : > { %v4882_v24 = vpop.f32.mrf.mxu0  ;;  %v4884_v46 = vpop.f32.mrf.mxu1 }
 0x1f7   : > { %v2221_v32 = vpop.f32.mrf.mxu0  ;;  %v2446_v40 = vpop.f32.mrf.mxu1 }
 0x1f9   : > { %v4886_v19 = vpop.f32.mrf.mxu0  ;;  %v4888_v27 = vpop.f32.mrf.mxu1 }
 0x1fb   : > { %v2226_v58 = vpop.f32.mrf.mxu0  ;;  %v2451_v33 = vpop.f32.mrf.mxu1 }
 0x1fc   : > { %v2175_v33 = vadd.f32 %v2174_v2, %v4751_v18 }
 0x1fd   : > { %v4890_v10 = vpop.f32.mrf.mxu0  ;;  %v4892_v16 = vpop.f32.mrf.mxu1 }
 0x1fe   : > { %5278 = vst [vmem:[#allocation14_spill] sm:$0xff] %v4892_v16  ;;  %v2400_v25 = vadd.f32 %v2399_v3, %v2175_v33 }
 0x1ff   : > { %v2231_v11 = vpop.f32.mrf.mxu0  ;;  %v2456_v59 = vpop.f32.mrf.mxu1 }
 0x201   : > { %v4894_v29 = vpop.f32.mrf.mxu0  ;;  %v4896_v20 = vpop.f32.mrf.mxu1 }
 0x203   : > { %v2236_v48 = vpop.f32.mrf.mxu0  ;;  %v2461_v32 = vpop.f32.mrf.mxu1 }
 0x204   : > { %v2185_v48 = vadd.f32 %v2184_v55, %v4763_v21  ;;  %v2405_v55 = vadd.f32 %v4856_v14, %v2180_v50  ;;  %v2190_v50 = vadd.f32 %v4860_v61, %v4769_v43 }
 0x205   : > { %v4898_v40 = vpop.f32.mrf.mxu0  ;;  %v4900_v7 = vpop.f32.mrf.mxu1 }
 0x207   : > { %v2241_v60 = vpop.f32.mrf.mxu0  ;;  %v2466_v58 = vpop.f32.mrf.mxu1 }
 0x208   : > { %v2410_v58 = vadd.f32 %v4858_v13, %v2185_v48 }
 0x209   : > { %v4903_v53 = vpop.f32.mrf.mxu0  ;;  %v4905_v16 = vpop.f32.mrf.mxu1 }
 0x20b   : > { %v2246_v11 = vpop.f32.mrf.mxu0  ;;  %v2471_v59 = vpop.f32.mrf.mxu1 }
 0x20d   : > { %v3136_v18 = vpop.f32.mrf.mxu0  ;;  %v3160_v60 = vpop.f32.mrf.mxu1 }
 0x20e   : > { %v2545_v2 = vadd.f32 %v3136_v18, %v4809_v15  ;;  %v4917_v32 = vadd.f32 %v3160_v60, %v2400_v25  ;;  %v2195_v15 = vadd.f32 %v2194_v34, %v4775_v37 }
 0x20f   : > { %v2539_v3 = vpop.f32.mrf.mxu0  ;;  %v2619_v6 = vpop.f32.mrf.mxu1 }
 0x210   : > { %2699 = vst [vmem:[%s4914_s10 + $0x8] sm:$0xff] %v2545_v2  ;;  %2715 = vst [vmem:[%s4914_s10 + $0x88] sm:$0xff] %v4917_v32  ;;  %v2540_v21 = vadd.f32 %v2539_v3, %v4806_v0  ;;  %v4924_v23 = vadd.f32 %v2619_v6, %v4854_v62  ;;  %v2768_v11 = vmul.f32 %v2545_v2, %v2545_v2 }
 0x211   : > { %v3139_v25 = vpop.f32.mrf.mxu0  ;;  %v3163_v33 = vpop.f32.mrf.mxu1  ;;  %v2420_v60 = vadd.f32 %v4864_v44, %v2195_v15  ;;  %v2415_v6 = vadd.f32 %v4862_v49, %v2190_v50  ;;  %v2200_v44 = vadd.f32 %v4866_v45, %v4781_v26 }
 0x212   : > { %2698 = vst [vmem:[%s4914_s10] sm:$0xff] %v2540_v21  ;;  %v2730_v59 = vadd.f32 %v2545_v2, %v2540_v21  ;;  %v2767_v18 = vmul.f32 %v2540_v21, %v2540_v21  ;;  %2714 = vst [vmem:[%s4914_s10 + $0x80] sm:$0xff] %v4924_v23  ;;  %v2555_v0 = vadd.f32 %v3139_v25, %v4815_v12 }
 0x213   : > { %v4935_v62 = vadd.f32 %v3163_v33, %v2410_v58  ;;  %v2549_v14 = vpop.f32.mrf.mxu0  ;;  %v2629_v37 = vpop.f32.mrf.mxu1  ;;  %v2205_v2 = vadd.f32 %v4870_v54, %v4787_v39 }
 0x214   : > { %v2799_v13 = vadd.f32 %v2768_v11, %v2767_v18  ;;  %2701 = vst [vmem:[%s4914_s10 + $0x18] sm:$0xff] %v2555_v0  ;;  %v2550_v34 = vadd.f32 %v2549_v14, %v4812_v9  ;;  %v4939_v48 = vadd.f32 %v2629_v37, %v2405_v55  ;;  %v2770_v55 = vmul.f32 %v2555_v0, %v2555_v0 }
 0x215   : > { %2717 = vst [vmem:[%s4914_s10 + $0x98] sm:$0xff] %v4935_v62  ;;  %v3142_v43 = vpop.f32.mrf.mxu0  ;;  %v3166_v12 = vpop.f32.mrf.mxu1  ;;  %v2430_v33 = vadd.f32 %v4872_v4, %v2205_v2  ;;  %v2210_v4 = vadd.f32 %v4874_v36, %v4789_v35 }
 0x216   : > { %2700 = vst [vmem:[%s4914_s10 + $0x10] sm:$0xff] %v2550_v34  ;;  %v2731_v61 = vadd.f32 %v2730_v59, %v2550_v34  ;;  %v2769_v3 = vmul.f32 %v2550_v34, %v2550_v34  ;;  %2716 = vst [vmem:[%s4914_s10 + $0x90] sm:$0xff] %v4939_v48  ;;  %v2565_v9 = vadd.f32 %v3142_v43, %v4821_v28 }
 0x217   : > { %v4953_v39 = vadd.f32 %v3166_v12, %v2420_v60  ;;  %v2559_v54 = vpop.f32.mrf.mxu0  ;;  %v2639_v21 = vpop.f32.mrf.mxu1  ;;  %v2215_v28 = vadd.f32 %v4878_v41, %v4791_v42 }
 0x218   : > { %v2800_v58 = vadd.f32 %v2799_v13, %v2769_v3  ;;  %2703 = vst [vmem:[%s4914_s10 + $0x28] sm:$0xff] %v2565_v9  ;;  %v2560_v15 = vadd.f32 %v2559_v54, %v4818_v22  ;;  %v2732_v25 = vadd.f32 %v2731_v61, %v2555_v0  ;;  %v4962_v49 = vadd.f32 %v2639_v21, %v2415_v6 }
 0x219   : > { %2719 = vst [vmem:[%s4914_s10 + $0xa8] sm:$0xff] %v4953_v39  ;;  %v3145_v26 = vpop.f32.mrf.mxu0  ;;  %v3169_v45 = vpop.f32.mrf.mxu1  ;;  %v2425_v0 = vadd.f32 %v4868_v1, %v2200_v44  ;;  %v2772_v14 = vmul.f32 %v2565_v9, %v2565_v9  ;;  %v2225_v1 = vadd.f32 %v4886_v19, %v4795_v47  ;;  %v2435_v61 = vadd.f32 %v4876_v57, %v2210_v4 }
 0x21a   : > { %2702 = vst [vmem:[%s4914_s10 + $0x20] sm:$0xff] %v2560_v15  ;;  %v2733_v11 = vadd.f32 %v2732_v25, %v2560_v15  ;;  %v2771_v59 = vmul.f32 %v2560_v15, %v2560_v15  ;;  %v2801_v18 = vadd.f32 %v2800_v58, %v2770_v55  ;;  %v2575_v22 = vadd.f32 %v3145_v26, %v4827_v8 }
 0x21b   : > { %2718 = vst [vmem:[%s4914_s10 + $0xa0] sm:$0xff] %v4962_v49  ;;  %v4971_v42 = vadd.f32 %v3169_v45, %v2430_v33  ;;  %v2569_v41 = vpop.f32.mrf.mxu0  ;;  %v2649_v50 = vpop.f32.mrf.mxu1  ;;  %v2440_v8 = vadd.f32 %v4880_v5, %v2215_v28  ;;  %v2220_v5 = vadd.f32 %v4882_v24, %v4793_v51  ;;  %v2235_v57 = vadd.f32 %v4894_v29, %v4799_v30 }
 0x21c   : > { %v2802_v37 = vadd.f32 %v2801_v18, %v2771_v59  ;;  %2705 = vst [vmem:[%s4914_s10 + $0x38] sm:$0xff] %v2575_v22  ;;  %v2570_v13 = vadd.f32 %v2569_v41, %v4824_v52  ;;  %v2734_v34 = vadd.f32 %v2733_v11, %v2565_v9  ;;  %v4980_v35 = vadd.f32 %v2649_v50, %v2425_v0  ;;  %v5280_v41 = vld [vmem:[#allocation12_spill] sm:$0xff]  ;;  %v5281_v50 = vld [vmem:[#allocation14_spill] sm:$0xff] }
 0x21d   : > { %2721 = vst [vmem:[%s4914_s10 + $0xb8] sm:$0xff] %v4971_v42  ;;  %v3148_v36 = vpop.f32.mrf.mxu0  ;;  %v3172_v60 = vpop.f32.mrf.mxu1  ;;  %v2774_v9 = vmul.f32 %v2575_v22, %v2575_v22  ;;  %v2445_v25 = vadd.f32 %v4884_v46, %v2220_v5  ;;  %v5279_v46 = vld [vmem:[#allocation13_spill] sm:$0xff] }
 0x21e   : > { %2704 = vst [vmem:[%s4914_s10 + $0x30] sm:$0xff] %v2570_v13  ;;  %v2735_v2 = vadd.f32 %v2734_v34, %v2570_v13  ;;  %v2773_v43 = vmul.f32 %v2570_v13, %v2570_v13  ;;  %v2803_v12 = vadd.f32 %v2802_v37, %v2772_v14  ;;  %v2585_v52 = vadd.f32 %v3148_v36, %v4833_v17  ;;  %v5283_v36 = vld [vmem:[#allocation8_spill] sm:$0xff] }
 0x21f   : > { %2720 = vst [vmem:[%s4914_s10 + $0xb0] sm:$0xff] %v4980_v35  ;;  %v4989_v47 = vadd.f32 %v3172_v60, %v2440_v8  ;;  %v2579_v19 = vpop.f32.mrf.mxu0  ;;  %v2659_v3 = vpop.f32.mrf.mxu1  ;;  %v2450_v17 = vadd.f32 %v4888_v27, %v2225_v1  ;;  %v2230_v27 = vadd.f32 %v4890_v10, %v4797_v56  ;;  %v2245_v59 = vadd.f32 %v4903_v53, %v5279_v46 }
 0x220   : > { %v2804_v6 = vadd.f32 %v2803_v12, %v2773_v43  ;;  %2707 = vst [vmem:[%s4914_s10 + $0x48] sm:$0xff] %v2585_v52  ;;  %v2580_v44 = vadd.f32 %v2579_v19, %v4830_v38  ;;  %v2736_v54 = vadd.f32 %v2735_v2, %v2575_v22  ;;  %v4998_v51 = vadd.f32 %v2659_v3, %v2435_v61  ;;  %v5284_v3 = vld [vmem:[#allocation10_spill] sm:$0xff] }
 0x221   : > { %2723 = vst [vmem:[%s4914_s10 + $0xc8] sm:$0xff] %v4989_v47  ;;  %v3151_v24 = vpop.f32.mrf.mxu0  ;;  %v3175_v21 = vpop.f32.mrf.mxu1  ;;  %v2776_v28 = vmul.f32 %v2585_v52, %v2585_v52  ;;  %v2455_v14 = vadd.f32 %v5281_v50, %v2230_v27  ;;  %v2470_v43 = vadd.f32 %v4905_v16, %v2245_v59  ;;  %v2785_v46 = vmul.f32 %v4939_v48, %v4939_v48 }
 0x222   : > { %2706 = vst [vmem:[%s4914_s10 + $0x40] sm:$0xff] %v2580_v44  ;;  %v2737_v55 = vadd.f32 %v2736_v54, %v2580_v44  ;;  %v2775_v58 = vmul.f32 %v2580_v44, %v2580_v44  ;;  %v2805_v15 = vadd.f32 %v2804_v6, %v2774_v9  ;;  %v2595_v38 = vadd.f32 %v3151_v24, %v4839_v63  ;;  %v5285_v24 = vld [vmem:[#allocation16_spill] sm:$0xff] }
 0x223   : > { %2722 = vst [vmem:[%s4914_s10 + $0xc0] sm:$0xff] %v4998_v51  ;;  %v5007_v30 = vadd.f32 %v3175_v21, %v2450_v17  ;;  %v2589_v29 = vpop.f32.mrf.mxu0  ;;  %v2669_v33 = vpop.f32.mrf.mxu1  ;;  %v2460_v63 = vadd.f32 %v4896_v20, %v2235_v57  ;;  %v5282_v20 = vld [vmem:[#allocation9_spill] sm:$0xff] }
 0x224   : > { %v2806_v26 = vadd.f32 %v2805_v15, %v2775_v58  ;;  %2709 = vst [vmem:[%s4914_s10 + $0x58] sm:$0xff] %v2595_v38  ;;  %v2590_v45 = vadd.f32 %v2589_v29, %v4836_v31  ;;  %v2738_v11 = vadd.f32 %v2737_v55, %v2585_v52  ;;  %v5016_v56 = vadd.f32 %v2669_v33, %v2445_v25 }
 0x225   : > { %2725 = vst [vmem:[%s4914_s10 + $0xd8] sm:$0xff] %v5007_v30  ;;  %v3154_v10 = vpop.f32.mrf.mxu0  ;;  %v3178_v18 = vpop.f32.mrf.mxu1  ;;  %v2240_v53 = vadd.f32 %v4898_v40, %v5282_v20  ;;  %v2778_v8 = vmul.f32 %v2595_v38, %v2595_v38  ;;  %v2783_v33 = vmul.f32 %v4924_v23, %v4924_v23 }
 0x226   : > { %2708 = vst [vmem:[%s4914_s10 + $0x50] sm:$0xff] %v2590_v45  ;;  %v2739_v22 = vadd.f32 %v2738_v11, %v2590_v45  ;;  %v2777_v0 = vmul.f32 %v2590_v45, %v2590_v45  ;;  %v2807_v4 = vadd.f32 %v2806_v26, %v2776_v28  ;;  %v2605_v31 = vadd.f32 %v3154_v10, %v5280_v41 }
 0x227   : > { %2724 = vst [vmem:[%s4914_s10 + $0xd0] sm:$0xff] %v5016_v56  ;;  %v5025_v37 = vadd.f32 %v3178_v18, %v2460_v63  ;;  %v2599_v13 = vpop.f32.mrf.mxu0  ;;  %v2679_v34 = vpop.f32.mrf.mxu1  ;;  %v2465_v6 = vadd.f32 %v4900_v7, %v2240_v53  ;;  %v2784_v45 = vmul.f32 %v4917_v32, %v4917_v32  ;;  %v2786_v18 = vmul.f32 %v4935_v62, %v4935_v62 }
 0x228   : > { %v2808_v1 = vadd.f32 %v2807_v4, %v2777_v0  ;;  %2711 = vst [vmem:[%s4914_s10 + $0x68] sm:$0xff] %v2605_v31  ;;  %v2600_v60 = vadd.f32 %v2599_v13, %v5283_v36  ;;  %v2740_v2 = vadd.f32 %v2739_v22, %v2595_v38  ;;  %v5032_v12 = vadd.f32 %v2679_v34, %v2455_v14 }
 0x229   : > { %2727 = vst [vmem:[%s4914_s10 + $0xe8] sm:$0xff] %v5025_v37  ;;  %v3157_v40 = vpop.f32.mrf.mxu0  ;;  %v3181_v52 = vpop.f32.mrf.mxu1  ;;  %v2780_v17 = vmul.f32 %v2605_v31, %v2605_v31 }
 0x22a   : > { %2710 = vst [vmem:[%s4914_s10 + $0x60] sm:$0xff] %v2600_v60  ;;  %v2741_v61 = vadd.f32 %v2740_v2, %v2600_v60  ;;  %v2779_v5 = vmul.f32 %v2600_v60, %v2600_v60  ;;  %v2809_v19 = vadd.f32 %v2808_v1, %v2778_v8  ;;  %v2615_v9 = vadd.f32 %v3157_v40, %v5284_v3 }
 0x22b   : > { %2726 = vst [vmem:[%s4914_s10 + $0xe0] sm:$0xff] %v5032_v12  ;;  %v5039_v16 = vadd.f32 %v3181_v52, %v2470_v43  ;;  %v2609_v44 = vpop.f32.mrf.mxu0  ;;  %v2689_v54 = vpop.f32.mrf.mxu1 }
 0x22c   : > { %v2810_v57 = vadd.f32 %v2809_v19, %v2779_v5  ;;  %2713 = vst [vmem:[%s4914_s10 + $0x78] sm:$0xff] %v2615_v9  ;;  %v2610_v21 = vadd.f32 %v2609_v44, %v5285_v24  ;;  %v2742_v55 = vadd.f32 %v2741_v61, %v2605_v31  ;;  %v2690_v58 = vadd.f32 %v2689_v54, %v2465_v6 }
 0x22d   : > { %2729 = vst [vmem:[%s4914_s10 + $0xf8] sm:$0xff] %v5039_v16  ;;  %v2782_v25 = vmul.f32 %v2615_v9, %v2615_v9 }
 0x22e   : > { %2712 = vst [vmem:[%s4914_s10 + $0x70] sm:$0xff] %v2610_v21  ;;  %v2743_v15 = vadd.f32 %v2742_v55, %v2610_v21  ;;  %v2781_v38 = vmul.f32 %v2610_v21, %v2610_v21  ;;  %v2811_v7 = vadd.f32 %v2810_v57, %v2780_v17  ;;  %2728 = vst [vmem:[%s4914_s10 + $0xf0] sm:$0xff] %v2690_v58 }
 0x22f   : > { %v2797_v3 = vmul.f32 %v2690_v58, %v2690_v58 }
 0x230   : > { %v2744_v27 = vadd.f32 %v2743_v15, %v2615_v9  ;;  %v2812_v29 = vadd.f32 %v2811_v7, %v2781_v38 }
 0x232   : > { %v2745_v28 = vadd.f32 %v2744_v27, %v4924_v23  ;;  %v2813_v26 = vadd.f32 %v2812_v29, %v2782_v25  ;;  %v2787_v23 = vmul.f32 %v4962_v49, %v4962_v49 }
 0x234   : > { %v2746_v11 = vadd.f32 %v2745_v28, %v4917_v32  ;;  %v2814_v63 = vadd.f32 %v2813_v26, %v2783_v33  ;;  %v2788_v32 = vmul.f32 %v4953_v39, %v4953_v39 }
 0x236   : > { %v2747_v59 = vadd.f32 %v2746_v11, %v4939_v48  ;;  %v2815_v10 = vadd.f32 %v2814_v63, %v2784_v45  ;;  %v2789_v48 = vmul.f32 %v4980_v35, %v4980_v35 }
 0x238   : > { %v2748_v22 = vadd.f32 %v2747_v59, %v4935_v62  ;;  %v2816_v0 = vadd.f32 %v2815_v10, %v2785_v46  ;;  %v2790_v62 = vmul.f32 %v4971_v42, %v4971_v42 }
 0x23a   : > { %v2749_v4 = vadd.f32 %v2748_v22, %v4962_v49  ;;  %v2817_v41 = vadd.f32 %v2816_v0, %v2786_v18  ;;  %v2791_v49 = vmul.f32 %v4998_v51, %v4998_v51 }
 0x23c   : > { %v2750_v31 = vadd.f32 %v2749_v4, %v4953_v39  ;;  %v2818_v50 = vadd.f32 %v2817_v41, %v2787_v23  ;;  %v2792_v39 = vmul.f32 %v4989_v47, %v4989_v47 }
 0x23e   : > { %v2819_v14 = vadd.f32 %v2818_v50, %v2788_v32  ;;  %v2751_v20 = vadd.f32 %v2750_v31, %v4980_v35  ;;  %v2793_v35 = vmul.f32 %v5016_v56, %v5016_v56 }
 0x240   : > { %v2752_v53 = vadd.f32 %v2751_v20, %v4971_v42  ;;  %v2820_v13 = vadd.f32 %v2819_v14, %v2789_v48  ;;  %v2794_v42 = vmul.f32 %v5007_v30, %v5007_v30 }
 0x242   : > { %v2753_v34 = vadd.f32 %v2752_v53, %v4998_v51  ;;  %v2821_v8 = vadd.f32 %v2820_v13, %v2790_v62  ;;  %v2795_v51 = vmul.f32 %v5032_v12, %v5032_v12 }
 0x244   : > { %v2754_v1 = vadd.f32 %v2753_v34, %v4989_v47  ;;  %v2822_v36 = vadd.f32 %v2821_v8, %v2791_v49  ;;  %v2796_v47 = vmul.f32 %v5025_v37, %v5025_v37 }
 0x246   : > { %v2755_v60 = vadd.f32 %v2754_v1, %v5016_v56  ;;  %v2823_v2 = vadd.f32 %v2822_v36, %v2792_v39 }
 0x248   : > { %v2756_v43 = vadd.f32 %v2755_v60, %v5007_v30  ;;  %v2824_v40 = vadd.f32 %v2823_v2, %v2793_v35  ;;  %v2798_v30 = vmul.f32 %v5039_v16, %v5039_v16 }
 0x24a   : > { %v2757_v52 = vadd.f32 %v2756_v43, %v5032_v12  ;;  %v2825_v61 = vadd.f32 %v2824_v40, %v2794_v42 }
 0x24c   : > { %v2758_v5 = vadd.f32 %v2757_v52, %v5025_v37  ;;  %v2826_v19 = vadd.f32 %v2825_v61, %v2795_v51 }
 0x24e   : > { %v2759_v56 = vadd.f32 %v2758_v5, %v2690_v58  ;;  %v2827_v9 = vadd.f32 %v2826_v19, %v2796_v47 }
 0x250   : > { %v2760_v6 = vadd.f32 %v2759_v56, %v5039_v16  ;;  %v2828_v44 = vadd.f32 %v2827_v9, %v2797_v3 }
 0x252   : > { %v2761_v54 = vrot.slane %v2760_v6, 4  ;;  %v2829_v12 = vadd.f32 %v2828_v44, %v2798_v30 }
 0x254   : > { %v2762_v17 = vadd.f32 %v2761_v54, %v2760_v6  ;;  %v2830_v57 = vrot.slane %v2829_v12, 4 }
 0x256   : > { %v2763_v24 = vrot.slane %v2762_v17, 2  ;;  %v2831_v21 = vadd.f32 %v2830_v57, %v2829_v12 }
 0x258   : > { %v2764_v55 = vadd.f32 %v2763_v24, %v2762_v17  ;;  %v2832_v37 = vrot.slane %v2831_v21, 2 }
 0x25a   : > { %v2765_v15 = vrot.slane %v2764_v55, 1  ;;  %v2833_v38 = vadd.f32 %v2832_v37, %v2831_v21 }
 0x25c   : > { %v2766_v58 = vadd.f32 %v2765_v15, %v2764_v55  ;;  %v2834_v7 = vrot.slane %v2833_v38, 1 }
 0x25e   : > { %v2835_v16 = vadd.f32 %v2834_v7, %v2833_v38  ;;  %2836 = vst [vmem:[%s265_s12] sm:$0x1] %v2766_v58 }
 0x260   : > { %2837 = vst [vmem:[%s268_s26] sm:$0x1] %v2835_v16 }
 0x261 PF: > { %s17_s21 = sadd.s32 1, %s3231_s21  }
 0x262   : > { %p14_p4 = scmp.ge.s32.totalorder %s17_s21, 4  }
 0x264   :  { %16 = sbr.rel (!%p14_p4) target bundleno = 1 (0x1), region = 90 }

</bundles_post_ra>
